<compile_context>
chip_gen: v7x
topology: tpu7x:2x2x1
jax: 0.10.0
libtpu: 0.0.40
codegen_flags: <defaults>
</compile_context>

<pallas_src>
import jax
import jax.numpy as jnp
from jax import lax
from jax.experimental import pallas as pl
from jax.experimental.pallas import tpu as pltpu

EPS = 1e-5          # nn.BatchNorm2d default eps
LANE = 128          # TPU lane width; channel dims padded to this for lane-dense stores
TILE_R = 256        # pixels (rows) per grid step; multiple of 8


def _round_up(x, m):
    return (x + m - 1) // m * m


# ---------------------------------------------------------------------------
# Pallas kernel 1: tiled matmul (bf16 MXU, f32 acc) + per-tile BN partial stats
# ---------------------------------------------------------------------------
def _matmul_stats_kernel(p_ref, w_ref, y_ref, stats_ref):
    # p_ref:     (TILE_R, K)  bf16 im2col / phase patches for this row tile
    # w_ref:     (K, C)       bf16 weights (C padded to a multiple of 128)
    # y_ref:     (TILE_R, C)  f32 pre-BN activations
    # stats_ref: (8, C)       f32 partial stats: row0 = sum, row1 = sum of squares
    acc = jnp.dot(p_ref[...], w_ref[...], preferred_element_type=jnp.float32)
    y_ref[...] = acc
    s = jnp.sum(acc, axis=0, keepdims=True)
    sq = jnp.sum(acc * acc, axis=0, keepdims=True)
    pad = jnp.zeros((6, acc.shape[1]), jnp.float32)
    stats_ref[...] = jnp.concatenate([s, sq, pad], axis=0)


def _matmul_stats(patches_bf16, w_bf16):
    rp, k = patches_bf16.shape
    c = w_bf16.shape[1]
    nt = rp // TILE_R
    flops = 2 * rp * k * c
    bytes_accessed = rp * k * 2 + k * c * 2 + rp * c * 4 + nt * 8 * c * 4
    return pl.pallas_call(
        _matmul_stats_kernel,
        out_shape=(jax.ShapeDtypeStruct((rp, c), jnp.float32),
                   jax.ShapeDtypeStruct((nt * 8, c), jnp.float32)),
        grid=(nt,),
        in_specs=[pl.BlockSpec((TILE_R, k), lambda i: (i, 0)),
                  pl.BlockSpec((k, c), lambda i: (0, 0))],
        out_specs=(pl.BlockSpec((TILE_R, c), lambda i: (i, 0)),
                   pl.BlockSpec((8, c), lambda i: (i, 0))),
        compiler_params=pltpu.CompilerParams(
            dimension_semantics=("parallel",),
            vmem_limit_bytes=32 * 1024 * 1024),
        cost_estimate=pl.CostEstimate(flops=flops, transcendentals=0,
                                      bytes_accessed=bytes_accessed),
    )(patches_bf16, w_bf16)


# ---------------------------------------------------------------------------
# Pallas kernel 2: normalize with finalized batch stats + PReLU, tiled over rows
# ---------------------------------------------------------------------------
def _bn_prelu_kernel(y_ref, mean_ref, inv_ref, alpha_ref, o_ref):
    # y_ref: (TILE_R, C) f32 ; mean_ref/inv_ref: (1, C) f32 ; alpha_ref: (1,) SMEM
    y = (y_ref[...] - mean_ref[...]) * inv_ref[...]
    a = alpha_ref[0]
    o_ref[...] = jnp.where(y >= 0.0, y, a * y)


def _bn_prelu(y, mean_row, inv_row, alpha):
    rp, c = y.shape
    nt = rp // TILE_R
    return pl.pallas_call(
        _bn_prelu_kernel,
        out_shape=jax.ShapeDtypeStruct((rp, c), jnp.float32),
        grid=(nt,),
        in_specs=[pl.BlockSpec((TILE_R, c), lambda i: (i, 0)),
                  pl.BlockSpec((1, c), lambda i: (0, 0)),
                  pl.BlockSpec((1, c), lambda i: (0, 0)),
                  pl.BlockSpec(memory_space=pltpu.MemorySpace.SMEM)],
        out_specs=pl.BlockSpec((TILE_R, c), lambda i: (i, 0)),
        compiler_params=pltpu.CompilerParams(
            dimension_semantics=("parallel",),
            vmem_limit_bytes=32 * 1024 * 1024),
    )(y, mean_row, inv_row, alpha)


# ---------------------------------------------------------------------------
# JAX glue: patch construction, stats finalization, weight reshuffles
# ---------------------------------------------------------------------------
def _im2col_3x3(xp, H, W):
    # xp: (N, H+2, W+2, C) -> (N*H*W, 9*C), tap-major then channel.
    N, C = xp.shape[0], xp.shape[3]
    cols = [xp[:, kh:kh + H, kw:kw + W, :] for kh in range(3) for kw in range(3)]
    patches = jnp.stack(cols, axis=3)          # (N, H, W, 9, C)
    return patches.reshape(N * H * W, 9 * C)


def _finalize_stats(stats, count, phases):
    # stats: (num_tiles*8, phases*C); per tile row0=sum, row1=sumsq (per column).
    nt8, pc = stats.shape
    c = pc // phases
    st = stats.reshape(nt8 // 8, 8, phases, c)
    s = jnp.sum(st[:, 0], axis=(0, 1))                      # (C,)
    sq = jnp.sum(st[:, 1], axis=(0, 1))                     # (C,)
    mean = s / count
    var = jnp.maximum(sq / count - mean * mean, 0.0)
    inv = lax.rsqrt(var + EPS)
    mean_row = jnp.tile(mean, phases).reshape(1, pc)
    inv_row = jnp.tile(inv, phases).reshape(1, pc)
    return mean_row, inv_row


def _build_deconv_phase_weights(w2, cout_p):
    # w2: (Cmid, Cout, 3, 3) [PyTorch ConvTranspose2d layout (in, out, kh, kw)].
    # Combined matrix mapping the 2x2 input neighborhood of each output pixel to
    # the 4 sub-pixel phases of ConvTranspose(k=3, s=2, p=1, op=1).
    cmid, cout = w2.shape[0], w2.shape[1]

    def M(kh, kw):                    # flipped-kernel tap as a (Cmid, Cout) matrix
        return w2[:, :, 2 - kh, 2 - kw]

    Z = jnp.zeros((cmid, cout), w2.dtype)
    # rows: neighbor (dh, dw) in [(0,0),(0,1),(1,0),(1,1)]
    # cols: phase   (ph, pw) in [(0,0),(0,1),(1,0),(1,1)]
    table = [
        [M(1, 1), M(1, 0), M(0, 1), M(0, 0)],   # neighbor (0, 0)
        [Z,       M(1, 2), Z,       M(0, 2)],   # neighbor (0, 1)
        [Z,       Z,       M(2, 1), M(2, 0)],   # neighbor (1, 0)
        [Z,       Z,       Z,       M(2, 2)],   # neighbor (1, 1)
    ]
    rows = [jnp.concatenate(r, axis=1) for r in table]       # each (Cmid, 4*Cout)
    wc = jnp.concatenate(rows, axis=0)                        # (4*Cmid, 4*Cout)
    wc = wc.reshape(4 * cmid, 4, cout)
    wc = jnp.pad(wc, ((0, 0), (0, 0), (0, cout_p - cout)))    # lane-pad each phase
    return wc.reshape(4 * cmid, 4 * cout_p).astype(jnp.bfloat16)


def decoder_up_block(x_nchw, params):
    """Forward pass of _DecoderUpBlock. x_nchw: (N, Cin, H, W) -> (N, Cout, 2H, 2W)."""
    w1 = params["conv_w"]       # (Cmid, Cin, 3, 3)  Conv2d weight (OIHW), no bias
    w2 = params["deconv_w"]     # (Cmid, Cout, 3, 3) ConvTranspose2d weight
    # params["deconv_b"] is intentionally unused: bias cancels under BatchNorm.
    alpha = params["prelu_a"].astype(jnp.float32)   # (1,) shared PReLU slope

    x = jnp.transpose(x_nchw, (0, 2, 3, 1)).astype(jnp.float32)   # NHWC
    N, H, W, Cin = x.shape
    Cmid = w1.shape[0]
    Cout = w2.shape[1]
    Cmid_p = _round_up(Cmid, LANE)
    Cout_p = _round_up(Cout, LANE)

    # --- stage 1: ReflectionPad2d(1) + Conv2d 3x3 (valid) + BN + PReLU ---------
    xp = jnp.pad(x, ((0, 0), (1, 1), (1, 1), (0, 0)), mode="reflect")
    p1 = _im2col_3x3(xp, H, W)                          # (R1, 9*Cin)
    R1 = p1.shape[0]
    R1p = _round_up(R1, TILE_R)
    p1 = jnp.pad(p1, ((0, R1p - R1), (0, 0))).astype(jnp.bfloat16)
    w1_mat = jnp.transpose(w1, (2, 3, 1, 0)).reshape(9 * Cin, Cmid)
    w1_mat = jnp.pad(w1_mat, ((0, 0), (0, Cmid_p - Cmid))).astype(jnp.bfloat16)

    y1, st1 = _matmul_stats(p1, w1_mat)                 # (R1p, Cmid_p), stats
    mean1, inv1 = _finalize_stats(st1, count=R1, phases=1)
    y1 = _bn_prelu(y1, mean1, inv1, alpha)
    y1 = y1[:R1, :Cmid].reshape(N, H, W, Cmid)

    # --- stage 2: ConvTranspose2d(k3, s2, p1, op1) as 4-phase matmul + BN + PReLU
    y1p = jnp.pad(y1, ((0, 0), (0, 1), (0, 1), (0, 0)))           # zero halo (bottom/right)
    nbrs = [y1p[:, dh:dh + H, dw:dw + W, :] for dh in (0, 1) for dw in (0, 1)]
    p2 = jnp.concatenate(nbrs, axis=-1).reshape(N * H * W, 4 * Cmid)
    R2 = p2.shape[0]
    R2p = _round_up(R2, TILE_R)
    p2 = jnp.pad(p2, ((0, R2p - R2), (0, 0))).astype(jnp.bfloat16)
    w2_comb = _build_deconv_phase_weights(w2, Cout_p)             # (4*Cmid, 4*Cout_p)

    y2, st2 = _matmul_stats(p2, w2_comb)                # (R2p, 4*Cout_p)
    mean2, inv2 = _finalize_stats(st2, count=4 * R2, phases=4)
    y2 = _bn_prelu(y2, mean2, inv2, alpha)

    # depth-to-space: columns are (phase_h, phase_w, channel)
    y2 = y2[:R2].reshape(N, H, W, 2, 2, Cout_p)[..., :Cout]
    y2 = jnp.transpose(y2, (0, 1, 3, 2, 4, 5)).reshape(N, 2 * H, 2 * W, Cout)
    return jnp.transpose(y2, (0, 3, 1, 2))              # back to NCHW


# ---------------------------------------------------------------------------
# Pure-JAX reference (lax convs) for correctness checking.
# Conv operands are cast to bf16 to mirror the kernel's MXU precision so the
# comparison isolates structural correctness with a tight tolerance.
# ---------------------------------------------------------------------------
def _bn_train(y):
    mean = jnp.mean(y, axis=(0, 2, 3), keepdims=True)
    var = jnp.mean((y - mean) ** 2, axis=(0, 2, 3), keepdims=True)
    return (y - mean) / jnp.sqrt(var + EPS)


def _prelu(y, a):
    return jnp.where(y >= 0.0, y, a[0] * y)


def reference(x_nchw, params):
    w1, w2, b2, a = (params["conv_w"], params["deconv_w"],
                     params["deconv_b"], params["prelu_a"])
    xp = jnp.pad(x_nchw.astype(jnp.bfloat16), ((0, 0), (0, 0), (1, 1), (1, 1)),
                 mode="reflect")
    y = lax.conv_general_dilated(xp, w1.astype(jnp.bfloat16), (1, 1), "VALID",
                                 dimension_numbers=("NCHW", "OIHW", "NCHW"),
                                 preferred_element_type=jnp.float32)
    y = _prelu(_bn_train(y), a)
    w2c = jnp.transpose(w2[:, :, ::-1, ::-1], (1, 0, 2, 3)).astype(jnp.bfloat16)
    y2 = lax.conv_general_dilated(y.astype(jnp.bfloat16), w2c, (1, 1),
                                  padding=[(1, 2), (1, 2)], lhs_dilation=(2, 2),
                                  dimension_numbers=("NCHW", "OIHW", "NCHW"),
                                  preferred_element_type=jnp.float32)
    y2 = y2 + b2.reshape(1, -1, 1, 1)          # cancelled by BN; kept to prove it
    return _prelu(_bn_train(y2), a)


# ---------------------------------------------------------------------------
if __name__ == "__main__":
    N, Cin, H, W = 2, 4, 16, 16
    Cmid, Cout = 8, 4

    key = jax.random.PRNGKey(0)
    k1, k2, k3, k4 = jax.random.split(key, 4)
    params = {
        "conv_w":   jax.random.normal(k1, (Cmid, Cin, 3, 3), jnp.float32) * 0.1,
        "deconv_w": jax.random.normal(k2, (Cmid, Cout, 3, 3), jnp.float32) * 0.1,
        "deconv_b": jax.random.normal(k3, (Cout,), jnp.float32) * 0.1,
        "prelu_a":  jnp.array([0.25], jnp.float32),
    }
    x = jax.random.normal(k4, (N, Cin, H, W), jnp.float32)

    fwd = jax.jit(decoder_up_block)
    out = jax.block_until_ready(fwd(x, params))
    assert out.shape == (N, Cout, 2 * H, 2 * W), out.shape

    ref = jax.block_until_ready(reference(x, params))
    max_err = float(jnp.max(jnp.abs(out - ref)))
    if not jnp.allclose(out, ref, atol=1e-2, rtol=1e-2):
        raise AssertionError(f"mismatch: max abs err {max_err}")

    print("KERNEL_OK")
</pallas_src>

<mosaic_0001>
module attributes {stable_mosaic.version = 11 : i64} {
  func.func @_matmul_stats_kernel(%arg0: i32, %arg1: memref<256x36xbf16, #tpu.memory_space<vmem>>, %arg2: memref<36x128xbf16, #tpu.memory_space<vmem>>, %arg3: memref<256x128xf32, #tpu.memory_space<vmem>>, %arg4: memref<8x128xf32, #tpu.memory_space<vmem>>) attributes {dimension_semantics = [#tpu.dimension_semantics<parallel>], iteration_bounds = array<i64: 2>, scalar_prefetch = 0 : i64, scratch_operands = 0 : i64, tpu.core_type = #tpu.core_type<tc>, window_params = [{transform_indices = @transform_0, window_bounds = array<i64: 256, 36>}, {pipeline_mode = #tpu.pipeline_mode<synchronous>, transform_indices = @transform_1, window_bounds = array<i64: 36, 128>}, {transform_indices = @transform_2, window_bounds = array<i64: 256, 128>}, {transform_indices = @transform_3, window_bounds = array<i64: 8, 128>}]} {
    %c0 = arith.constant 0 : index
    %c0_0 = arith.constant 0 : index
    %0 = vector.load %arg1[%c0, %c0_0] : memref<256x36xbf16, #tpu.memory_space<vmem>>, vector<256x36xbf16>
    %c0_1 = arith.constant 0 : index
    %c0_2 = arith.constant 0 : index
    %1 = vector.load %arg2[%c0_1, %c0_2] : memref<36x128xbf16, #tpu.memory_space<vmem>>, vector<36x128xbf16>
    %cst = arith.constant dense<0.000000e+00> : vector<256x128xf32>
    %2 = tpu.matmul %0, %1, %cst {dimension_numbers = #tpu.dot_dimension_numbers<[1], [0], [0], [1], [0, 0, 1, 1], [], []>} : vector<256x36xbf16>, vector<36x128xbf16>, vector<256x128xf32> -> vector<256x128xf32>
    %c0_3 = arith.constant 0 : index
    %c0_4 = arith.constant 0 : index
    %3 = vector.load %arg3[%c0_3, %c0_4] : memref<256x128xf32, #tpu.memory_space<vmem>>, vector<256x128xf32>
    tpu.vector_store %arg3[%c0_3, %c0_4], %2 {strides = array<i32>} : memref<256x128xf32, #tpu.memory_space<vmem>>, vector<256x128xf32>,
    %cst_5 = arith.constant dense<0.000000e+00> : vector<128xf32>
    %4 = vector.multi_reduction <add>, %2, %cst_5 [0] : vector<256x128xf32> to vector<128xf32>
    %5 = vector.shape_cast %4 : vector<128xf32> to vector<1x128xf32>
    %6 = arith.mulf %2, %2 : vector<256x128xf32>
    %cst_6 = arith.constant dense<0.000000e+00> : vector<128xf32>
    %7 = vector.multi_reduction <add>, %6, %cst_6 [0] : vector<256x128xf32> to vector<128xf32>
    %8 = vector.shape_cast %7 : vector<128xf32> to vector<1x128xf32>
    %cst_7 = arith.constant 0.000000e+00 : f32
    %9 = vector.broadcast %cst_7 : f32 to vector<6x128xf32>
    %10 = tpu.concatenate %5, %8, %9 in 0 : vector<1x128xf32>, vector<1x128xf32>, vector<6x128xf32> -> vector<8x128xf32>
    %c0_8 = arith.constant 0 : index
    %c0_9 = arith.constant 0 : index
    %11 = vector.load %arg4[%c0_8, %c0_9] : memref<8x128xf32, #tpu.memory_space<vmem>>, vector<8x128xf32>
    tpu.vector_store %arg4[%c0_8, %c0_9], %10 {strides = array<i32>} : memref<8x128xf32, #tpu.memory_space<vmem>>, vector<8x128xf32>,
    return
  }
  func.func @transform_0(%arg0: i32) -> (i32, i32) {
    %c0_i32 = arith.constant 0 : i32
    %c0_i32_0 = arith.constant 0 : i32
    return %arg0, %c0_i32 : i32, i32
  }
  func.func @transform_1(%arg0: i32) -> (i32, i32) {
    %c0_i32 = arith.constant 0 : i32
    %c0_i32_0 = arith.constant 0 : i32
    %c0_i32_1 = arith.constant 0 : i32
    return %c0_i32, %c0_i32_0 : i32, i32
  }
  func.func @transform_2(%arg0: i32) -> (i32, i32) {
    %c0_i32 = arith.constant 0 : i32
    %c0_i32_0 = arith.constant 0 : i32
    return %arg0, %c0_i32 : i32, i32
  }
  func.func @transform_3(%arg0: i32) -> (i32, i32) {
    %c0_i32 = arith.constant 0 : i32
    %c0_i32_0 = arith.constant 0 : i32
    return %arg0, %c0_i32 : i32, i32
  }
}

module attributes {stable_mosaic.version = 11 : i64} {
  func.func @_bn_prelu_kernel(%arg0: i32, %arg1: memref<256x128xf32, #tpu.memory_space<vmem>>, %arg2: memref<1x128xf32, #tpu.memory_space<vmem>>, %arg3: memref<1x128xf32, #tpu.memory_space<vmem>>, %arg4: memref<1xf32, #tpu.memory_space<smem>>, %arg5: memref<256x128xf32, #tpu.memory_space<vmem>>) attributes {dimension_semantics = [#tpu.dimension_semantics<parallel>], iteration_bounds = array<i64: 2>, scalar_prefetch = 0 : i64, scratch_operands = 0 : i64, tpu.core_type = #tpu.core_type<tc>, window_params = [{transform_indices = @transform_0, window_bounds = array<i64: 256, 128>}, {pipeline_mode = #tpu.pipeline_mode<synchronous>, transform_indices = @transform_1, window_bounds = array<i64: 1, 128>}, {pipeline_mode = #tpu.pipeline_mode<synchronous>, transform_indices = @transform_2, window_bounds = array<i64: 1, 128>}, {transform_indices = @transform_3, window_bounds = array<i64: 1>}, {transform_indices = @transform_4, window_bounds = array<i64: 256, 128>}]} {
    %c0 = arith.constant 0 : index
    %c0_0 = arith.constant 0 : index
    %0 = vector.load %arg1[%c0, %c0_0] : memref<256x128xf32, #tpu.memory_space<vmem>>, vector<256x128xf32>
    %c0_1 = arith.constant 0 : index
    %c0_2 = arith.constant 0 : index
    %1 = vector.load %arg2[%c0_1, %c0_2] : memref<1x128xf32, #tpu.memory_space<vmem>>, vector<1x128xf32>
    %2 = vector.broadcast %1 : vector<1x128xf32> to vector<256x128xf32>
    %3 = arith.subf %0, %2 : vector<256x128xf32>
    %c0_3 = arith.constant 0 : index
    %c0_4 = arith.constant 0 : index
    %4 = vector.load %arg3[%c0_3, %c0_4] : memref<1x128xf32, #tpu.memory_space<vmem>>, vector<1x128xf32>
    %5 = vector.broadcast %4 : vector<1x128xf32> to vector<256x128xf32>
    %6 = arith.mulf %3, %5 : vector<256x128xf32>
    %c0_5 = arith.constant 0 : index
    %7 = memref.load %arg4[%c0_5] : memref<1xf32, #tpu.memory_space<smem>>
    %cst = arith.constant 0.000000e+00 : f32
    %8 = vector.broadcast %cst : f32 to vector<256x128xf32>
    %9 = arith.cmpf oge, %6, %8 : vector<256x128xf32>
    %10 = vector.broadcast %7 : f32 to vector<256x128xf32>
    %11 = arith.mulf %10, %6 : vector<256x128xf32>
    %12 = arith.select %9, %6, %11 : vector<256x128xi1>, vector<256x128xf32>
    %c0_6 = arith.constant 0 : index
    %c0_7 = arith.constant 0 : index
    %13 = vector.load %arg5[%c0_6, %c0_7] : memref<256x128xf32, #tpu.memory_space<vmem>>, vector<256x128xf32>
    tpu.vector_store %arg5[%c0_6, %c0_7], %12 {strides = array<i32>} : memref<256x128xf32, #tpu.memory_space<vmem>>, vector<256x128xf32>,
    return
  }
  func.func @transform_0(%arg0: i32) -> (i32, i32) {
    %c0_i32 = arith.constant 0 : i32
    %c0_i32_0 = arith.constant 0 : i32
    return %arg0, %c0_i32 : i32, i32
  }
  func.func @transform_1(%arg0: i32) -> (i32, i32) {
    %c0_i32 = arith.constant 0 : i32
    %c0_i32_0 = arith.constant 0 : i32
    %c0_i32_1 = arith.constant 0 : i32
    return %c0_i32, %c0_i32_0 : i32, i32
  }
  func.func @transform_2(%arg0: i32) -> (i32, i32) {
    %c0_i32 = arith.constant 0 : i32
    %c0_i32_0 = arith.constant 0 : i32
    %c0_i32_1 = arith.constant 0 : i32
    return %c0_i32, %c0_i32_0 : i32, i32
  }
  func.func @transform_3(%arg0: i32) -> i32 {
    %c0_i32 = arith.constant 0 : i32
    %c0_i32_0 = arith.constant 0 : i32
    return %c0_i32 : i32
  }
  func.func @transform_4(%arg0: i32) -> (i32, i32) {
    %c0_i32 = arith.constant 0 : i32
    %c0_i32_0 = arith.constant 0 : i32
    return %arg0, %c0_i32 : i32, i32
  }
}

module attributes {stable_mosaic.version = 11 : i64} {
  func.func @_matmul_stats_kernel(%arg0: i32, %arg1: memref<256x32xbf16, #tpu.memory_space<vmem>>, %arg2: memref<32x512xbf16, #tpu.memory_space<vmem>>, %arg3: memref<256x512xf32, #tpu.memory_space<vmem>>, %arg4: memref<8x512xf32, #tpu.memory_space<vmem>>) attributes {dimension_semantics = [#tpu.dimension_semantics<parallel>], iteration_bounds = array<i64: 2>, scalar_prefetch = 0 : i64, scratch_operands = 0 : i64, tpu.core_type = #tpu.core_type<tc>, window_params = [{transform_indices = @transform_0, window_bounds = array<i64: 256, 32>}, {pipeline_mode = #tpu.pipeline_mode<synchronous>, transform_indices = @transform_1, window_bounds = array<i64: 32, 512>}, {transform_indices = @transform_2, window_bounds = array<i64: 256, 512>}, {transform_indices = @transform_3, window_bounds = array<i64: 8, 512>}]} {
    %c0 = arith.constant 0 : index
    %c0_0 = arith.constant 0 : index
    %0 = vector.load %arg1[%c0, %c0_0] : memref<256x32xbf16, #tpu.memory_space<vmem>>, vector<256x32xbf16>
    %c0_1 = arith.constant 0 : index
    %c0_2 = arith.constant 0 : index
    %1 = vector.load %arg2[%c0_1, %c0_2] : memref<32x512xbf16, #tpu.memory_space<vmem>>, vector<32x512xbf16>
    %cst = arith.constant dense<0.000000e+00> : vector<256x512xf32>
    %2 = tpu.matmul %0, %1, %cst {dimension_numbers = #tpu.dot_dimension_numbers<[1], [0], [0], [1], [0, 0, 1, 1], [], []>} : vector<256x32xbf16>, vector<32x512xbf16>, vector<256x512xf32> -> vector<256x512xf32>
    %c0_3 = arith.constant 0 : index
    %c0_4 = arith.constant 0 : index
    %3 = vector.load %arg3[%c0_3, %c0_4] : memref<256x512xf32, #tpu.memory_space<vmem>>, vector<256x512xf32>
    tpu.vector_store %arg3[%c0_3, %c0_4], %2 {strides = array<i32>} : memref<256x512xf32, #tpu.memory_space<vmem>>, vector<256x512xf32>,
    %cst_5 = arith.constant dense<0.000000e+00> : vector<512xf32>
    %4 = vector.multi_reduction <add>, %2, %cst_5 [0] : vector<256x512xf32> to vector<512xf32>
    %5 = vector.shape_cast %4 : vector<512xf32> to vector<1x512xf32>
    %6 = arith.mulf %2, %2 : vector<256x512xf32>
    %cst_6 = arith.constant dense<0.000000e+00> : vector<512xf32>
    %7 = vector.multi_reduction <add>, %6, %cst_6 [0] : vector<256x512xf32> to vector<512xf32>
    %8 = vector.shape_cast %7 : vector<512xf32> to vector<1x512xf32>
    %cst_7 = arith.constant 0.000000e+00 : f32
    %9 = vector.broadcast %cst_7 : f32 to vector<6x512xf32>
    %10 = tpu.concatenate %5, %8, %9 in 0 : vector<1x512xf32>, vector<1x512xf32>, vector<6x512xf32> -> vector<8x512xf32>
    %c0_8 = arith.constant 0 : index
    %c0_9 = arith.constant 0 : index
    %11 = vector.load %arg4[%c0_8, %c0_9] : memref<8x512xf32, #tpu.memory_space<vmem>>, vector<8x512xf32>
    tpu.vector_store %arg4[%c0_8, %c0_9], %10 {strides = array<i32>} : memref<8x512xf32, #tpu.memory_space<vmem>>, vector<8x512xf32>,
    return
  }
  func.func @transform_0(%arg0: i32) -> (i32, i32) {
    %c0_i32 = arith.constant 0 : i32
    %c0_i32_0 = arith.constant 0 : i32
    return %arg0, %c0_i32 : i32, i32
  }
  func.func @transform_1(%arg0: i32) -> (i32, i32) {
    %c0_i32 = arith.constant 0 : i32
    %c0_i32_0 = arith.constant 0 : i32
    %c0_i32_1 = arith.constant 0 : i32
    return %c0_i32, %c0_i32_0 : i32, i32
  }
  func.func @transform_2(%arg0: i32) -> (i32, i32) {
    %c0_i32 = arith.constant 0 : i32
    %c0_i32_0 = arith.constant 0 : i32
    return %arg0, %c0_i32 : i32, i32
  }
  func.func @transform_3(%arg0: i32) -> (i32, i32) {
    %c0_i32 = arith.constant 0 : i32
    %c0_i32_0 = arith.constant 0 : i32
    return %arg0, %c0_i32 : i32, i32
  }
}

module attributes {stable_mosaic.version = 11 : i64} {
  func.func @_bn_prelu_kernel(%arg0: i32, %arg1: memref<256x512xf32, #tpu.memory_space<vmem>>, %arg2: memref<1x512xf32, #tpu.memory_space<vmem>>, %arg3: memref<1x512xf32, #tpu.memory_space<vmem>>, %arg4: memref<1xf32, #tpu.memory_space<smem>>, %arg5: memref<256x512xf32, #tpu.memory_space<vmem>>) attributes {dimension_semantics = [#tpu.dimension_semantics<parallel>], iteration_bounds = array<i64: 2>, scalar_prefetch = 0 : i64, scratch_operands = 0 : i64, tpu.core_type = #tpu.core_type<tc>, window_params = [{transform_indices = @transform_0, window_bounds = array<i64: 256, 512>}, {pipeline_mode = #tpu.pipeline_mode<synchronous>, transform_indices = @transform_1, window_bounds = array<i64: 1, 512>}, {pipeline_mode = #tpu.pipeline_mode<synchronous>, transform_indices = @transform_2, window_bounds = array<i64: 1, 512>}, {transform_indices = @transform_3, window_bounds = array<i64: 1>}, {transform_indices = @transform_4, window_bounds = array<i64: 256, 512>}]} {
    %c0 = arith.constant 0 : index
    %c0_0 = arith.constant 0 : index
    %0 = vector.load %arg1[%c0, %c0_0] : memref<256x512xf32, #tpu.memory_space<vmem>>, vector<256x512xf32>
    %c0_1 = arith.constant 0 : index
    %c0_2 = arith.constant 0 : index
    %1 = vector.load %arg2[%c0_1, %c0_2] : memref<1x512xf32, #tpu.memory_space<vmem>>, vector<1x512xf32>
    %2 = vector.broadcast %1 : vector<1x512xf32> to vector<256x512xf32>
    %3 = arith.subf %0, %2 : vector<256x512xf32>
    %c0_3 = arith.constant 0 : index
    %c0_4 = arith.constant 0 : index
    %4 = vector.load %arg3[%c0_3, %c0_4] : memref<1x512xf32, #tpu.memory_space<vmem>>, vector<1x512xf32>
    %5 = vector.broadcast %4 : vector<1x512xf32> to vector<256x512xf32>
    %6 = arith.mulf %3, %5 : vector<256x512xf32>
    %c0_5 = arith.constant 0 : index
    %7 = memref.load %arg4[%c0_5] : memref<1xf32, #tpu.memory_space<smem>>
    %cst = arith.constant 0.000000e+00 : f32
    %8 = vector.broadcast %cst : f32 to vector<256x512xf32>
    %9 = arith.cmpf oge, %6, %8 : vector<256x512xf32>
    %10 = vector.broadcast %7 : f32 to vector<256x512xf32>
    %11 = arith.mulf %10, %6 : vector<256x512xf32>
    %12 = arith.select %9, %6, %11 : vector<256x512xi1>, vector<256x512xf32>
    %c0_6 = arith.constant 0 : index
    %c0_7 = arith.constant 0 : index
    %13 = vector.load %arg5[%c0_6, %c0_7] : memref<256x512xf32, #tpu.memory_space<vmem>>, vector<256x512xf32>
    tpu.vector_store %arg5[%c0_6, %c0_7], %12 {strides = array<i32>} : memref<256x512xf32, #tpu.memory_space<vmem>>, vector<256x512xf32>,
    return
  }
  func.func @transform_0(%arg0: i32) -> (i32, i32) {
    %c0_i32 = arith.constant 0 : i32
    %c0_i32_0 = arith.constant 0 : i32
    return %arg0, %c0_i32 : i32, i32
  }
  func.func @transform_1(%arg0: i32) -> (i32, i32) {
    %c0_i32 = arith.constant 0 : i32
    %c0_i32_0 = arith.constant 0 : i32
    %c0_i32_1 = arith.constant 0 : i32
    return %c0_i32, %c0_i32_0 : i32, i32
  }
  func.func @transform_2(%arg0: i32) -> (i32, i32) {
    %c0_i32 = arith.constant 0 : i32
    %c0_i32_0 = arith.constant 0 : i32
    %c0_i32_1 = arith.constant 0 : i32
    return %c0_i32, %c0_i32_0 : i32, i32
  }
  func.func @transform_3(%arg0: i32) -> i32 {
    %c0_i32 = arith.constant 0 : i32
    %c0_i32_0 = arith.constant 0 : i32
    return %c0_i32 : i32
  }
  func.func @transform_4(%arg0: i32) -> (i32, i32) {
    %c0_i32 = arith.constant 0 : i32
    %c0_i32_0 = arith.constant 0 : i32
    return %arg0, %c0_i32 : i32, i32
  }
}

</mosaic_0001>

<bundles_post_ra>
// kernel: decoder_up_block.5
= control target key start
LH: loop header
LB: loop body
LE: loop exit
PB: predicated region body
PF: predicated region fallthrough
CT: control target
= control target key end

     0   :  { %s555_s17 = smov 0   ;;  %s751_s0 = inlined_call_operand.vmem [shape: f32[512,128], index: 0, kind: input, shape index: {}]   ;;  %s752_s1 = inlined_call_operand.vmem [shape: f32[1,128], index: 1, kind: input, shape index: {}]   ;;  %s753_s2 = inlined_call_operand.vmem [shape: f32[1,128], index: 2, kind: input, shape index: {}]   ;;  %s754_s3 = inlined_call_operand.<no memory space> [shape: f32[1], index: 3, kind: input, shape index: {}]   ;;  %s755_s4 = inlined_call_operand.vmem [shape: f32[512,128], index: 4, kind: output, shape index: {}]  }
   0x1   :  { %9 = sst [smem:[#allocation2]] %s754_s3 }
   0x2 LB: > { %s498_s18 = sadd.s32 4294967295, %s525_s17   ;;  %p502_p0 = scmp.ge.s32.totalorder %s525_s17, 1  ;;  %s525_s17 = sphi %s555_s17, %s15_s17  }
   0x3   : > { %p164_p1 = scmp.lt.s32.totalorder %s525_s17, 3 }
   0x5   : > { %p165_p2 = pnand %p502_p0, %p164_p1 }
   0x6   : > { %s503_s19 = sshll.u32 (!%p165_p2), %s498_s18, 5  ;;  %s312_s20 = sld [smem:[#allocation2]] (!%p165_p2)  ;;  %v569_v0 = vld [vmem:[%s752_s1] ss:$0 sm:$0xff] (!%p165_p2) }
   0x7   : > { %168 = sbr.rel (%p165_p2) target bundleno = 63 (0x3f), region = 36  ;;  %p191_p3 = scmp.lt.s32.totalorder (!%p165_p2), %s503_s19, 63  ;;  %v579_v1 = vld [vmem:[%s753_s2] ss:$0 sm:$0xff] (!%p165_p2) }
   0xc   : > { %v590_v11 = vstv (!%p165_p2), %s312_s20 }
   0xe   : > { %s757_s19 = smov (!%p191_p3, %s503_s19), 63 }
   0xf   : > { %s504_s3 = sshll.u32 %s757_s19, 3 }
  0x10   : > { %s574_s25 = scalar_lea.vmem %s751_s0, %s504_s3  ;;  %s608_s30 = scalar_lea.vmem %s755_s4, %s504_s3 }
  0x11   : > { %v202_v2 = vld [vmem:[%s574_s25] sm:$0xff]  ;;  %v203_v3 = vld [vmem:[%s574_s25 + $0x8] sm:$0xff]  ;;  %v204_v4 = vld [vmem:[%s574_s25 + $0x10] sm:$0xff] }
  0x12   : > { %v241_v5 = vsub.f32 %v202_v2, %v569_v0  ;;  %v242_v6 = vsub.f32 %v203_v3, %v569_v0  ;;  %v243_v7 = vsub.f32 %v204_v4, %v569_v0  ;;  %v205_v8 = vld [vmem:[%s574_s25 + $0x18] sm:$0xff]  ;;  %v206_v9 = vld [vmem:[%s574_s25 + $0x20] sm:$0xff]  ;;  %v207_v10 = vld [vmem:[%s574_s25 + $0x28] sm:$0xff] }
  0x13   : > { %v244_v12 = vsub.f32 %v205_v8, %v569_v0  ;;  %v245_v13 = vsub.f32 %v206_v9, %v569_v0  ;;  %v246_v14 = vsub.f32 %v207_v10, %v569_v0  ;;  %v208_v15 = vld [vmem:[%s574_s25 + $0x30] sm:$0xff]  ;;  %v209_v16 = vld [vmem:[%s574_s25 + $0x38] sm:$0xff]  ;;  %v210_v29 = vld [vmem:[%s574_s25 + $0x40] sm:$0xff] }
  0x14   : > { %v280_v17 = vmul.f32 %v579_v1, %v241_v5  ;;  %v281_v18 = vmul.f32 %v579_v1, %v242_v6  ;;  %v282_v19 = vmul.f32 %v579_v1, %v243_v7  ;;  %v247_v20 = vsub.f32 %v208_v15, %v569_v0  ;;  %v211_v33 = vld [vmem:[%s574_s25 + $0x48] sm:$0xff]  ;;  %v212_v34 = vld [vmem:[%s574_s25 + $0x50] sm:$0xff]  ;;  %v213_v35 = vld [vmem:[%s574_s25 + $0x58] sm:$0xff] }
  0x15   : > { %v283_v21 = vmul.f32 %v579_v1, %v244_v12  ;;  %v284_v22 = vmul.f32 %v579_v1, %v245_v13  ;;  %v285_v23 = vmul.f32 %v579_v1, %v246_v14  ;;  %v248_v24 = vsub.f32 %v209_v16, %v569_v0  ;;  %v214_v47 = vld [vmem:[%s574_s25 + $0x60] sm:$0xff]  ;;  %v215_v48 = vld [vmem:[%s574_s25 + $0x68] sm:$0xff]  ;;  %v216_v61 = vld [vmem:[%s574_s25 + $0x70] sm:$0xff] }
  0x16   : > { %vm313_vm0 = vcmp.ge.f32.partialorder %v280_v17, 0.0  ;;  %v346_v25 = vmul.f32 %v590_v11, %v280_v17  ;;  %vm314_vm1 = vcmp.ge.f32.partialorder %v281_v18, 0.0  ;;  %v347_v26 = vmul.f32 %v590_v11, %v281_v18  ;;  %v217_v62 = vld [vmem:[%s574_s25 + $0x78] sm:$0xff]  ;;  %v218_v7 = vld [vmem:[%s574_s25 + $0x80] sm:$0xff]  ;;  %v219_v8 = vld [vmem:[%s574_s25 + $0x88] sm:$0xff] }
  0x17   : > { %vm315_vm2 = vcmp.ge.f32.partialorder %v282_v19, 0.0  ;;  %v348_v27 = vmul.f32 %v590_v11, %v282_v19  ;;  %vm316_vm3 = vcmp.ge.f32.partialorder %v283_v21, 0.0  ;;  %v349_v28 = vmul.f32 %v590_v11, %v283_v21  ;;  %v220_v14 = vld [vmem:[%s574_s25 + $0x90] sm:$0xff]  ;;  %v221_v15 = vld [vmem:[%s574_s25 + $0x98] sm:$0xff] }
  0x18   : > { %v378_v30 = vsel %vm313_vm0, %v280_v17, %v346_v25  ;;  %v379_v31 = vsel %vm314_vm1, %v281_v18, %v347_v26  ;;  %vm317_vm4 = vcmp.ge.f32.partialorder %v284_v22, 0.0  ;;  %v350_v32 = vmul.f32 %v590_v11, %v284_v22  ;;  %v222_v26 = vld [vmem:[%s574_s25 + $0xa0] sm:$0xff] }
  0x19   : > { %410 = vst [vmem:[%s608_s30] sm:$0xff] %v378_v30  ;;  %411 = vst [vmem:[%s608_s30 + $0x8] sm:$0xff] %v379_v31  ;;  %v380_v36 = vsel %vm315_vm2, %v282_v19, %v348_v27  ;;  %v381_v37 = vsel %vm316_vm3, %v283_v21, %v349_v28  ;;  %vm318_vm5 = vcmp.ge.f32.partialorder %v285_v23, 0.0  ;;  %v351_v38 = vmul.f32 %v590_v11, %v285_v23  ;;  %v223_v27 = vld [vmem:[%s574_s25 + $0xa8] sm:$0xff] }
  0x1a   : > { %412 = vst [vmem:[%s608_s30 + $0x10] sm:$0xff] %v380_v36  ;;  %413 = vst [vmem:[%s608_s30 + $0x18] sm:$0xff] %v381_v37  ;;  %v382_v39 = vsel %vm317_vm4, %v284_v22, %v350_v32  ;;  %v286_v40 = vmul.f32 %v579_v1, %v247_v20  ;;  %v287_v41 = vmul.f32 %v579_v1, %v248_v24 }
  0x1b   : > { %v249_v42 = vsub.f32 %v210_v29, %v569_v0  ;;  %414 = vst [vmem:[%s608_s30 + $0x20] sm:$0xff] %v382_v39  ;;  %v383_v43 = vsel %vm318_vm5, %v285_v23, %v351_v38  ;;  %v250_v44 = vsub.f32 %v211_v33, %v569_v0  ;;  %v251_v45 = vsub.f32 %v212_v34, %v569_v0 }
  0x1c   : > { %v252_v46 = vsub.f32 %v213_v35, %v569_v0  ;;  %415 = vst [vmem:[%s608_s30 + $0x28] sm:$0xff] %v383_v43  ;;  %vm319_vm6 = vcmp.ge.f32.partialorder %v286_v40, 0.0  ;;  %v352_v49 = vmul.f32 %v590_v11, %v286_v40  ;;  %vm320_vm7 = vcmp.ge.f32.partialorder %v287_v41, 0.0 }
  0x1d   : > { %v353_v50 = vmul.f32 %v590_v11, %v287_v41  ;;  %v288_v51 = vmul.f32 %v579_v1, %v249_v42  ;;  %v289_v52 = vmul.f32 %v579_v1, %v250_v44  ;;  %v290_v53 = vmul.f32 %v579_v1, %v251_v45 }
  0x1e   : > { %v291_v54 = vmul.f32 %v579_v1, %v252_v46  ;;  %v384_v55 = vsel %vm319_vm6, %v286_v40, %v352_v49  ;;  %v253_v57 = vsub.f32 %v214_v47, %v569_v0  ;;  %v254_v58 = vsub.f32 %v215_v48, %v569_v0  ;;  %v224_v40 = vld [vmem:[%s574_s25 + $0xb0] sm:$0xff]  ;;  %v226_v48 = vld [vmem:[%s574_s25 + $0xc0] sm:$0xff]  ;;  %v227_v49 = vld [vmem:[%s574_s25 + $0xc8] sm:$0xff] }
  0x1f   : > { %v385_v56 = vsel %vm320_vm7, %v287_v41, %v353_v50  ;;  %416 = vst [vmem:[%s608_s30 + $0x30] sm:$0xff] %v384_v55  ;;  %vm321_vm8 = vcmp.ge.f32.partialorder %v288_v51, 0.0  ;;  %v354_v59 = vmul.f32 %v590_v11, %v288_v51  ;;  %vm322_vm9 = vcmp.ge.f32.partialorder %v289_v52, 0.0  ;;  %v225_v41 = vld [vmem:[%s574_s25 + $0xb8] sm:$0xff] }
  0x20   : > { %417 = vst [vmem:[%s608_s30 + $0x38] sm:$0xff] %v385_v56  ;;  %v355_v60 = vmul.f32 %v590_v11, %v289_v52  ;;  %vm323_vm10 = vcmp.ge.f32.partialorder %v290_v53, 0.0  ;;  %v356_v63 = vmul.f32 %v590_v11, %v290_v53  ;;  %vm324_vm11 = vcmp.ge.f32.partialorder %v291_v54, 0.0  ;;  %v229_v55 = vld [vmem:[%s574_s25 + $0xd8] sm:$0xff] }
  0x21   : > { %v357_v2 = vmul.f32 %v590_v11, %v291_v54  ;;  %v386_v3 = vsel %vm321_vm8, %v288_v51, %v354_v59  ;;  %v292_v5 = vmul.f32 %v579_v1, %v253_v57  ;;  %v293_v6 = vmul.f32 %v579_v1, %v254_v58 }
  0x22   : > { %v387_v4 = vsel %vm322_vm9, %v289_v52, %v355_v60  ;;  %418 = vst [vmem:[%s608_s30 + $0x40] sm:$0xff] %v386_v3  ;;  %v388_v9 = vsel %vm323_vm10, %v290_v53, %v356_v63  ;;  %v255_v12 = vsub.f32 %v216_v61, %v569_v0  ;;  %v256_v13 = vsub.f32 %v217_v62, %v569_v0 }
  0x23   : > { %419 = vst [vmem:[%s608_s30 + $0x48] sm:$0xff] %v387_v4  ;;  %v389_v10 = vsel %vm324_vm11, %v291_v54, %v357_v2  ;;  %420 = vst [vmem:[%s608_s30 + $0x50] sm:$0xff] %v388_v9  ;;  %vm325_vm12 = vcmp.ge.f32.partialorder %v292_v5, 0.0  ;;  %v358_v16 = vmul.f32 %v590_v11, %v292_v5  ;;  %vm326_vm13 = vcmp.ge.f32.partialorder %v293_v6, 0.0  ;;  %v228_v54 = vld [vmem:[%s574_s25 + $0xd0] sm:$0xff]  ;;  %v230_v4 = vld [vmem:[%s574_s25 + $0xe0] sm:$0xff] }
  0x24   : > { %421 = vst [vmem:[%s608_s30 + $0x58] sm:$0xff] %v389_v10  ;;  %v359_v17 = vmul.f32 %v590_v11, %v293_v6  ;;  %v294_v18 = vmul.f32 %v579_v1, %v255_v12  ;;  %v295_v19 = vmul.f32 %v579_v1, %v256_v13  ;;  %v257_v20 = vsub.f32 %v218_v7, %v569_v0 }
  0x25   : > { %v258_v21 = vsub.f32 %v219_v8, %v569_v0  ;;  %v390_v22 = vsel %vm325_vm12, %v292_v5, %v358_v16  ;;  %v259_v24 = vsub.f32 %v220_v14, %v569_v0  ;;  %v260_v25 = vsub.f32 %v221_v15, %v569_v0  ;;  %v231_v5 = vld [vmem:[%s574_s25 + $0xe8] sm:$0xff] }
  0x26   : > { %v391_v23 = vsel %vm326_vm13, %v293_v6, %v359_v17  ;;  %422 = vst [vmem:[%s608_s30 + $0x60] sm:$0xff] %v390_v22  ;;  %vm327_vm14 = vcmp.ge.f32.partialorder %v294_v18, 0.0  ;;  %v360_v28 = vmul.f32 %v590_v11, %v294_v18  ;;  %vm328_vm15 = vcmp.ge.f32.partialorder %v295_v19, 0.0 }
  0x27   : > { %423 = vst [vmem:[%s608_s30 + $0x68] sm:$0xff] %v391_v23  ;;  %v361_v29 = vmul.f32 %v590_v11, %v295_v19  ;;  %v296_v30 = vmul.f32 %v579_v1, %v257_v20  ;;  %v297_v31 = vmul.f32 %v579_v1, %v258_v21  ;;  %v298_v32 = vmul.f32 %v579_v1, %v259_v24  ;;  %v233_v20 = vld [vmem:[%s574_s25 + $0xf8] sm:$0xff] }
  0x28   : > { %v299_v33 = vmul.f32 %v579_v1, %v260_v25  ;;  %v392_v34 = vsel %vm327_vm14, %v294_v18, %v360_v28  ;;  %v261_v36 = vsub.f32 %v222_v26, %v569_v0  ;;  %v262_v37 = vsub.f32 %v223_v27, %v569_v0 }
  0x29   : > { %v393_v35 = vsel %vm328_vm15, %v295_v19, %v361_v29  ;;  %424 = vst [vmem:[%s608_s30 + $0x70] sm:$0xff] %v392_v34  ;;  %vm329_vm0 = vcmp.ge.f32.partialorder %v296_v30, 0.0  ;;  %v362_v38 = vmul.f32 %v590_v11, %v296_v30  ;;  %vm330_vm1 = vcmp.ge.f32.partialorder %v297_v31, 0.0  ;;  %v232_v19 = vld [vmem:[%s574_s25 + $0xf0] sm:$0xff] }
  0x2a   : > { %425 = vst [vmem:[%s608_s30 + $0x78] sm:$0xff] %v393_v35  ;;  %v363_v39 = vmul.f32 %v590_v11, %v297_v31  ;;  %vm331_vm2 = vcmp.ge.f32.partialorder %v298_v32, 0.0  ;;  %v364_v42 = vmul.f32 %v590_v11, %v298_v32  ;;  %vm332_vm3 = vcmp.ge.f32.partialorder %v299_v33, 0.0 }
  0x2b   : > { %v365_v43 = vmul.f32 %v590_v11, %v299_v33  ;;  %v394_v44 = vsel %vm329_vm0, %v296_v30, %v362_v38  ;;  %v300_v46 = vmul.f32 %v579_v1, %v261_v36  ;;  %v301_v47 = vmul.f32 %v579_v1, %v262_v37 }
  0x2c   : > { %v395_v45 = vsel %vm330_vm1, %v297_v31, %v363_v39  ;;  %426 = vst [vmem:[%s608_s30 + $0x80] sm:$0xff] %v394_v44  ;;  %v396_v50 = vsel %vm331_vm2, %v298_v32, %v364_v42  ;;  %v263_v52 = vsub.f32 %v224_v40, %v569_v0  ;;  %v264_v53 = vsub.f32 %v225_v41, %v569_v0 }
  0x2d   : > { %427 = vst [vmem:[%s608_s30 + $0x88] sm:$0xff] %v395_v45  ;;  %v397_v51 = vsel %vm332_vm3, %v299_v33, %v365_v43  ;;  %428 = vst [vmem:[%s608_s30 + $0x90] sm:$0xff] %v396_v50  ;;  %vm333_vm4 = vcmp.ge.f32.partialorder %v300_v46, 0.0  ;;  %v366_v56 = vmul.f32 %v590_v11, %v300_v46  ;;  %vm334_vm5 = vcmp.ge.f32.partialorder %v301_v47, 0.0 }
  0x2e   : > { %429 = vst [vmem:[%s608_s30 + $0x98] sm:$0xff] %v397_v51  ;;  %v367_v57 = vmul.f32 %v590_v11, %v301_v47  ;;  %v302_v58 = vmul.f32 %v579_v1, %v263_v52  ;;  %v303_v59 = vmul.f32 %v579_v1, %v264_v53  ;;  %v265_v60 = vsub.f32 %v226_v48, %v569_v0 }
  0x2f   : > { %v266_v61 = vsub.f32 %v227_v49, %v569_v0  ;;  %v398_v62 = vsel %vm333_vm4, %v300_v46, %v366_v56  ;;  %v267_v2 = vsub.f32 %v228_v54, %v569_v0  ;;  %v268_v3 = vsub.f32 %v229_v55, %v569_v0 }
  0x30   : > { %v399_v63 = vsel %vm334_vm5, %v301_v47, %v367_v57  ;;  %430 = vst [vmem:[%s608_s30 + $0xa0] sm:$0xff] %v398_v62  ;;  %vm335_vm6 = vcmp.ge.f32.partialorder %v302_v58, 0.0  ;;  %v368_v6 = vmul.f32 %v590_v11, %v302_v58  ;;  %vm336_vm7 = vcmp.ge.f32.partialorder %v303_v59, 0.0 }
  0x31   : > { %431 = vst [vmem:[%s608_s30 + $0xa8] sm:$0xff] %v399_v63  ;;  %v369_v7 = vmul.f32 %v590_v11, %v303_v59  ;;  %v304_v8 = vmul.f32 %v579_v1, %v265_v60  ;;  %v305_v9 = vmul.f32 %v579_v1, %v266_v61  ;;  %v306_v10 = vmul.f32 %v579_v1, %v267_v2 }
  0x32   : > { %v307_v12 = vmul.f32 %v579_v1, %v268_v3  ;;  %v400_v13 = vsel %vm335_vm6, %v302_v58, %v368_v6  ;;  %v269_v15 = vsub.f32 %v230_v4, %v569_v0  ;;  %v270_v16 = vsub.f32 %v231_v5, %v569_v0 }
  0x33   : > { %v401_v14 = vsel %vm336_vm7, %v303_v59, %v369_v7  ;;  %432 = vst [vmem:[%s608_s30 + $0xb0] sm:$0xff] %v400_v13  ;;  %vm337_vm8 = vcmp.ge.f32.partialorder %v304_v8, 0.0  ;;  %v370_v17 = vmul.f32 %v590_v11, %v304_v8  ;;  %vm338_vm9 = vcmp.ge.f32.partialorder %v305_v9, 0.0 }
  0x34   : > { %433 = vst [vmem:[%s608_s30 + $0xb8] sm:$0xff] %v401_v14  ;;  %v371_v18 = vmul.f32 %v590_v11, %v305_v9  ;;  %vm339_vm10 = vcmp.ge.f32.partialorder %v306_v10, 0.0  ;;  %v372_v21 = vmul.f32 %v590_v11, %v306_v10  ;;  %vm340_vm11 = vcmp.ge.f32.partialorder %v307_v12, 0.0 }
  0x35   : > { %v373_v22 = vmul.f32 %v590_v11, %v307_v12  ;;  %v402_v23 = vsel %vm337_vm8, %v304_v8, %v370_v17  ;;  %v308_v25 = vmul.f32 %v579_v1, %v269_v15  ;;  %v309_v26 = vmul.f32 %v579_v1, %v270_v16 }
  0x36   : > { %v403_v24 = vsel %vm338_vm9, %v305_v9, %v371_v18  ;;  %434 = vst [vmem:[%s608_s30 + $0xc0] sm:$0xff] %v402_v23  ;;  %v404_v27 = vsel %vm339_vm10, %v306_v10, %v372_v21  ;;  %v271_v29 = vsub.f32 %v232_v19, %v569_v0  ;;  %v272_v30 = vsub.f32 %v233_v20, %v569_v0 }
  0x37   : > { %435 = vst [vmem:[%s608_s30 + $0xc8] sm:$0xff] %v403_v24  ;;  %v405_v28 = vsel %vm340_vm11, %v307_v12, %v373_v22  ;;  %436 = vst [vmem:[%s608_s30 + $0xd0] sm:$0xff] %v404_v27  ;;  %vm341_vm12 = vcmp.ge.f32.partialorder %v308_v25, 0.0  ;;  %v374_v31 = vmul.f32 %v590_v11, %v308_v25  ;;  %vm342_vm13 = vcmp.ge.f32.partialorder %v309_v26, 0.0 }
  0x38   : > { %437 = vst [vmem:[%s608_s30 + $0xd8] sm:$0xff] %v405_v28  ;;  %v375_v32 = vmul.f32 %v590_v11, %v309_v26  ;;  %v310_v33 = vmul.f32 %v579_v1, %v271_v29  ;;  %v311_v34 = vmul.f32 %v579_v1, %v272_v30 }
  0x39   : > { %v406_v35 = vsel %vm341_vm12, %v308_v25, %v374_v31 }
  0x3a   : > { %v407_v36 = vsel %vm342_vm13, %v309_v26, %v375_v32  ;;  %438 = vst [vmem:[%s608_s30 + $0xe0] sm:$0xff] %v406_v35  ;;  %vm343_vm14 = vcmp.ge.f32.partialorder %v310_v33, 0.0  ;;  %v376_v0 = vmul.f32 %v590_v11, %v310_v33  ;;  %vm344_vm15 = vcmp.ge.f32.partialorder %v311_v34, 0.0 }
  0x3b   : > { %439 = vst [vmem:[%s608_s30 + $0xe8] sm:$0xff] %v407_v36  ;;  %v377_v37 = vmul.f32 %v590_v11, %v311_v34 }
  0x3c   : > { %v408_v38 = vsel %vm343_vm14, %v310_v33, %v376_v0 }
  0x3d   : > { %v409_v39 = vsel %vm344_vm15, %v311_v34, %v377_v37  ;;  %440 = vst [vmem:[%s608_s30 + $0xf0] sm:$0xff] %v408_v38 }
  0x3e   : > { %441 = vst [vmem:[%s608_s30 + $0xf8] sm:$0xff] %v409_v39 }
  0x3f PF: > { %s15_s17 = sadd.s32 1, %s525_s17  }
  0x40   : > { %p12_p4 = scmp.ge.s32.totalorder %s15_s17, 4  }
  0x42   :  { %14 = sbr.rel (!%p12_p4) target bundleno = 2 (0x2), region = 66 }

// kernel: decoder_up_block.4
= control target key start
LH: loop header
LB: loop body
LE: loop exit
PB: predicated region body
PF: predicated region fallthrough
CT: control target
= control target key end

     0   :  { %s928_s12 = smov 0   ;;  %s1098_s0 = inlined_call_operand.vmem [shape: bf16[512,36], index: 0, kind: input, shape index: {}]   ;;  %s1099_s1 = inlined_call_operand.vmem [shape: bf16[36,128], index: 1, kind: input, shape index: {}]   ;;  %s1100_s2 = inlined_call_operand.vmem [shape: f32[512,128], index: 2, kind: output, shape index: {0}]   ;;  %s1101_s3 = inlined_call_operand.vmem [shape: f32[16,128], index: 3, kind: output, shape index: {1}]  }
   0x1 LB: > { %s934_s13 = sadd.s32 4294967295, %s906_s12   ;;  %p765_p0 = scmp.ge.s32.totalorder %s906_s12, 1  ;;  %s906_s12 = sphi %s928_s12, %s14_s12  }
   0x2   : > { %p141_p1 = scmp.lt.s32.totalorder %s906_s12, 3 }
   0x4   : > { %p142_p2 = pnand %p765_p0, %p141_p1 }
   0x5   : > { %v881_v0 = vld [vmem:[%s1099_s1] sm:$0xff] (!%p142_p2)   ;;  %v882_v1 = vld [vmem:[%s1099_s1 + $0x8] sm:$0xff] (!%p142_p2)   ;;  %s766_s18 = sshll.u32 (!%p142_p2), %s934_s13, 5  ;;  %v883_v2 = vld [vmem:[%s1099_s1 + $0x10] ss:$0 sps:$4 sm:$0x33] (!%p142_p2)  }
   0x6   : > { %145 = sbr.rel (%p142_p2) target bundleno = 312 (0x138), region = 28  ;;  %827 = vmatprep.subr.bf16.mxu0 (!%p142_p2), %v881_v0  ;;  %p170_p3 = scmp.lt.s32.totalorder (!%p142_p2), %s766_s18, 63  ;;  %865 = vmatprep.subr.bf16.mxu1 (!%p142_p2), %v881_v0  ;;  %vm367_vm0 = vcmask (!%p142_p2), 1041408   ;;  %vm318_vm1 = vcmask (!%p142_p2), 293888   ;;  %vm670_vm2 = vcmask (!%p142_p2), 1040384  }
   0x7   : > { %828 = vmatpush3.bf16.msra.mxu0 (!%p142_p2), %v881_v0  ;;  %868 = vmatpush3.bf16.msra.mxu1 (!%p142_p2), %v881_v0  ;;  %v369_v3 = vsel (!%p142_p2), %vm367_vm0, %v883_v2, 0  ;;  %p181_p4 = scmp.lt.s32.totalorder (!%p142_p2), %s934_s13, 1 }
   0x8   : > { %829 = vmatprep.subr.bf16.mxu0 (!%p142_p2), %v882_v1  ;;  %866 = vmatprep.subr.bf16.mxu1 (!%p142_p2), %v882_v1 }
   0xb   : > { %830 = vmatpush3.bf16.msra.mxu0 (!%p142_p2), %v882_v1  ;;  %869 = vmatpush3.bf16.msra.mxu1 (!%p142_p2), %v882_v1 }
   0xc   : > { %871 = vmatprep.subr.msk.bf16.mxu0 (!%p142_p2), %vm367_vm0, %v883_v2  ;;  %872 = vmatprep.subr.msk.bf16.mxu1 (!%p142_p2), %vm367_vm0, %v883_v2 }
   0xd   : > { %s1103_s18 = smov (!%p170_p3, %s766_s18), 63  ;;  %s1105_s13 = smov (!%p181_p4, %s934_s13), 1 }
   0xe   : > { %s767_s21 = sshll.u32 %s1103_s18, 2  ;;  %s769_s25 = sshll.u32 %s1103_s18, 3 }
   0xf   : > { %s954_s24 = scalar_lea.vmem %s1098_s0, %s767_s21  ;;  %832 = vmatpush3.bf16.msra.mxu0 %v369_v3  ;;  %870 = vmatpush3.bf16.msra.mxu1 %v369_v3  ;;  %s995_s28 = scalar_lea.vmem %s1100_s2, %s769_s25 }
  0x10   : > { %v884_v4 = vld [vmem:[%s954_s24] sm:$0xff]   ;;  %v885_v5 = vld [vmem:[%s954_s24 + $0x8] sm:$0xff]   ;;  %v886_v6 = vld [vmem:[%s954_s24 + $0x10] sm:$0xff]   ;;  %s770_s29 = sshll.u32 %s1105_s13, 3 }
  0x11   : > { %833 = vmatprep.mubr.msk.bf16.mxu0 %vm318_vm1, %v884_v4  ;;  %v887_v7 = vld [vmem:[%s954_s24 + $0x18] sm:$0xff]   ;;  %v892_v8 = vld [vmem:[%s954_s24 + $0x40] sm:$0xff]   ;;  %v893_v9 = vld [vmem:[%s954_s24 + $0x48] sm:$0xff]   ;;  %s184_s5 = scalar_lea.vmem %s1101_s3, %s770_s29 }
  0x12   : > { %834 = vmatmul.mubr.msk.bf16.vlgmr.msra.gmra.mrb[0].mxu0 %vm318_vm1, %v885_v5  ;;  %849 = vmatprep.mubr.msk.bf16.mxu1 %vm318_vm1, %v892_v8  ;;  %v894_v10 = vld [vmem:[%s954_s24 + $0x50] sm:$0xff]   ;;  %v888_v11 = vld [vmem:[%s954_s24 + $0x20] sm:$0xff]   ;;  %v895_v12 = vld [vmem:[%s954_s24 + $0x58] sm:$0xff]  }
  0x13   : > { %837 = vmatprep.mubr.msk.bf16.mxu0 %vm318_vm1, %v886_v6  ;;  %850 = vmatmul.mubr.msk.bf16.vlgmr.msra.gmra.mrb[0].mxu1 %vm318_vm1, %v893_v9  ;;  %v896_v13 = vld [vmem:[%s954_s24 + $0x60] sm:$0xff]   ;;  %v889_v14 = vld [vmem:[%s954_s24 + $0x28] sm:$0xff]   ;;  %v890_v15 = vld [vmem:[%s954_s24 + $0x30] sm:$0xff]  }
  0x14   : > { %853 = vmatprep.mubr.msk.bf16.mxu1 %vm318_vm1, %v894_v10  ;;  %v897_v16 = vld [vmem:[%s954_s24 + $0x68] sm:$0xff]   ;;  %v898_v17 = vld [vmem:[%s954_s24 + $0x70] sm:$0xff]   ;;  %v891_v18 = vld [vmem:[%s954_s24 + $0x38] sm:$0xff]  }
  0x15   : > { %v899_v19 = vld [vmem:[%s954_s24 + $0x78] sm:$0xff]  }
  0x1a   : > { %838 = vmatmul.mubr.msk.bf16.gmra.mrb[4].mxu0 %vm318_vm1, %v887_v7 }
  0x1b   : > { %841 = vmatprep.mubr.msk.bf16.mxu0 %vm318_vm1, %v888_v11  ;;  %854 = vmatmul.mubr.msk.bf16.gmra.mrb[4].mxu1 %vm318_vm1, %v895_v12 }
  0x1c   : > { %857 = vmatprep.mubr.msk.bf16.mxu1 %vm318_vm1, %v896_v13 }
  0x22   : > { %842 = vmatmul.mubr.msk.bf16.gmra.mrb[8].mxu0 %vm318_vm1, %v889_v14 }
  0x23   : > { %845 = vmatprep.mubr.msk.bf16.mxu0 %vm318_vm1, %v890_v15  ;;  %858 = vmatmul.mubr.msk.bf16.gmra.mrb[8].mxu1 %vm318_vm1, %v897_v16 }
  0x24   : > { %861 = vmatprep.mubr.msk.bf16.mxu1 %vm318_vm1, %v898_v17 }
  0x2a   : > { %846 = vmatmul.mubr.msk.bf16.gmra.mrb[12].mxu0 %vm318_vm1, %v891_v18 }
  0x2b   : > { %862 = vmatmul.mubr.msk.bf16.gmra.mrb[12].mxu1 %vm318_vm1, %v899_v19 }
  0xe5   : > { %v835_v20 = vpop.f32.mrb[0].mxu0 }
  0xe6   : > { %534 = vst [vmem:[%s995_s28 + $0x10] sm:$0xff] %v835_v20  ;;  %v405_v21 = vpop.f32.mrb[1].mxu0  ;;  %v1001_v27 = vpop.f32.mrb[0].mxu1  ;;  %v603_v28 = vmul.f32 %v835_v20, %v835_v20 }
  0xe7   : > { %532 = vst [vmem:[%s995_s28] sm:$0xff] %v405_v21  ;;  %v836_v22 = vpop.f32.mrb[2].mxu0  ;;  %v601_v24 = vmul.f32 %v405_v21, %v405_v21  ;;  %550 = vst [vmem:[%s995_s28 + $0x90] sm:$0xff] %v1001_v27  ;;  %v1005_v31 = vpop.f32.mrb[1].mxu1 }
  0xe8   : > { %535 = vst [vmem:[%s995_s28 + $0x18] sm:$0xff] %v836_v22  ;;  %v408_v23 = vpop.f32.mrb[3].mxu0  ;;  %548 = vst [vmem:[%s995_s28 + $0x80] sm:$0xff] %v1005_v31  ;;  %v1009_v32 = vpop.f32.mrb[2].mxu1  ;;  %v604_v33 = vmul.f32 %v836_v22, %v836_v22 }
  0xe9   : > { %533 = vst [vmem:[%s995_s28 + $0x8] sm:$0xff] %v408_v23  ;;  %v564_v25 = vadd.f32 %v408_v23, %v405_v21  ;;  %v602_v26 = vmul.f32 %v408_v23, %v408_v23  ;;  %551 = vst [vmem:[%s995_s28 + $0x98] sm:$0xff] %v1009_v32  ;;  %v1013_v37 = vpop.f32.mrb[3].mxu1 }
  0xea   : > { %549 = vst [vmem:[%s995_s28 + $0x88] sm:$0xff] %v1013_v37 }
  0xeb   : > { %v565_v29 = vadd.f32 %v835_v20, %v564_v25  ;;  %v633_v30 = vadd.f32 %v602_v26, %v601_v24 }
  0xed   : > { %v634_v34 = vadd.f32 %v633_v30, %v603_v28  ;;  %v839_v35 = vpop.f32.mrb[4].mxu0  ;;  %v566_v36 = vadd.f32 %v836_v22, %v565_v29 }
  0xee   : > { %538 = vst [vmem:[%s995_s28 + $0x30] sm:$0xff] %v839_v35  ;;  %v421_v38 = vpop.f32.mrb[5].mxu0  ;;  %v1021_v47 = vpop.f32.mrb[4].mxu1  ;;  %v607_v48 = vmul.f32 %v839_v35, %v839_v35 }
  0xef   : > { %536 = vst [vmem:[%s995_s28 + $0x20] sm:$0xff] %v421_v38  ;;  %v567_v39 = vadd.f32 %v566_v36, %v421_v38  ;;  %v605_v40 = vmul.f32 %v421_v38, %v421_v38  ;;  %v635_v41 = vadd.f32 %v634_v34, %v604_v33  ;;  %v840_v42 = vpop.f32.mrb[6].mxu0  ;;  %554 = vst [vmem:[%s995_s28 + $0xb0] sm:$0xff] %v1021_v47  ;;  %v1025_v51 = vpop.f32.mrb[5].mxu1 }
  0xf0   : > { %539 = vst [vmem:[%s995_s28 + $0x38] sm:$0xff] %v840_v42  ;;  %v424_v43 = vpop.f32.mrb[7].mxu0  ;;  %552 = vst [vmem:[%s995_s28 + $0xa0] sm:$0xff] %v1025_v51  ;;  %v1029_v52 = vpop.f32.mrb[6].mxu1  ;;  %v608_v53 = vmul.f32 %v840_v42, %v840_v42 }
  0xf1   : > { %v636_v44 = vadd.f32 %v635_v41, %v605_v40  ;;  %537 = vst [vmem:[%s995_s28 + $0x28] sm:$0xff] %v424_v43  ;;  %v568_v45 = vadd.f32 %v567_v39, %v424_v43  ;;  %v606_v46 = vmul.f32 %v424_v43, %v424_v43  ;;  %555 = vst [vmem:[%s995_s28 + $0xb8] sm:$0xff] %v1029_v52  ;;  %v1033_v57 = vpop.f32.mrb[7].mxu1 }
  0xf2   : > { %553 = vst [vmem:[%s995_s28 + $0xa8] sm:$0xff] %v1033_v57  ;;  %v619_v43 = vmul.f32 %v1001_v27, %v1001_v27 }
  0xf3   : > { %v569_v49 = vadd.f32 %v839_v35, %v568_v45  ;;  %v637_v50 = vadd.f32 %v636_v44, %v606_v46  ;;  %v617_v35 = vmul.f32 %v1005_v31, %v1005_v31  ;;  %v620_v46 = vmul.f32 %v1009_v32, %v1009_v32 }
  0xf5   : > { %v638_v54 = vadd.f32 %v637_v50, %v607_v48  ;;  %v843_v55 = vpop.f32.mrb[8].mxu0  ;;  %v570_v56 = vadd.f32 %v840_v42, %v569_v49  ;;  %v618_v42 = vmul.f32 %v1013_v37, %v1013_v37 }
  0xf6   : > { %542 = vst [vmem:[%s995_s28 + $0x50] sm:$0xff] %v843_v55  ;;  %v437_v58 = vpop.f32.mrb[9].mxu0  ;;  %v1041_v3 = vpop.f32.mrb[8].mxu1  ;;  %v611_v4 = vmul.f32 %v843_v55, %v843_v55 }
  0xf7   : > { %540 = vst [vmem:[%s995_s28 + $0x40] sm:$0xff] %v437_v58  ;;  %v571_v59 = vadd.f32 %v570_v56, %v437_v58  ;;  %v609_v60 = vmul.f32 %v437_v58, %v437_v58  ;;  %v639_v61 = vadd.f32 %v638_v54, %v608_v53  ;;  %v844_v62 = vpop.f32.mrb[10].mxu0  ;;  %558 = vst [vmem:[%s995_s28 + $0xd0] sm:$0xff] %v1041_v3  ;;  %v501_v7 = vpop.f32.mrb[9].mxu1 }
  0xf8   : > { %543 = vst [vmem:[%s995_s28 + $0x58] sm:$0xff] %v844_v62  ;;  %v440_v63 = vpop.f32.mrb[11].mxu0  ;;  %556 = vst [vmem:[%s995_s28 + $0xc0] sm:$0xff] %v501_v7  ;;  %v1046_v8 = vpop.f32.mrb[10].mxu1  ;;  %v612_v9 = vmul.f32 %v844_v62, %v844_v62 }
  0xf9   : > { %v640_v0 = vadd.f32 %v639_v61, %v609_v60  ;;  %541 = vst [vmem:[%s995_s28 + $0x48] sm:$0xff] %v440_v63  ;;  %v572_v1 = vadd.f32 %v571_v59, %v440_v63  ;;  %v610_v2 = vmul.f32 %v440_v63, %v440_v63  ;;  %559 = vst [vmem:[%s995_s28 + $0xd8] sm:$0xff] %v1046_v8  ;;  %v504_v13 = vpop.f32.mrb[11].mxu1 }
  0xfa   : > { %557 = vst [vmem:[%s995_s28 + $0xc8] sm:$0xff] %v504_v13 }
  0xfb   : > { %v573_v5 = vadd.f32 %v843_v55, %v572_v1  ;;  %v641_v6 = vadd.f32 %v640_v0, %v610_v2  ;;  %v622_v55 = vmul.f32 %v1033_v57, %v1033_v57  ;;  %v626_v1 = vmul.f32 %v504_v13, %v504_v13 }
  0xfd   : > { %v642_v10 = vadd.f32 %v641_v6, %v611_v4  ;;  %v847_v11 = vpop.f32.mrb[12].mxu0  ;;  %v574_v12 = vadd.f32 %v844_v62, %v573_v5 }
  0xfe   : > { %546 = vst [vmem:[%s995_s28 + $0x70] sm:$0xff] %v847_v11  ;;  %v453_v14 = vpop.f32.mrb[13].mxu0  ;;  %v863_v23 = vpop.f32.mrb[12].mxu1  ;;  %v615_v24 = vmul.f32 %v847_v11, %v847_v11 }
  0xff   : > { %544 = vst [vmem:[%s995_s28 + $0x60] sm:$0xff] %v453_v14  ;;  %v575_v15 = vadd.f32 %v574_v12, %v453_v14  ;;  %v613_v16 = vmul.f32 %v453_v14, %v453_v14  ;;  %v643_v17 = vadd.f32 %v642_v10, %v612_v9  ;;  %v848_v18 = vpop.f32.mrb[14].mxu0  ;;  %562 = vst [vmem:[%s995_s28 + $0xf0] sm:$0xff] %v863_v23  ;;  %v517_v28 = vpop.f32.mrb[13].mxu1 }
 0x100   : > { %547 = vst [vmem:[%s995_s28 + $0x78] sm:$0xff] %v848_v18  ;;  %v456_v19 = vpop.f32.mrb[15].mxu0  ;;  %560 = vst [vmem:[%s995_s28 + $0xe0] sm:$0xff] %v517_v28  ;;  %v864_v29 = vpop.f32.mrb[14].mxu1  ;;  %v616_v30 = vmul.f32 %v848_v18, %v848_v18 }
 0x101   : > { %v644_v20 = vadd.f32 %v643_v17, %v613_v16  ;;  %545 = vst [vmem:[%s995_s28 + $0x68] sm:$0xff] %v456_v19  ;;  %v576_v21 = vadd.f32 %v575_v15, %v456_v19  ;;  %v614_v22 = vmul.f32 %v456_v19, %v456_v19  ;;  %563 = vst [vmem:[%s995_s28 + $0xf8] sm:$0xff] %v864_v29  ;;  %v520_v36 = vpop.f32.mrb[15].mxu1 }
 0x102   : > { %561 = vst [vmem:[%s995_s28 + $0xe8] sm:$0xff] %v520_v36  ;;  %v630_v12 = vmul.f32 %v520_v36, %v520_v36  ;;  %v632_v16 = vmul.f32 %v864_v29, %v864_v29 }
 0x103   : > { %v577_v25 = vadd.f32 %v847_v11, %v576_v21  ;;  %v645_v26 = vadd.f32 %v644_v20, %v614_v22 }
 0x105   : > { %v646_v33 = vadd.f32 %v645_v26, %v615_v24  ;;  %v578_v34 = vadd.f32 %v848_v18, %v577_v25 }
 0x107   : > { %v579_v38 = vadd.f32 %v578_v34, %v1005_v31  ;;  %v647_v39 = vadd.f32 %v646_v33, %v616_v30  ;;  %v621_v31 = vmul.f32 %v1025_v51, %v1025_v51 }
 0x109   : > { %v648_v40 = vadd.f32 %v647_v39, %v617_v35  ;;  %v580_v41 = vadd.f32 %v579_v38, %v1013_v37 }
 0x10b   : > { %v581_v44 = vadd.f32 %v1001_v27, %v580_v41  ;;  %v649_v45 = vadd.f32 %v648_v40, %v618_v42  ;;  %v623_v27 = vmul.f32 %v1021_v47, %v1021_v47 }
 0x10d   : > { %v650_v48 = vadd.f32 %v649_v45, %v619_v43  ;;  %v582_v49 = vadd.f32 %v1009_v32, %v581_v44  ;;  %v624_v32 = vmul.f32 %v1029_v52, %v1029_v52 }
 0x10f   : > { %v583_v50 = vadd.f32 %v582_v49, %v1025_v51  ;;  %v651_v53 = vadd.f32 %v650_v48, %v620_v46  ;;  %v625_v51 = vmul.f32 %v501_v7, %v501_v7 }
 0x111   : > { %v652_v54 = vadd.f32 %v651_v53, %v621_v31  ;;  %v584_v37 = vadd.f32 %v583_v50, %v1033_v57  ;;  %v627_v57 = vmul.f32 %v1041_v3, %v1041_v3 }
 0x113   : > { %v585_v56 = vadd.f32 %v1021_v47, %v584_v37  ;;  %v653_v58 = vadd.f32 %v652_v54, %v622_v55  ;;  %v628_v47 = vmul.f32 %v1046_v8, %v1046_v8 }
 0x115   : > { %v654_v59 = vadd.f32 %v653_v58, %v623_v27  ;;  %v586_v60 = vadd.f32 %v1029_v52, %v585_v56  ;;  %v629_v52 = vmul.f32 %v517_v28, %v517_v28 }
 0x117   : > { %v587_v61 = vadd.f32 %v586_v60, %v501_v7  ;;  %v655_v62 = vadd.f32 %v654_v59, %v624_v32 }
 0x119   : > { %v656_v63 = vadd.f32 %v655_v62, %v625_v51  ;;  %v588_v0 = vadd.f32 %v587_v61, %v504_v13  ;;  %v631_v13 = vmul.f32 %v863_v23, %v863_v23 }
 0x11b   : > { %v589_v2 = vadd.f32 %v1041_v3, %v588_v0  ;;  %v657_v4 = vadd.f32 %v656_v63, %v626_v1 }
 0x11d   : > { %v658_v5 = vadd.f32 %v657_v4, %v627_v57  ;;  %v590_v6 = vadd.f32 %v1046_v8, %v589_v2 }
 0x11f   : > { %v591_v9 = vadd.f32 %v590_v6, %v517_v28  ;;  %v659_v7 = vadd.f32 %v658_v5, %v628_v47 }
 0x121   : > { %v660_v10 = vadd.f32 %v659_v7, %v629_v52  ;;  %v592_v11 = vadd.f32 %v591_v9, %v520_v36 }
 0x123   : > { %v593_v14 = vadd.f32 %v863_v23, %v592_v11  ;;  %v661_v15 = vadd.f32 %v660_v10, %v630_v12 }
 0x125   : > { %v594_v3 = vadd.f32 %v864_v29, %v593_v14  ;;  %v662_v17 = vadd.f32 %v661_v15, %v631_v13 }
 0x127   : > { %v595_v18 = vrot.slane %v594_v3, 4  ;;  %v663_v19 = vadd.f32 %v662_v17, %v632_v16 }
 0x129   : > { %v596_v20 = vadd.f32 %v595_v18, %v594_v3  ;;  %v664_v21 = vrot.slane %v663_v19, 4 }
 0x12b   : > { %v597_v22 = vrot.slane %v596_v20, 2  ;;  %v665_v8 = vadd.f32 %v664_v21, %v663_v19 }
 0x12d   : > { %v598_v24 = vadd.f32 %v597_v22, %v596_v20  ;;  %v666_v25 = vrot.slane %v665_v8, 2 }
 0x12f   : > { %v599_v26 = vrot.slane %v598_v24, 1  ;;  %v667_v28 = vadd.f32 %v666_v25, %v665_v8 }
 0x131   : > { %v668_v30 = vrot.slane %v667_v28, 1  ;;  %v600_v23 = vadd.f32 %v599_v26, %v598_v24 }
 0x133   : > { %v669_v33 = vadd.f32 %v668_v30, %v667_v28 }
 0x135   : > { %v671_v29 = vsel %vm670_vm2, %v600_v23, %v669_v33 }
 0x136   : > { %v672_v34 = vsel %vm367_vm0, %v671_v29, 0.0 }
 0x137   : > { %673 = vst [vmem:[%s184_s5] sm:$0xff] %v672_v34 }
 0x138 PF: > { %s14_s12 = sadd.s32 1, %s906_s12  }
 0x139   : > { %p11_p5 = scmp.ge.s32.totalorder %s14_s12, 4  }
 0x13b   :  { %13 = sbr.rel (!%p11_p5) target bundleno = 1 (0x1), region = 70 }

// kernel: tile.22
= control target key start
LH: loop header
LB: loop body
LE: loop exit
PB: predicated region body
PF: predicated region fallthrough
CT: control target
= control target key end

     0   :  { %s22_s0 = inlined_call_operand.vmem [shape: f32[128], index: 0, kind: input, shape index: {}]   ;;  %s23_s1 = inlined_call_operand.vmem [shape: f32[4,128], index: 1, kind: output, shape index: {}]  }
   0x1   :  { %v4_v0 = vld [vmem:[%s22_s0] ss:$0 sm:$0xff] }
   0x2   :  { %5 = vst [vmem:[%s23_s1] sm:$0xf] %v4_v0 }

// kernel: decoder_up_block.6
= control target key start
LH: loop header
LB: loop body
LE: loop exit
PB: predicated region body
PF: predicated region fallthrough
CT: control target
= control target key end

     0   :  { %s1580_s12 = smov 0   ;;  %s1858_s0 = inlined_call_operand.vmem [shape: bf16[512,32], index: 0, kind: input, shape index: {}]   ;;  %s1859_s1 = inlined_call_operand.vmem [shape: bf16[32,512], index: 1, kind: input, shape index: {}]   ;;  %s1860_s2 = inlined_call_operand.vmem [shape: f32[512,512], index: 2, kind: output, shape index: {0}]   ;;  %s1861_s3 = inlined_call_operand.vmem [shape: f32[16,512], index: 3, kind: output, shape index: {1}]  }
   0x1 LB: > { %s1586_s13 = sadd.s32 4294967295, %s1557_s12   ;;  %p1446_p0 = scmp.ge.s32.totalorder %s1557_s12, 1  ;;  %s1557_s12 = sphi %s1580_s12, %s14_s12  }
   0x2   : > { %p141_p1 = scmp.lt.s32.totalorder %s1557_s12, 3 }
   0x4   : > { %p142_p2 = pnand %p1446_p0, %p141_p1 }
   0x5   : > { %v1523_v0 = vld [vmem:[%s1859_s1 + $0x4] ss:$16 sps:$4 sm:$0xff] (!%p142_p2)   ;;  %s1447_s16 = sshll.u32 (!%p142_p2), %s1586_s13, 5  ;;  %v1525_v1 = vld [vmem:[%s1859_s1 + $0xc] ss:$16 sps:$4 sm:$0xff] (!%p142_p2)   ;;  %v1559_v2 = vmov (!%p142_p2), 0  }
   0x6   : > { %145 = sbr.rel (%p142_p2) target bundleno = 374 (0x176), region = 28  ;;  %431 = vmatprep.mubr.bf16.mxu0 (!%p142_p2), %v1559_v2  ;;  %624 = vmatprep.mubr.bf16.mxu1 (!%p142_p2), %v1559_v2  ;;  %p172_p3 = scmp.lt.s32.totalorder (!%p142_p2), %s1447_s16, 63  ;;  %v1527_v3 = vld [vmem:[%s1859_s1] ss:$16 sps:$4 sm:$0xff] (!%p142_p2)   ;;  %v1528_v4 = vld [vmem:[%s1859_s1 + $0x8] ss:$16 sps:$4 sm:$0xff] (!%p142_p2)  }
   0x7   : > { %399 = vmatprep.subr.bf16.mxu0 (!%p142_p2), %v1523_v0  ;;  %592 = vmatprep.subr.bf16.mxu1 (!%p142_p2), %v1525_v1  ;;  %v1529_v5 = vld [vmem:[%s1859_s1 + $0x24] ss:$16 sps:$4 sm:$0xff] (!%p142_p2)   ;;  %v1531_v6 = vld [vmem:[%s1859_s1 + $0x2c] ss:$16 sps:$4 sm:$0xff] (!%p142_p2)   ;;  %v1533_v7 = vld [vmem:[%s1859_s1 + $0x20] ss:$16 sps:$4 sm:$0xff] (!%p142_p2)  }
   0x8   : > { %400 = vmatpush1.bf16.msra.mxu0 (!%p142_p2), %v1527_v3  ;;  %593 = vmatpush1.bf16.msra.mxu1 (!%p142_p2), %v1528_v4  ;;  %v1534_v8 = vld [vmem:[%s1859_s1 + $0x28] ss:$16 sps:$4 sm:$0xff] (!%p142_p2)   ;;  %vm350_vm0 = vcmask (!%p142_p2), 261120   ;;  %p184_p4 = scmp.lt.s32.totalorder (!%p142_p2), %s1586_s13, 1  ;;  %vm1337_vm1 = vcmask (!%p142_p2), 1040384   ;;  %vm1342_vm2 = vcmask (!%p142_p2), 1041408  }
   0x9   : > { %401 = vmatprep.subr.bf16.mxu0 (!%p142_p2), %v1529_v5  ;;  %594 = vmatprep.subr.bf16.mxu1 (!%p142_p2), %v1531_v6 }
   0xc   : > { %402 = vmatpush1.bf16.msra.mxu0 (!%p142_p2), %v1533_v7  ;;  %595 = vmatpush1.bf16.msra.mxu1 (!%p142_p2), %v1534_v8 }
   0xd   : > { %s1863_s16 = smov (!%p172_p3, %s1447_s16), 63  ;;  %s1865_s13 = smov (!%p184_p4, %s1586_s13), 1 }
   0xe   : > { %s1448_s4 = sshll.u32 %s1863_s16, 2  ;;  %s1512_s8 = sshll.u32 %s1863_s16, 5 }
   0xf   : > { %s1623_s7 = scalar_lea.vmem %s1858_s0, %s1448_s4  ;;  %s1707_s11 = scalar_lea.vmem %s1860_s2, %s1512_s8 }
  0x10   : > { %v1535_v9 = vld [vmem:[%s1623_s7] sm:$0xff]   ;;  %v1536_v10 = vld [vmem:[%s1623_s7 + $0x8] sm:$0xff]   ;;  %v1537_v11 = vld [vmem:[%s1623_s7 + $0x10] sm:$0xff]   ;;  %s1513_s14 = sshll.u32 %s1865_s13, 5 }
  0x11   : > { %1478 = vmatmul.mubr.msk.bf16.vlgmr.msra.gmra.mrb[0].mxu0 %vm350_vm0, %v1535_v9  ;;  %1494 = vmatmul.mubr.msk.bf16.vlgmr.msra.gmra.mrb[0].mxu1 %vm350_vm0, %v1535_v9  ;;  %v1538_v12 = vld [vmem:[%s1623_s7 + $0x18] sm:$0xff]   ;;  %v1539_v13 = vld [vmem:[%s1623_s7 + $0x20] sm:$0xff]   ;;  %v1540_v14 = vld [vmem:[%s1623_s7 + $0x28] sm:$0xff]   ;;  %s188_s17 = scalar_lea.vmem %s1861_s3, %s1513_s14 }
  0x12   : > { %441 = vmatprep.mubr.bf16.mxu0 %v1559_v2  ;;  %634 = vmatprep.mubr.bf16.mxu1 %v1559_v2  ;;  %v1541_v15 = vld [vmem:[%s1623_s7 + $0x30] sm:$0xff]   ;;  %v1542_v16 = vld [vmem:[%s1623_s7 + $0x38] sm:$0xff]   ;;  %v1543_v17 = vld [vmem:[%s1623_s7 + $0x40] sm:$0xff]  }
  0x13   : > { %v1544_v18 = vld [vmem:[%s1623_s7 + $0x48] sm:$0xff]   ;;  %v1545_v19 = vld [vmem:[%s1623_s7 + $0x50] sm:$0xff]   ;;  %v1546_v20 = vld [vmem:[%s1623_s7 + $0x58] sm:$0xff]  }
  0x14   : > { %v1547_v21 = vld [vmem:[%s1623_s7 + $0x60] sm:$0xff]   ;;  %v1548_v22 = vld [vmem:[%s1623_s7 + $0x68] sm:$0xff]   ;;  %v1549_v23 = vld [vmem:[%s1623_s7 + $0x70] sm:$0xff]  }
  0x15   : > { %v1550_v24 = vld [vmem:[%s1623_s7 + $0x78] sm:$0xff]  }
  0x19   : > { %1479 = vmatmul.mubr.msk.bf16.gmra.mrb[4].mxu0 %vm350_vm0, %v1536_v10  ;;  %1495 = vmatmul.mubr.msk.bf16.gmra.mrb[4].mxu1 %vm350_vm0, %v1536_v10 }
  0x1a   : > { %451 = vmatprep.mubr.bf16.mxu0 %v1559_v2  ;;  %644 = vmatprep.mubr.bf16.mxu1 %v1559_v2 }
  0x21   : > { %1480 = vmatmul.mubr.msk.bf16.gmra.mrb[8].mxu0 %vm350_vm0, %v1537_v11  ;;  %1496 = vmatmul.mubr.msk.bf16.gmra.mrb[8].mxu1 %vm350_vm0, %v1537_v11 }
  0x22   : > { %461 = vmatprep.mubr.bf16.mxu0 %v1559_v2  ;;  %654 = vmatprep.mubr.bf16.mxu1 %v1559_v2 }
  0x29   : > { %1481 = vmatmul.mubr.msk.bf16.gmra.mrb[12].mxu0 %vm350_vm0, %v1538_v12  ;;  %1497 = vmatmul.mubr.msk.bf16.gmra.mrb[12].mxu1 %vm350_vm0, %v1538_v12 }
  0x2a   : > { %471 = vmatprep.mubr.bf16.mxu0 %v1559_v2  ;;  %664 = vmatprep.mubr.bf16.mxu1 %v1559_v2 }
  0x31   : > { %1482 = vmatmul.mubr.msk.bf16.gmra.mrb[16].mxu0 %vm350_vm0, %v1539_v13  ;;  %1498 = vmatmul.mubr.msk.bf16.gmra.mrb[16].mxu1 %vm350_vm0, %v1539_v13 }
  0x32   : > { %481 = vmatprep.mubr.bf16.mxu0 %v1559_v2  ;;  %674 = vmatprep.mubr.bf16.mxu1 %v1559_v2 }
  0x39   : > { %1483 = vmatmul.mubr.msk.bf16.gmra.mrb[20].mxu0 %vm350_vm0, %v1540_v14  ;;  %1499 = vmatmul.mubr.msk.bf16.gmra.mrb[20].mxu1 %vm350_vm0, %v1540_v14 }
  0x3a   : > { %491 = vmatprep.mubr.bf16.mxu0 %v1559_v2  ;;  %684 = vmatprep.mubr.bf16.mxu1 %v1559_v2 }
  0x41   : > { %1484 = vmatmul.mubr.msk.bf16.gmra.mrb[24].mxu0 %vm350_vm0, %v1541_v15  ;;  %1500 = vmatmul.mubr.msk.bf16.gmra.mrb[24].mxu1 %vm350_vm0, %v1541_v15 }
  0x42   : > { %501 = vmatprep.mubr.bf16.mxu0 %v1559_v2  ;;  %694 = vmatprep.mubr.bf16.mxu1 %v1559_v2 }
  0x49   : > { %1485 = vmatmul.mubr.msk.bf16.gmra.mrb[28].mxu0 %vm350_vm0, %v1542_v16  ;;  %1501 = vmatmul.mubr.msk.bf16.gmra.mrb[28].mxu1 %vm350_vm0, %v1542_v16 }
  0x4a   : > { %511 = vmatprep.mubr.bf16.mxu0 %v1559_v2  ;;  %704 = vmatprep.mubr.bf16.mxu1 %v1559_v2 }
  0x51   : > { %1486 = vmatmul.mubr.msk.bf16.gmra.mrb[32].mxu0 %vm350_vm0, %v1543_v17  ;;  %1502 = vmatmul.mubr.msk.bf16.gmra.mrb[32].mxu1 %vm350_vm0, %v1543_v17 }
  0x52   : > { %521 = vmatprep.mubr.bf16.mxu0 %v1559_v2  ;;  %714 = vmatprep.mubr.bf16.mxu1 %v1559_v2 }
  0x59   : > { %1487 = vmatmul.mubr.msk.bf16.gmra.mrb[36].mxu0 %vm350_vm0, %v1544_v18  ;;  %1503 = vmatmul.mubr.msk.bf16.gmra.mrb[36].mxu1 %vm350_vm0, %v1544_v18 }
  0x5a   : > { %531 = vmatprep.mubr.bf16.mxu0 %v1559_v2  ;;  %724 = vmatprep.mubr.bf16.mxu1 %v1559_v2 }
  0x61   : > { %1488 = vmatmul.mubr.msk.bf16.gmra.mrb[40].mxu0 %vm350_vm0, %v1545_v19  ;;  %1504 = vmatmul.mubr.msk.bf16.gmra.mrb[40].mxu1 %vm350_vm0, %v1545_v19 }
  0x62   : > { %541 = vmatprep.mubr.bf16.mxu0 %v1559_v2  ;;  %734 = vmatprep.mubr.bf16.mxu1 %v1559_v2 }
  0x69   : > { %1489 = vmatmul.mubr.msk.bf16.gmra.mrb[44].mxu0 %vm350_vm0, %v1546_v20  ;;  %1505 = vmatmul.mubr.msk.bf16.gmra.mrb[44].mxu1 %vm350_vm0, %v1546_v20 }
  0x6a   : > { %551 = vmatprep.mubr.bf16.mxu0 %v1559_v2  ;;  %744 = vmatprep.mubr.bf16.mxu1 %v1559_v2 }
  0x71   : > { %1490 = vmatmul.mubr.msk.bf16.gmra.mrb[48].mxu0 %vm350_vm0, %v1547_v21  ;;  %1506 = vmatmul.mubr.msk.bf16.gmra.mrb[48].mxu1 %vm350_vm0, %v1547_v21 }
  0x72   : > { %561 = vmatprep.mubr.bf16.mxu0 %v1559_v2  ;;  %754 = vmatprep.mubr.bf16.mxu1 %v1559_v2 }
  0x79   : > { %1491 = vmatmul.mubr.msk.bf16.gmra.mrb[52].mxu0 %vm350_vm0, %v1548_v22  ;;  %1507 = vmatmul.mubr.msk.bf16.gmra.mrb[52].mxu1 %vm350_vm0, %v1548_v22 }
  0x7a   : > { %571 = vmatprep.mubr.bf16.mxu0 %v1559_v2  ;;  %764 = vmatprep.mubr.bf16.mxu1 %v1559_v2 }
  0x81   : > { %1492 = vmatmul.mubr.msk.bf16.gmra.mrb[56].mxu0 %vm350_vm0, %v1549_v23  ;;  %1508 = vmatmul.mubr.msk.bf16.gmra.mrb[56].mxu1 %vm350_vm0, %v1549_v23 }
  0x82   : > { %581 = vmatprep.mubr.bf16.mxu0 %v1559_v2  ;;  %774 = vmatprep.mubr.bf16.mxu1 %v1559_v2 }
  0x89   : > { %1493 = vmatmul.mubr.msk.bf16.gmra.mrb[60].mxu0 %vm350_vm0, %v1550_v24  ;;  %1509 = vmatmul.mubr.msk.bf16.gmra.mrb[60].mxu1 %vm350_vm0, %v1550_v24 }
  0xe4   : > { %v433_v25 = vpop.f32.mrb[0].mxu0  ;;  %v626_v26 = vpop.f32.mrb[0].mxu1 }
  0xe5   : > { %785 = vst [vmem:[%s1707_s11] sm:$0xff] %v433_v25  ;;  %787 = vst [vmem:[%s1707_s11 + $0x10] sm:$0xff] %v626_v26  ;;  %v435_v27 = vpop.f32.mrb[1].mxu0  ;;  %v628_v28 = vpop.f32.mrb[1].mxu1  ;;  %v1061_v29 = vmul.f32 %v433_v25, %v433_v25  ;;  %v1063_v30 = vmul.f32 %v626_v26, %v626_v26 }
  0xe6   : > { %786 = vst [vmem:[%s1707_s11 + $0x8] sm:$0xff] %v435_v27  ;;  %v1062_v31 = vmul.f32 %v435_v27, %v435_v27  ;;  %788 = vst [vmem:[%s1707_s11 + $0x18] sm:$0xff] %v628_v28  ;;  %v1064_v32 = vmul.f32 %v628_v28, %v628_v28  ;;  %v437_v33 = vpop.f32.mrb[2].mxu0  ;;  %v630_v34 = vpop.f32.mrb[2].mxu1 }
  0xe7   : > { %789 = vst [vmem:[%s1707_s11 + $0x20] sm:$0xff] %v437_v33  ;;  %v913_v35 = vadd.f32 %v437_v33, %v433_v25  ;;  %v1065_v36 = vmul.f32 %v437_v33, %v437_v33  ;;  %791 = vst [vmem:[%s1707_s11 + $0x30] sm:$0xff] %v630_v34  ;;  %v987_v37 = vadd.f32 %v630_v34, %v626_v26  ;;  %v439_v39 = vpop.f32.mrb[3].mxu0  ;;  %v632_v40 = vpop.f32.mrb[3].mxu1 }
  0xe8   : > { %v1067_v38 = vmul.f32 %v630_v34, %v630_v34  ;;  %790 = vst [vmem:[%s1707_s11 + $0x28] sm:$0xff] %v439_v39  ;;  %v950_v41 = vadd.f32 %v439_v39, %v435_v27  ;;  %v1066_v42 = vmul.f32 %v439_v39, %v439_v39  ;;  %792 = vst [vmem:[%s1707_s11 + $0x38] sm:$0xff] %v632_v40 }
  0xe9   : > { %v1024_v43 = vadd.f32 %v632_v40, %v628_v28  ;;  %v1068_v44 = vmul.f32 %v632_v40, %v632_v40  ;;  %v1189_v45 = vadd.f32 %v1065_v36, %v1061_v29 }
  0xea   : > { %v1263_v46 = vadd.f32 %v1067_v38, %v1063_v30  ;;  %v1226_v47 = vadd.f32 %v1066_v42, %v1062_v31 }
  0xeb   : > { %v1300_v48 = vadd.f32 %v1068_v44, %v1064_v32 }
  0xec   : > { %v443_v49 = vpop.f32.mrb[4].mxu0  ;;  %v636_v50 = vpop.f32.mrb[4].mxu1 }
  0xed   : > { %793 = vst [vmem:[%s1707_s11 + $0x40] sm:$0xff] %v443_v49  ;;  %v914_v51 = vadd.f32 %v913_v35, %v443_v49  ;;  %v1069_v52 = vmul.f32 %v443_v49, %v443_v49  ;;  %795 = vst [vmem:[%s1707_s11 + $0x50] sm:$0xff] %v636_v50  ;;  %v988_v53 = vadd.f32 %v987_v37, %v636_v50  ;;  %v445_v55 = vpop.f32.mrb[5].mxu0  ;;  %v638_v56 = vpop.f32.mrb[5].mxu1 }
  0xee   : > { %v1071_v54 = vmul.f32 %v636_v50, %v636_v50  ;;  %794 = vst [vmem:[%s1707_s11 + $0x48] sm:$0xff] %v445_v55  ;;  %v951_v57 = vadd.f32 %v950_v41, %v445_v55  ;;  %v1070_v58 = vmul.f32 %v445_v55, %v445_v55  ;;  %796 = vst [vmem:[%s1707_s11 + $0x58] sm:$0xff] %v638_v56  ;;  %v447_v61 = vpop.f32.mrb[6].mxu0  ;;  %v640_v62 = vpop.f32.mrb[6].mxu1 }
  0xef   : > { %v1025_v59 = vadd.f32 %v1024_v43, %v638_v56  ;;  %v1072_v60 = vmul.f32 %v638_v56, %v638_v56  ;;  %v1190_v63 = vadd.f32 %v1189_v45, %v1069_v52  ;;  %797 = vst [vmem:[%s1707_s11 + $0x60] sm:$0xff] %v447_v61  ;;  %v915_v1 = vadd.f32 %v914_v51, %v447_v61  ;;  %v449_v3 = vpop.f32.mrb[7].mxu0  ;;  %v642_v4 = vpop.f32.mrb[7].mxu1 }
  0xf0   : > { %v1264_v0 = vadd.f32 %v1263_v46, %v1071_v54  ;;  %v1073_v2 = vmul.f32 %v447_v61, %v447_v61  ;;  %799 = vst [vmem:[%s1707_s11 + $0x70] sm:$0xff] %v640_v62  ;;  %v1227_v5 = vadd.f32 %v1226_v47, %v1070_v58  ;;  %v989_v7 = vadd.f32 %v988_v53, %v640_v62 }
  0xf1   : > { %v1301_v6 = vadd.f32 %v1300_v48, %v1072_v60  ;;  %v1075_v8 = vmul.f32 %v640_v62, %v640_v62  ;;  %798 = vst [vmem:[%s1707_s11 + $0x68] sm:$0xff] %v449_v3  ;;  %800 = vst [vmem:[%s1707_s11 + $0x78] sm:$0xff] %v642_v4  ;;  %v952_v10 = vadd.f32 %v951_v57, %v449_v3 }
  0xf2   : > { %v1191_v9 = vadd.f32 %v1190_v63, %v1073_v2  ;;  %v1074_v11 = vmul.f32 %v449_v3, %v449_v3  ;;  %v1026_v12 = vadd.f32 %v1025_v59, %v642_v4  ;;  %v1076_v14 = vmul.f32 %v642_v4, %v642_v4 }
  0xf3   : > { %v1265_v13 = vadd.f32 %v1264_v0, %v1075_v8 }
  0xf4   : > { %v1228_v15 = vadd.f32 %v1227_v5, %v1074_v11  ;;  %v1302_v16 = vadd.f32 %v1301_v6, %v1076_v14  ;;  %v453_v17 = vpop.f32.mrb[8].mxu0  ;;  %v646_v18 = vpop.f32.mrb[8].mxu1 }
  0xf5   : > { %801 = vst [vmem:[%s1707_s11 + $0x80] sm:$0xff] %v453_v17  ;;  %v916_v19 = vadd.f32 %v915_v1, %v453_v17  ;;  %v1077_v20 = vmul.f32 %v453_v17, %v453_v17  ;;  %803 = vst [vmem:[%s1707_s11 + $0x90] sm:$0xff] %v646_v18  ;;  %v990_v21 = vadd.f32 %v989_v7, %v646_v18  ;;  %v455_v23 = vpop.f32.mrb[9].mxu0  ;;  %v648_v24 = vpop.f32.mrb[9].mxu1 }
  0xf6   : > { %v1079_v22 = vmul.f32 %v646_v18, %v646_v18  ;;  %802 = vst [vmem:[%s1707_s11 + $0x88] sm:$0xff] %v455_v23  ;;  %v953_v25 = vadd.f32 %v952_v10, %v455_v23  ;;  %v1078_v26 = vmul.f32 %v455_v23, %v455_v23  ;;  %804 = vst [vmem:[%s1707_s11 + $0x98] sm:$0xff] %v648_v24  ;;  %v457_v29 = vpop.f32.mrb[10].mxu0  ;;  %v650_v30 = vpop.f32.mrb[10].mxu1 }
  0xf7   : > { %v1027_v27 = vadd.f32 %v1026_v12, %v648_v24  ;;  %v1080_v28 = vmul.f32 %v648_v24, %v648_v24  ;;  %v1192_v31 = vadd.f32 %v1191_v9, %v1077_v20  ;;  %805 = vst [vmem:[%s1707_s11 + $0xa0] sm:$0xff] %v457_v29  ;;  %v917_v33 = vadd.f32 %v916_v19, %v457_v29  ;;  %v459_v35 = vpop.f32.mrb[11].mxu0  ;;  %v652_v36 = vpop.f32.mrb[11].mxu1 }
  0xf8   : > { %v1266_v32 = vadd.f32 %v1265_v13, %v1079_v22  ;;  %v1081_v34 = vmul.f32 %v457_v29, %v457_v29  ;;  %807 = vst [vmem:[%s1707_s11 + $0xb0] sm:$0xff] %v650_v30  ;;  %v1229_v37 = vadd.f32 %v1228_v15, %v1078_v26  ;;  %v991_v39 = vadd.f32 %v990_v21, %v650_v30 }
  0xf9   : > { %v1303_v38 = vadd.f32 %v1302_v16, %v1080_v28  ;;  %v1083_v40 = vmul.f32 %v650_v30, %v650_v30  ;;  %806 = vst [vmem:[%s1707_s11 + $0xa8] sm:$0xff] %v459_v35  ;;  %808 = vst [vmem:[%s1707_s11 + $0xb8] sm:$0xff] %v652_v36  ;;  %v954_v42 = vadd.f32 %v953_v25, %v459_v35 }
  0xfa   : > { %v1193_v41 = vadd.f32 %v1192_v31, %v1081_v34  ;;  %v1082_v43 = vmul.f32 %v459_v35, %v459_v35  ;;  %v1028_v44 = vadd.f32 %v1027_v27, %v652_v36  ;;  %v1084_v46 = vmul.f32 %v652_v36, %v652_v36 }
  0xfb   : > { %v1267_v45 = vadd.f32 %v1266_v32, %v1083_v40 }
  0xfc   : > { %v1230_v47 = vadd.f32 %v1229_v37, %v1082_v43  ;;  %v1304_v48 = vadd.f32 %v1303_v38, %v1084_v46  ;;  %v463_v49 = vpop.f32.mrb[12].mxu0  ;;  %v656_v50 = vpop.f32.mrb[12].mxu1 }
  0xfd   : > { %809 = vst [vmem:[%s1707_s11 + $0xc0] sm:$0xff] %v463_v49  ;;  %v918_v51 = vadd.f32 %v917_v33, %v463_v49  ;;  %v1085_v52 = vmul.f32 %v463_v49, %v463_v49  ;;  %811 = vst [vmem:[%s1707_s11 + $0xd0] sm:$0xff] %v656_v50  ;;  %v992_v53 = vadd.f32 %v991_v39, %v656_v50  ;;  %v465_v55 = vpop.f32.mrb[13].mxu0  ;;  %v658_v56 = vpop.f32.mrb[13].mxu1 }
  0xfe   : > { %v1087_v54 = vmul.f32 %v656_v50, %v656_v50  ;;  %810 = vst [vmem:[%s1707_s11 + $0xc8] sm:$0xff] %v465_v55  ;;  %v955_v57 = vadd.f32 %v954_v42, %v465_v55  ;;  %v1086_v58 = vmul.f32 %v465_v55, %v465_v55  ;;  %812 = vst [vmem:[%s1707_s11 + $0xd8] sm:$0xff] %v658_v56  ;;  %v467_v61 = vpop.f32.mrb[14].mxu0  ;;  %v660_v62 = vpop.f32.mrb[14].mxu1 }
  0xff   : > { %v1029_v59 = vadd.f32 %v1028_v44, %v658_v56  ;;  %v1088_v60 = vmul.f32 %v658_v56, %v658_v56  ;;  %v1194_v63 = vadd.f32 %v1193_v41, %v1085_v52  ;;  %813 = vst [vmem:[%s1707_s11 + $0xe0] sm:$0xff] %v467_v61  ;;  %v919_v1 = vadd.f32 %v918_v51, %v467_v61  ;;  %v469_v3 = vpop.f32.mrb[15].mxu0  ;;  %v662_v4 = vpop.f32.mrb[15].mxu1 }
 0x100   : > { %v1268_v0 = vadd.f32 %v1267_v45, %v1087_v54  ;;  %v1089_v2 = vmul.f32 %v467_v61, %v467_v61  ;;  %815 = vst [vmem:[%s1707_s11 + $0xf0] sm:$0xff] %v660_v62  ;;  %v1231_v5 = vadd.f32 %v1230_v47, %v1086_v58  ;;  %v993_v7 = vadd.f32 %v992_v53, %v660_v62 }
 0x101   : > { %v1305_v6 = vadd.f32 %v1304_v48, %v1088_v60  ;;  %v1091_v8 = vmul.f32 %v660_v62, %v660_v62  ;;  %814 = vst [vmem:[%s1707_s11 + $0xe8] sm:$0xff] %v469_v3  ;;  %816 = vst [vmem:[%s1707_s11 + $0xf8] sm:$0xff] %v662_v4  ;;  %v956_v10 = vadd.f32 %v955_v57, %v469_v3 }
 0x102   : > { %v1195_v9 = vadd.f32 %v1194_v63, %v1089_v2  ;;  %v1090_v11 = vmul.f32 %v469_v3, %v469_v3  ;;  %v1030_v12 = vadd.f32 %v1029_v59, %v662_v4  ;;  %v1092_v14 = vmul.f32 %v662_v4, %v662_v4 }
 0x103   : > { %v1269_v13 = vadd.f32 %v1268_v0, %v1091_v8 }
 0x104   : > { %v1232_v15 = vadd.f32 %v1231_v5, %v1090_v11  ;;  %v1306_v16 = vadd.f32 %v1305_v6, %v1092_v14  ;;  %v473_v17 = vpop.f32.mrb[16].mxu0  ;;  %v666_v18 = vpop.f32.mrb[16].mxu1 }
 0x105   : > { %817 = vst [vmem:[%s1707_s11 + $0x100] sm:$0xff] %v473_v17  ;;  %v920_v19 = vadd.f32 %v919_v1, %v473_v17  ;;  %v1093_v20 = vmul.f32 %v473_v17, %v473_v17  ;;  %819 = vst [vmem:[%s1707_s11 + $0x110] sm:$0xff] %v666_v18  ;;  %v994_v21 = vadd.f32 %v993_v7, %v666_v18  ;;  %v475_v23 = vpop.f32.mrb[17].mxu0  ;;  %v668_v24 = vpop.f32.mrb[17].mxu1 }
 0x106   : > { %v1095_v22 = vmul.f32 %v666_v18, %v666_v18  ;;  %818 = vst [vmem:[%s1707_s11 + $0x108] sm:$0xff] %v475_v23  ;;  %v957_v25 = vadd.f32 %v956_v10, %v475_v23  ;;  %v1094_v26 = vmul.f32 %v475_v23, %v475_v23  ;;  %820 = vst [vmem:[%s1707_s11 + $0x118] sm:$0xff] %v668_v24  ;;  %v477_v29 = vpop.f32.mrb[18].mxu0  ;;  %v670_v30 = vpop.f32.mrb[18].mxu1 }
 0x107   : > { %v1031_v27 = vadd.f32 %v1030_v12, %v668_v24  ;;  %v1096_v28 = vmul.f32 %v668_v24, %v668_v24  ;;  %v1196_v31 = vadd.f32 %v1195_v9, %v1093_v20  ;;  %821 = vst [vmem:[%s1707_s11 + $0x120] sm:$0xff] %v477_v29  ;;  %v921_v33 = vadd.f32 %v920_v19, %v477_v29  ;;  %v479_v35 = vpop.f32.mrb[19].mxu0  ;;  %v672_v36 = vpop.f32.mrb[19].mxu1 }
 0x108   : > { %v1270_v32 = vadd.f32 %v1269_v13, %v1095_v22  ;;  %v1097_v34 = vmul.f32 %v477_v29, %v477_v29  ;;  %823 = vst [vmem:[%s1707_s11 + $0x130] sm:$0xff] %v670_v30  ;;  %v1233_v37 = vadd.f32 %v1232_v15, %v1094_v26  ;;  %v995_v39 = vadd.f32 %v994_v21, %v670_v30 }
 0x109   : > { %v1307_v38 = vadd.f32 %v1306_v16, %v1096_v28  ;;  %v1099_v40 = vmul.f32 %v670_v30, %v670_v30  ;;  %822 = vst [vmem:[%s1707_s11 + $0x128] sm:$0xff] %v479_v35  ;;  %824 = vst [vmem:[%s1707_s11 + $0x138] sm:$0xff] %v672_v36  ;;  %v958_v42 = vadd.f32 %v957_v25, %v479_v35 }
 0x10a   : > { %v1197_v41 = vadd.f32 %v1196_v31, %v1097_v34  ;;  %v1098_v43 = vmul.f32 %v479_v35, %v479_v35  ;;  %v1032_v44 = vadd.f32 %v1031_v27, %v672_v36  ;;  %v1100_v46 = vmul.f32 %v672_v36, %v672_v36 }
 0x10b   : > { %v1271_v45 = vadd.f32 %v1270_v32, %v1099_v40 }
 0x10c   : > { %v1234_v47 = vadd.f32 %v1233_v37, %v1098_v43  ;;  %v1308_v48 = vadd.f32 %v1307_v38, %v1100_v46  ;;  %v483_v49 = vpop.f32.mrb[20].mxu0  ;;  %v676_v50 = vpop.f32.mrb[20].mxu1 }
 0x10d   : > { %825 = vst [vmem:[%s1707_s11 + $0x140] sm:$0xff] %v483_v49  ;;  %v922_v51 = vadd.f32 %v921_v33, %v483_v49  ;;  %v1101_v52 = vmul.f32 %v483_v49, %v483_v49  ;;  %827 = vst [vmem:[%s1707_s11 + $0x150] sm:$0xff] %v676_v50  ;;  %v996_v53 = vadd.f32 %v995_v39, %v676_v50  ;;  %v485_v55 = vpop.f32.mrb[21].mxu0  ;;  %v678_v56 = vpop.f32.mrb[21].mxu1 }
 0x10e   : > { %v1103_v54 = vmul.f32 %v676_v50, %v676_v50  ;;  %826 = vst [vmem:[%s1707_s11 + $0x148] sm:$0xff] %v485_v55  ;;  %v959_v57 = vadd.f32 %v958_v42, %v485_v55  ;;  %v1102_v58 = vmul.f32 %v485_v55, %v485_v55  ;;  %828 = vst [vmem:[%s1707_s11 + $0x158] sm:$0xff] %v678_v56  ;;  %v487_v61 = vpop.f32.mrb[22].mxu0  ;;  %v680_v62 = vpop.f32.mrb[22].mxu1 }
 0x10f   : > { %v1033_v59 = vadd.f32 %v1032_v44, %v678_v56  ;;  %v1104_v60 = vmul.f32 %v678_v56, %v678_v56  ;;  %v1198_v63 = vadd.f32 %v1197_v41, %v1101_v52  ;;  %829 = vst [vmem:[%s1707_s11 + $0x160] sm:$0xff] %v487_v61  ;;  %v923_v1 = vadd.f32 %v922_v51, %v487_v61  ;;  %v489_v3 = vpop.f32.mrb[23].mxu0  ;;  %v682_v4 = vpop.f32.mrb[23].mxu1 }
 0x110   : > { %v1272_v0 = vadd.f32 %v1271_v45, %v1103_v54  ;;  %v1105_v2 = vmul.f32 %v487_v61, %v487_v61  ;;  %831 = vst [vmem:[%s1707_s11 + $0x170] sm:$0xff] %v680_v62  ;;  %v1235_v5 = vadd.f32 %v1234_v47, %v1102_v58  ;;  %v997_v7 = vadd.f32 %v996_v53, %v680_v62 }
 0x111   : > { %v1309_v6 = vadd.f32 %v1308_v48, %v1104_v60  ;;  %v1107_v8 = vmul.f32 %v680_v62, %v680_v62  ;;  %830 = vst [vmem:[%s1707_s11 + $0x168] sm:$0xff] %v489_v3  ;;  %832 = vst [vmem:[%s1707_s11 + $0x178] sm:$0xff] %v682_v4  ;;  %v960_v10 = vadd.f32 %v959_v57, %v489_v3 }
 0x112   : > { %v1199_v9 = vadd.f32 %v1198_v63, %v1105_v2  ;;  %v1106_v11 = vmul.f32 %v489_v3, %v489_v3  ;;  %v1034_v12 = vadd.f32 %v1033_v59, %v682_v4  ;;  %v1108_v14 = vmul.f32 %v682_v4, %v682_v4 }
 0x113   : > { %v1273_v13 = vadd.f32 %v1272_v0, %v1107_v8 }
 0x114   : > { %v1236_v15 = vadd.f32 %v1235_v5, %v1106_v11  ;;  %v1310_v16 = vadd.f32 %v1309_v6, %v1108_v14  ;;  %v493_v17 = vpop.f32.mrb[24].mxu0  ;;  %v686_v18 = vpop.f32.mrb[24].mxu1 }
 0x115   : > { %833 = vst [vmem:[%s1707_s11 + $0x180] sm:$0xff] %v493_v17  ;;  %v924_v19 = vadd.f32 %v923_v1, %v493_v17  ;;  %v1109_v20 = vmul.f32 %v493_v17, %v493_v17  ;;  %835 = vst [vmem:[%s1707_s11 + $0x190] sm:$0xff] %v686_v18  ;;  %v998_v21 = vadd.f32 %v997_v7, %v686_v18  ;;  %v495_v23 = vpop.f32.mrb[25].mxu0  ;;  %v688_v24 = vpop.f32.mrb[25].mxu1 }
 0x116   : > { %v1111_v22 = vmul.f32 %v686_v18, %v686_v18  ;;  %834 = vst [vmem:[%s1707_s11 + $0x188] sm:$0xff] %v495_v23  ;;  %v961_v25 = vadd.f32 %v960_v10, %v495_v23  ;;  %v1110_v26 = vmul.f32 %v495_v23, %v495_v23  ;;  %836 = vst [vmem:[%s1707_s11 + $0x198] sm:$0xff] %v688_v24  ;;  %v497_v29 = vpop.f32.mrb[26].mxu0  ;;  %v690_v30 = vpop.f32.mrb[26].mxu1 }
 0x117   : > { %v1035_v27 = vadd.f32 %v1034_v12, %v688_v24  ;;  %v1112_v28 = vmul.f32 %v688_v24, %v688_v24  ;;  %v1200_v31 = vadd.f32 %v1199_v9, %v1109_v20  ;;  %837 = vst [vmem:[%s1707_s11 + $0x1a0] sm:$0xff] %v497_v29  ;;  %v925_v33 = vadd.f32 %v924_v19, %v497_v29  ;;  %v499_v35 = vpop.f32.mrb[27].mxu0  ;;  %v692_v36 = vpop.f32.mrb[27].mxu1 }
 0x118   : > { %v1274_v32 = vadd.f32 %v1273_v13, %v1111_v22  ;;  %v1113_v34 = vmul.f32 %v497_v29, %v497_v29  ;;  %839 = vst [vmem:[%s1707_s11 + $0x1b0] sm:$0xff] %v690_v30  ;;  %v1237_v37 = vadd.f32 %v1236_v15, %v1110_v26  ;;  %v999_v39 = vadd.f32 %v998_v21, %v690_v30 }
 0x119   : > { %v1311_v38 = vadd.f32 %v1310_v16, %v1112_v28  ;;  %v1115_v40 = vmul.f32 %v690_v30, %v690_v30  ;;  %838 = vst [vmem:[%s1707_s11 + $0x1a8] sm:$0xff] %v499_v35  ;;  %840 = vst [vmem:[%s1707_s11 + $0x1b8] sm:$0xff] %v692_v36  ;;  %v962_v42 = vadd.f32 %v961_v25, %v499_v35 }
 0x11a   : > { %v1201_v41 = vadd.f32 %v1200_v31, %v1113_v34  ;;  %v1114_v43 = vmul.f32 %v499_v35, %v499_v35  ;;  %v1036_v44 = vadd.f32 %v1035_v27, %v692_v36  ;;  %v1116_v46 = vmul.f32 %v692_v36, %v692_v36 }
 0x11b   : > { %v1275_v45 = vadd.f32 %v1274_v32, %v1115_v40 }
 0x11c   : > { %v1238_v47 = vadd.f32 %v1237_v37, %v1114_v43  ;;  %v1312_v48 = vadd.f32 %v1311_v38, %v1116_v46  ;;  %v503_v49 = vpop.f32.mrb[28].mxu0  ;;  %v696_v50 = vpop.f32.mrb[28].mxu1 }
 0x11d   : > { %841 = vst [vmem:[%s1707_s11 + $0x1c0] sm:$0xff] %v503_v49  ;;  %v926_v51 = vadd.f32 %v925_v33, %v503_v49  ;;  %v1117_v52 = vmul.f32 %v503_v49, %v503_v49  ;;  %843 = vst [vmem:[%s1707_s11 + $0x1d0] sm:$0xff] %v696_v50  ;;  %v1000_v53 = vadd.f32 %v999_v39, %v696_v50  ;;  %v505_v55 = vpop.f32.mrb[29].mxu0  ;;  %v698_v56 = vpop.f32.mrb[29].mxu1 }
 0x11e   : > { %v1119_v54 = vmul.f32 %v696_v50, %v696_v50  ;;  %842 = vst [vmem:[%s1707_s11 + $0x1c8] sm:$0xff] %v505_v55  ;;  %v963_v57 = vadd.f32 %v962_v42, %v505_v55  ;;  %v1118_v58 = vmul.f32 %v505_v55, %v505_v55  ;;  %844 = vst [vmem:[%s1707_s11 + $0x1d8] sm:$0xff] %v698_v56  ;;  %v507_v61 = vpop.f32.mrb[30].mxu0  ;;  %v700_v62 = vpop.f32.mrb[30].mxu1 }
 0x11f   : > { %v1037_v59 = vadd.f32 %v1036_v44, %v698_v56  ;;  %v1120_v60 = vmul.f32 %v698_v56, %v698_v56  ;;  %v1202_v63 = vadd.f32 %v1201_v41, %v1117_v52  ;;  %845 = vst [vmem:[%s1707_s11 + $0x1e0] sm:$0xff] %v507_v61  ;;  %v927_v1 = vadd.f32 %v926_v51, %v507_v61  ;;  %v509_v3 = vpop.f32.mrb[31].mxu0  ;;  %v702_v4 = vpop.f32.mrb[31].mxu1 }
 0x120   : > { %v1276_v0 = vadd.f32 %v1275_v45, %v1119_v54  ;;  %v1121_v2 = vmul.f32 %v507_v61, %v507_v61  ;;  %847 = vst [vmem:[%s1707_s11 + $0x1f0] sm:$0xff] %v700_v62  ;;  %v1239_v5 = vadd.f32 %v1238_v47, %v1118_v58  ;;  %v1001_v7 = vadd.f32 %v1000_v53, %v700_v62 }
 0x121   : > { %v1313_v6 = vadd.f32 %v1312_v48, %v1120_v60  ;;  %v1123_v8 = vmul.f32 %v700_v62, %v700_v62  ;;  %846 = vst [vmem:[%s1707_s11 + $0x1e8] sm:$0xff] %v509_v3  ;;  %848 = vst [vmem:[%s1707_s11 + $0x1f8] sm:$0xff] %v702_v4  ;;  %v964_v10 = vadd.f32 %v963_v57, %v509_v3 }
 0x122   : > { %v1203_v9 = vadd.f32 %v1202_v63, %v1121_v2  ;;  %v1122_v11 = vmul.f32 %v509_v3, %v509_v3  ;;  %v1038_v12 = vadd.f32 %v1037_v59, %v702_v4  ;;  %v1124_v14 = vmul.f32 %v702_v4, %v702_v4 }
 0x123   : > { %v1277_v13 = vadd.f32 %v1276_v0, %v1123_v8 }
 0x124   : > { %v1240_v15 = vadd.f32 %v1239_v5, %v1122_v11  ;;  %v1314_v16 = vadd.f32 %v1313_v6, %v1124_v14  ;;  %v513_v17 = vpop.f32.mrb[32].mxu0  ;;  %v706_v18 = vpop.f32.mrb[32].mxu1 }
 0x125   : > { %849 = vst [vmem:[%s1707_s11 + $0x200] sm:$0xff] %v513_v17  ;;  %v928_v19 = vadd.f32 %v927_v1, %v513_v17  ;;  %v1125_v20 = vmul.f32 %v513_v17, %v513_v17  ;;  %851 = vst [vmem:[%s1707_s11 + $0x210] sm:$0xff] %v706_v18  ;;  %v1002_v21 = vadd.f32 %v1001_v7, %v706_v18  ;;  %v515_v23 = vpop.f32.mrb[33].mxu0  ;;  %v708_v24 = vpop.f32.mrb[33].mxu1 }
 0x126   : > { %v1127_v22 = vmul.f32 %v706_v18, %v706_v18  ;;  %850 = vst [vmem:[%s1707_s11 + $0x208] sm:$0xff] %v515_v23  ;;  %v965_v25 = vadd.f32 %v964_v10, %v515_v23  ;;  %v1126_v26 = vmul.f32 %v515_v23, %v515_v23  ;;  %852 = vst [vmem:[%s1707_s11 + $0x218] sm:$0xff] %v708_v24  ;;  %v517_v29 = vpop.f32.mrb[34].mxu0  ;;  %v710_v30 = vpop.f32.mrb[34].mxu1 }
 0x127   : > { %v1039_v27 = vadd.f32 %v1038_v12, %v708_v24  ;;  %v1128_v28 = vmul.f32 %v708_v24, %v708_v24  ;;  %v1204_v31 = vadd.f32 %v1203_v9, %v1125_v20  ;;  %853 = vst [vmem:[%s1707_s11 + $0x220] sm:$0xff] %v517_v29  ;;  %v929_v33 = vadd.f32 %v928_v19, %v517_v29  ;;  %v519_v35 = vpop.f32.mrb[35].mxu0  ;;  %v712_v36 = vpop.f32.mrb[35].mxu1 }
 0x128   : > { %v1278_v32 = vadd.f32 %v1277_v13, %v1127_v22  ;;  %v1129_v34 = vmul.f32 %v517_v29, %v517_v29  ;;  %855 = vst [vmem:[%s1707_s11 + $0x230] sm:$0xff] %v710_v30  ;;  %v1241_v37 = vadd.f32 %v1240_v15, %v1126_v26  ;;  %v1003_v39 = vadd.f32 %v1002_v21, %v710_v30 }
 0x129   : > { %v1315_v38 = vadd.f32 %v1314_v16, %v1128_v28  ;;  %v1131_v40 = vmul.f32 %v710_v30, %v710_v30  ;;  %854 = vst [vmem:[%s1707_s11 + $0x228] sm:$0xff] %v519_v35  ;;  %856 = vst [vmem:[%s1707_s11 + $0x238] sm:$0xff] %v712_v36  ;;  %v966_v42 = vadd.f32 %v965_v25, %v519_v35 }
 0x12a   : > { %v1205_v41 = vadd.f32 %v1204_v31, %v1129_v34  ;;  %v1130_v43 = vmul.f32 %v519_v35, %v519_v35  ;;  %v1040_v44 = vadd.f32 %v1039_v27, %v712_v36  ;;  %v1132_v46 = vmul.f32 %v712_v36, %v712_v36 }
 0x12b   : > { %v1279_v45 = vadd.f32 %v1278_v32, %v1131_v40 }
 0x12c   : > { %v1242_v47 = vadd.f32 %v1241_v37, %v1130_v43  ;;  %v1316_v48 = vadd.f32 %v1315_v38, %v1132_v46  ;;  %v523_v49 = vpop.f32.mrb[36].mxu0  ;;  %v716_v50 = vpop.f32.mrb[36].mxu1 }
 0x12d   : > { %857 = vst [vmem:[%s1707_s11 + $0x240] sm:$0xff] %v523_v49  ;;  %v930_v51 = vadd.f32 %v929_v33, %v523_v49  ;;  %v1133_v52 = vmul.f32 %v523_v49, %v523_v49  ;;  %859 = vst [vmem:[%s1707_s11 + $0x250] sm:$0xff] %v716_v50  ;;  %v1004_v53 = vadd.f32 %v1003_v39, %v716_v50  ;;  %v525_v55 = vpop.f32.mrb[37].mxu0  ;;  %v718_v56 = vpop.f32.mrb[37].mxu1 }
 0x12e   : > { %v1135_v54 = vmul.f32 %v716_v50, %v716_v50  ;;  %858 = vst [vmem:[%s1707_s11 + $0x248] sm:$0xff] %v525_v55  ;;  %v967_v57 = vadd.f32 %v966_v42, %v525_v55  ;;  %v1134_v58 = vmul.f32 %v525_v55, %v525_v55  ;;  %860 = vst [vmem:[%s1707_s11 + $0x258] sm:$0xff] %v718_v56  ;;  %v527_v61 = vpop.f32.mrb[38].mxu0  ;;  %v720_v62 = vpop.f32.mrb[38].mxu1 }
 0x12f   : > { %v1041_v59 = vadd.f32 %v1040_v44, %v718_v56  ;;  %v1136_v60 = vmul.f32 %v718_v56, %v718_v56  ;;  %v1206_v63 = vadd.f32 %v1205_v41, %v1133_v52  ;;  %861 = vst [vmem:[%s1707_s11 + $0x260] sm:$0xff] %v527_v61  ;;  %v931_v1 = vadd.f32 %v930_v51, %v527_v61  ;;  %v529_v3 = vpop.f32.mrb[39].mxu0  ;;  %v722_v4 = vpop.f32.mrb[39].mxu1 }
 0x130   : > { %v1280_v0 = vadd.f32 %v1279_v45, %v1135_v54  ;;  %v1137_v2 = vmul.f32 %v527_v61, %v527_v61  ;;  %863 = vst [vmem:[%s1707_s11 + $0x270] sm:$0xff] %v720_v62  ;;  %v1243_v5 = vadd.f32 %v1242_v47, %v1134_v58  ;;  %v1005_v7 = vadd.f32 %v1004_v53, %v720_v62 }
 0x131   : > { %v1317_v6 = vadd.f32 %v1316_v48, %v1136_v60  ;;  %v1139_v8 = vmul.f32 %v720_v62, %v720_v62  ;;  %862 = vst [vmem:[%s1707_s11 + $0x268] sm:$0xff] %v529_v3  ;;  %864 = vst [vmem:[%s1707_s11 + $0x278] sm:$0xff] %v722_v4  ;;  %v968_v10 = vadd.f32 %v967_v57, %v529_v3 }
 0x132   : > { %v1207_v9 = vadd.f32 %v1206_v63, %v1137_v2  ;;  %v1138_v11 = vmul.f32 %v529_v3, %v529_v3  ;;  %v1042_v12 = vadd.f32 %v1041_v59, %v722_v4  ;;  %v1140_v14 = vmul.f32 %v722_v4, %v722_v4 }
 0x133   : > { %v1281_v13 = vadd.f32 %v1280_v0, %v1139_v8 }
 0x134   : > { %v1244_v15 = vadd.f32 %v1243_v5, %v1138_v11  ;;  %v1318_v16 = vadd.f32 %v1317_v6, %v1140_v14  ;;  %v533_v17 = vpop.f32.mrb[40].mxu0  ;;  %v726_v18 = vpop.f32.mrb[40].mxu1 }
 0x135   : > { %865 = vst [vmem:[%s1707_s11 + $0x280] sm:$0xff] %v533_v17  ;;  %v932_v19 = vadd.f32 %v931_v1, %v533_v17  ;;  %v1141_v20 = vmul.f32 %v533_v17, %v533_v17  ;;  %867 = vst [vmem:[%s1707_s11 + $0x290] sm:$0xff] %v726_v18  ;;  %v1006_v21 = vadd.f32 %v1005_v7, %v726_v18  ;;  %v535_v23 = vpop.f32.mrb[41].mxu0  ;;  %v728_v24 = vpop.f32.mrb[41].mxu1 }
 0x136   : > { %v1143_v22 = vmul.f32 %v726_v18, %v726_v18  ;;  %866 = vst [vmem:[%s1707_s11 + $0x288] sm:$0xff] %v535_v23  ;;  %v969_v25 = vadd.f32 %v968_v10, %v535_v23  ;;  %v1142_v26 = vmul.f32 %v535_v23, %v535_v23  ;;  %868 = vst [vmem:[%s1707_s11 + $0x298] sm:$0xff] %v728_v24  ;;  %v537_v29 = vpop.f32.mrb[42].mxu0  ;;  %v730_v30 = vpop.f32.mrb[42].mxu1 }
 0x137   : > { %v1043_v27 = vadd.f32 %v1042_v12, %v728_v24  ;;  %v1144_v28 = vmul.f32 %v728_v24, %v728_v24  ;;  %v1208_v31 = vadd.f32 %v1207_v9, %v1141_v20  ;;  %869 = vst [vmem:[%s1707_s11 + $0x2a0] sm:$0xff] %v537_v29  ;;  %v933_v33 = vadd.f32 %v932_v19, %v537_v29  ;;  %v539_v35 = vpop.f32.mrb[43].mxu0  ;;  %v732_v36 = vpop.f32.mrb[43].mxu1 }
 0x138   : > { %v1282_v32 = vadd.f32 %v1281_v13, %v1143_v22  ;;  %v1145_v34 = vmul.f32 %v537_v29, %v537_v29  ;;  %871 = vst [vmem:[%s1707_s11 + $0x2b0] sm:$0xff] %v730_v30  ;;  %v1245_v37 = vadd.f32 %v1244_v15, %v1142_v26  ;;  %v1007_v39 = vadd.f32 %v1006_v21, %v730_v30 }
 0x139   : > { %v1319_v38 = vadd.f32 %v1318_v16, %v1144_v28  ;;  %v1147_v40 = vmul.f32 %v730_v30, %v730_v30  ;;  %870 = vst [vmem:[%s1707_s11 + $0x2a8] sm:$0xff] %v539_v35  ;;  %872 = vst [vmem:[%s1707_s11 + $0x2b8] sm:$0xff] %v732_v36  ;;  %v970_v42 = vadd.f32 %v969_v25, %v539_v35 }
 0x13a   : > { %v1209_v41 = vadd.f32 %v1208_v31, %v1145_v34  ;;  %v1146_v43 = vmul.f32 %v539_v35, %v539_v35  ;;  %v1044_v44 = vadd.f32 %v1043_v27, %v732_v36  ;;  %v1148_v46 = vmul.f32 %v732_v36, %v732_v36 }
 0x13b   : > { %v1283_v45 = vadd.f32 %v1282_v32, %v1147_v40 }
 0x13c   : > { %v1246_v47 = vadd.f32 %v1245_v37, %v1146_v43  ;;  %v1320_v48 = vadd.f32 %v1319_v38, %v1148_v46  ;;  %v543_v49 = vpop.f32.mrb[44].mxu0  ;;  %v736_v50 = vpop.f32.mrb[44].mxu1 }
 0x13d   : > { %873 = vst [vmem:[%s1707_s11 + $0x2c0] sm:$0xff] %v543_v49  ;;  %v934_v51 = vadd.f32 %v933_v33, %v543_v49  ;;  %v1149_v52 = vmul.f32 %v543_v49, %v543_v49  ;;  %875 = vst [vmem:[%s1707_s11 + $0x2d0] sm:$0xff] %v736_v50  ;;  %v1008_v53 = vadd.f32 %v1007_v39, %v736_v50  ;;  %v545_v55 = vpop.f32.mrb[45].mxu0  ;;  %v738_v56 = vpop.f32.mrb[45].mxu1 }
 0x13e   : > { %v1151_v54 = vmul.f32 %v736_v50, %v736_v50  ;;  %874 = vst [vmem:[%s1707_s11 + $0x2c8] sm:$0xff] %v545_v55  ;;  %v971_v57 = vadd.f32 %v970_v42, %v545_v55  ;;  %v1150_v58 = vmul.f32 %v545_v55, %v545_v55  ;;  %876 = vst [vmem:[%s1707_s11 + $0x2d8] sm:$0xff] %v738_v56  ;;  %v547_v61 = vpop.f32.mrb[46].mxu0  ;;  %v740_v62 = vpop.f32.mrb[46].mxu1 }
 0x13f   : > { %v1045_v59 = vadd.f32 %v1044_v44, %v738_v56  ;;  %v1152_v60 = vmul.f32 %v738_v56, %v738_v56  ;;  %v1210_v63 = vadd.f32 %v1209_v41, %v1149_v52  ;;  %877 = vst [vmem:[%s1707_s11 + $0x2e0] sm:$0xff] %v547_v61  ;;  %v935_v1 = vadd.f32 %v934_v51, %v547_v61  ;;  %v549_v3 = vpop.f32.mrb[47].mxu0  ;;  %v742_v4 = vpop.f32.mrb[47].mxu1 }
 0x140   : > { %v1284_v0 = vadd.f32 %v1283_v45, %v1151_v54  ;;  %v1153_v2 = vmul.f32 %v547_v61, %v547_v61  ;;  %879 = vst [vmem:[%s1707_s11 + $0x2f0] sm:$0xff] %v740_v62  ;;  %v1247_v5 = vadd.f32 %v1246_v47, %v1150_v58  ;;  %v1009_v7 = vadd.f32 %v1008_v53, %v740_v62 }
 0x141   : > { %v1321_v6 = vadd.f32 %v1320_v48, %v1152_v60  ;;  %v1155_v8 = vmul.f32 %v740_v62, %v740_v62  ;;  %878 = vst [vmem:[%s1707_s11 + $0x2e8] sm:$0xff] %v549_v3  ;;  %880 = vst [vmem:[%s1707_s11 + $0x2f8] sm:$0xff] %v742_v4  ;;  %v972_v10 = vadd.f32 %v971_v57, %v549_v3 }
 0x142   : > { %v1211_v9 = vadd.f32 %v1210_v63, %v1153_v2  ;;  %v1154_v11 = vmul.f32 %v549_v3, %v549_v3  ;;  %v1046_v12 = vadd.f32 %v1045_v59, %v742_v4  ;;  %v1156_v14 = vmul.f32 %v742_v4, %v742_v4 }
 0x143   : > { %v1285_v13 = vadd.f32 %v1284_v0, %v1155_v8 }
 0x144   : > { %v1248_v15 = vadd.f32 %v1247_v5, %v1154_v11  ;;  %v1322_v16 = vadd.f32 %v1321_v6, %v1156_v14  ;;  %v553_v17 = vpop.f32.mrb[48].mxu0  ;;  %v746_v18 = vpop.f32.mrb[48].mxu1 }
 0x145   : > { %881 = vst [vmem:[%s1707_s11 + $0x300] sm:$0xff] %v553_v17  ;;  %v936_v19 = vadd.f32 %v935_v1, %v553_v17  ;;  %v1157_v20 = vmul.f32 %v553_v17, %v553_v17  ;;  %883 = vst [vmem:[%s1707_s11 + $0x310] sm:$0xff] %v746_v18  ;;  %v1010_v21 = vadd.f32 %v1009_v7, %v746_v18  ;;  %v555_v23 = vpop.f32.mrb[49].mxu0  ;;  %v748_v24 = vpop.f32.mrb[49].mxu1 }
 0x146   : > { %v1159_v22 = vmul.f32 %v746_v18, %v746_v18  ;;  %882 = vst [vmem:[%s1707_s11 + $0x308] sm:$0xff] %v555_v23  ;;  %v973_v25 = vadd.f32 %v972_v10, %v555_v23  ;;  %v1158_v26 = vmul.f32 %v555_v23, %v555_v23  ;;  %884 = vst [vmem:[%s1707_s11 + $0x318] sm:$0xff] %v748_v24  ;;  %v557_v29 = vpop.f32.mrb[50].mxu0  ;;  %v750_v30 = vpop.f32.mrb[50].mxu1 }
 0x147   : > { %v1047_v27 = vadd.f32 %v1046_v12, %v748_v24  ;;  %v1160_v28 = vmul.f32 %v748_v24, %v748_v24  ;;  %v1212_v31 = vadd.f32 %v1211_v9, %v1157_v20  ;;  %885 = vst [vmem:[%s1707_s11 + $0x320] sm:$0xff] %v557_v29  ;;  %v937_v33 = vadd.f32 %v936_v19, %v557_v29  ;;  %v559_v35 = vpop.f32.mrb[51].mxu0  ;;  %v752_v36 = vpop.f32.mrb[51].mxu1 }
 0x148   : > { %v1286_v32 = vadd.f32 %v1285_v13, %v1159_v22  ;;  %v1161_v34 = vmul.f32 %v557_v29, %v557_v29  ;;  %887 = vst [vmem:[%s1707_s11 + $0x330] sm:$0xff] %v750_v30  ;;  %v1249_v37 = vadd.f32 %v1248_v15, %v1158_v26  ;;  %v1011_v39 = vadd.f32 %v1010_v21, %v750_v30 }
 0x149   : > { %v1323_v38 = vadd.f32 %v1322_v16, %v1160_v28  ;;  %v1163_v40 = vmul.f32 %v750_v30, %v750_v30  ;;  %886 = vst [vmem:[%s1707_s11 + $0x328] sm:$0xff] %v559_v35  ;;  %888 = vst [vmem:[%s1707_s11 + $0x338] sm:$0xff] %v752_v36  ;;  %v974_v42 = vadd.f32 %v973_v25, %v559_v35 }
 0x14a   : > { %v1213_v41 = vadd.f32 %v1212_v31, %v1161_v34  ;;  %v1162_v43 = vmul.f32 %v559_v35, %v559_v35  ;;  %v1048_v44 = vadd.f32 %v1047_v27, %v752_v36  ;;  %v1164_v46 = vmul.f32 %v752_v36, %v752_v36 }
 0x14b   : > { %v1287_v45 = vadd.f32 %v1286_v32, %v1163_v40 }
 0x14c   : > { %v1250_v47 = vadd.f32 %v1249_v37, %v1162_v43  ;;  %v1324_v48 = vadd.f32 %v1323_v38, %v1164_v46  ;;  %v563_v49 = vpop.f32.mrb[52].mxu0  ;;  %v756_v50 = vpop.f32.mrb[52].mxu1 }
 0x14d   : > { %889 = vst [vmem:[%s1707_s11 + $0x340] sm:$0xff] %v563_v49  ;;  %v938_v51 = vadd.f32 %v937_v33, %v563_v49  ;;  %v1165_v52 = vmul.f32 %v563_v49, %v563_v49  ;;  %891 = vst [vmem:[%s1707_s11 + $0x350] sm:$0xff] %v756_v50  ;;  %v1012_v53 = vadd.f32 %v1011_v39, %v756_v50  ;;  %v565_v55 = vpop.f32.mrb[53].mxu0  ;;  %v758_v56 = vpop.f32.mrb[53].mxu1 }
 0x14e   : > { %v1167_v54 = vmul.f32 %v756_v50, %v756_v50  ;;  %890 = vst [vmem:[%s1707_s11 + $0x348] sm:$0xff] %v565_v55  ;;  %v975_v57 = vadd.f32 %v974_v42, %v565_v55  ;;  %v1166_v58 = vmul.f32 %v565_v55, %v565_v55  ;;  %892 = vst [vmem:[%s1707_s11 + $0x358] sm:$0xff] %v758_v56  ;;  %v567_v61 = vpop.f32.mrb[54].mxu0  ;;  %v760_v62 = vpop.f32.mrb[54].mxu1 }
 0x14f   : > { %v1049_v59 = vadd.f32 %v1048_v44, %v758_v56  ;;  %v1168_v60 = vmul.f32 %v758_v56, %v758_v56  ;;  %v1214_v63 = vadd.f32 %v1213_v41, %v1165_v52  ;;  %893 = vst [vmem:[%s1707_s11 + $0x360] sm:$0xff] %v567_v61  ;;  %v939_v1 = vadd.f32 %v938_v51, %v567_v61  ;;  %v569_v3 = vpop.f32.mrb[55].mxu0  ;;  %v762_v4 = vpop.f32.mrb[55].mxu1 }
 0x150   : > { %v1288_v0 = vadd.f32 %v1287_v45, %v1167_v54  ;;  %v1169_v2 = vmul.f32 %v567_v61, %v567_v61  ;;  %895 = vst [vmem:[%s1707_s11 + $0x370] sm:$0xff] %v760_v62  ;;  %v1251_v5 = vadd.f32 %v1250_v47, %v1166_v58  ;;  %v1013_v7 = vadd.f32 %v1012_v53, %v760_v62 }
 0x151   : > { %v1325_v6 = vadd.f32 %v1324_v48, %v1168_v60  ;;  %v1171_v8 = vmul.f32 %v760_v62, %v760_v62  ;;  %894 = vst [vmem:[%s1707_s11 + $0x368] sm:$0xff] %v569_v3  ;;  %896 = vst [vmem:[%s1707_s11 + $0x378] sm:$0xff] %v762_v4  ;;  %v976_v10 = vadd.f32 %v975_v57, %v569_v3 }
 0x152   : > { %v1215_v9 = vadd.f32 %v1214_v63, %v1169_v2  ;;  %v1170_v11 = vmul.f32 %v569_v3, %v569_v3  ;;  %v1050_v12 = vadd.f32 %v1049_v59, %v762_v4  ;;  %v1172_v14 = vmul.f32 %v762_v4, %v762_v4 }
 0x153   : > { %v1289_v13 = vadd.f32 %v1288_v0, %v1171_v8 }
 0x154   : > { %v1252_v15 = vadd.f32 %v1251_v5, %v1170_v11  ;;  %v1326_v16 = vadd.f32 %v1325_v6, %v1172_v14  ;;  %v573_v17 = vpop.f32.mrb[56].mxu0  ;;  %v766_v18 = vpop.f32.mrb[56].mxu1 }
 0x155   : > { %897 = vst [vmem:[%s1707_s11 + $0x380] sm:$0xff] %v573_v17  ;;  %v940_v19 = vadd.f32 %v939_v1, %v573_v17  ;;  %v1173_v20 = vmul.f32 %v573_v17, %v573_v17  ;;  %899 = vst [vmem:[%s1707_s11 + $0x390] sm:$0xff] %v766_v18  ;;  %v1014_v21 = vadd.f32 %v1013_v7, %v766_v18  ;;  %v575_v23 = vpop.f32.mrb[57].mxu0  ;;  %v768_v24 = vpop.f32.mrb[57].mxu1 }
 0x156   : > { %v1175_v22 = vmul.f32 %v766_v18, %v766_v18  ;;  %898 = vst [vmem:[%s1707_s11 + $0x388] sm:$0xff] %v575_v23  ;;  %v977_v25 = vadd.f32 %v976_v10, %v575_v23  ;;  %v1174_v26 = vmul.f32 %v575_v23, %v575_v23  ;;  %900 = vst [vmem:[%s1707_s11 + $0x398] sm:$0xff] %v768_v24  ;;  %v577_v29 = vpop.f32.mrb[58].mxu0  ;;  %v770_v30 = vpop.f32.mrb[58].mxu1 }
 0x157   : > { %v1051_v27 = vadd.f32 %v1050_v12, %v768_v24  ;;  %v1176_v28 = vmul.f32 %v768_v24, %v768_v24  ;;  %v1216_v31 = vadd.f32 %v1215_v9, %v1173_v20  ;;  %901 = vst [vmem:[%s1707_s11 + $0x3a0] sm:$0xff] %v577_v29  ;;  %v941_v33 = vadd.f32 %v940_v19, %v577_v29  ;;  %v579_v35 = vpop.f32.mrb[59].mxu0  ;;  %v772_v36 = vpop.f32.mrb[59].mxu1 }
 0x158   : > { %v1290_v32 = vadd.f32 %v1289_v13, %v1175_v22  ;;  %v1177_v34 = vmul.f32 %v577_v29, %v577_v29  ;;  %903 = vst [vmem:[%s1707_s11 + $0x3b0] sm:$0xff] %v770_v30  ;;  %v1253_v37 = vadd.f32 %v1252_v15, %v1174_v26  ;;  %v1015_v39 = vadd.f32 %v1014_v21, %v770_v30 }
 0x159   : > { %v1327_v38 = vadd.f32 %v1326_v16, %v1176_v28  ;;  %v1179_v40 = vmul.f32 %v770_v30, %v770_v30  ;;  %902 = vst [vmem:[%s1707_s11 + $0x3a8] sm:$0xff] %v579_v35  ;;  %904 = vst [vmem:[%s1707_s11 + $0x3b8] sm:$0xff] %v772_v36  ;;  %v978_v42 = vadd.f32 %v977_v25, %v579_v35 }
 0x15a   : > { %v1217_v41 = vadd.f32 %v1216_v31, %v1177_v34  ;;  %v1178_v43 = vmul.f32 %v579_v35, %v579_v35  ;;  %v1052_v44 = vadd.f32 %v1051_v27, %v772_v36  ;;  %v1180_v46 = vmul.f32 %v772_v36, %v772_v36 }
 0x15b   : > { %v1291_v45 = vadd.f32 %v1290_v32, %v1179_v40 }
 0x15c   : > { %v1254_v47 = vadd.f32 %v1253_v37, %v1178_v43  ;;  %v1328_v48 = vadd.f32 %v1327_v38, %v1180_v46  ;;  %v583_v49 = vpop.f32.mrb[60].mxu0  ;;  %v776_v50 = vpop.f32.mrb[60].mxu1 }
 0x15d   : > { %905 = vst [vmem:[%s1707_s11 + $0x3c0] sm:$0xff] %v583_v49  ;;  %v942_v51 = vadd.f32 %v941_v33, %v583_v49  ;;  %v1181_v52 = vmul.f32 %v583_v49, %v583_v49  ;;  %907 = vst [vmem:[%s1707_s11 + $0x3d0] sm:$0xff] %v776_v50  ;;  %v1016_v53 = vadd.f32 %v1015_v39, %v776_v50  ;;  %v585_v55 = vpop.f32.mrb[61].mxu0  ;;  %v778_v56 = vpop.f32.mrb[61].mxu1 }
 0x15e   : > { %v1183_v54 = vmul.f32 %v776_v50, %v776_v50  ;;  %906 = vst [vmem:[%s1707_s11 + $0x3c8] sm:$0xff] %v585_v55  ;;  %v979_v57 = vadd.f32 %v978_v42, %v585_v55  ;;  %v1182_v58 = vmul.f32 %v585_v55, %v585_v55  ;;  %908 = vst [vmem:[%s1707_s11 + $0x3d8] sm:$0xff] %v778_v56  ;;  %v587_v61 = vpop.f32.mrb[62].mxu0  ;;  %v780_v62 = vpop.f32.mrb[62].mxu1 }
 0x15f   : > { %v1053_v59 = vadd.f32 %v1052_v44, %v778_v56  ;;  %v1184_v60 = vmul.f32 %v778_v56, %v778_v56  ;;  %v1218_v63 = vadd.f32 %v1217_v41, %v1181_v52  ;;  %909 = vst [vmem:[%s1707_s11 + $0x3e0] sm:$0xff] %v587_v61  ;;  %v943_v1 = vadd.f32 %v942_v51, %v587_v61  ;;  %v589_v3 = vpop.f32.mrb[63].mxu0  ;;  %v782_v4 = vpop.f32.mrb[63].mxu1 }
 0x160   : > { %v1292_v0 = vadd.f32 %v1291_v45, %v1183_v54  ;;  %v1185_v2 = vmul.f32 %v587_v61, %v587_v61  ;;  %911 = vst [vmem:[%s1707_s11 + $0x3f0] sm:$0xff] %v780_v62  ;;  %v1255_v5 = vadd.f32 %v1254_v47, %v1182_v58  ;;  %v1017_v7 = vadd.f32 %v1016_v53, %v780_v62 }
 0x161   : > { %v1329_v6 = vadd.f32 %v1328_v48, %v1184_v60  ;;  %v1187_v8 = vmul.f32 %v780_v62, %v780_v62  ;;  %910 = vst [vmem:[%s1707_s11 + $0x3e8] sm:$0xff] %v589_v3  ;;  %912 = vst [vmem:[%s1707_s11 + $0x3f8] sm:$0xff] %v782_v4  ;;  %v944_v9 = vrot.slane %v943_v1, 4  ;;  %v980_v11 = vadd.f32 %v979_v57, %v589_v3 }
 0x162   : > { %v1219_v10 = vadd.f32 %v1218_v63, %v1185_v2  ;;  %v1186_v12 = vmul.f32 %v589_v3, %v589_v3  ;;  %v1018_v13 = vrot.slane %v1017_v7, 4  ;;  %v1054_v15 = vadd.f32 %v1053_v59, %v782_v4 }
 0x163   : > { %v1293_v14 = vadd.f32 %v1292_v0, %v1187_v8  ;;  %v1188_v16 = vmul.f32 %v782_v4, %v782_v4  ;;  %v945_v17 = vadd.f32 %v944_v9, %v943_v1  ;;  %v981_v19 = vrot.slane %v980_v11, 4 }
 0x164   : > { %v1220_v18 = vrot.slane %v1219_v10, 4  ;;  %v1256_v20 = vadd.f32 %v1255_v5, %v1186_v12  ;;  %v1019_v21 = vadd.f32 %v1018_v13, %v1017_v7  ;;  %v1055_v23 = vrot.slane %v1054_v15, 4 }
 0x165   : > { %v1294_v22 = vrot.slane %v1293_v14, 4  ;;  %v1330_v24 = vadd.f32 %v1329_v6, %v1188_v16  ;;  %v946_v25 = vrot.slane %v945_v17, 2  ;;  %v982_v27 = vadd.f32 %v981_v19, %v980_v11 }
 0x166   : > { %v1221_v26 = vadd.f32 %v1220_v18, %v1219_v10  ;;  %v1257_v28 = vrot.slane %v1256_v20, 4  ;;  %v1020_v29 = vrot.slane %v1019_v21, 2  ;;  %v1056_v31 = vadd.f32 %v1055_v23, %v1054_v15 }
 0x167   : > { %v1295_v30 = vadd.f32 %v1294_v22, %v1293_v14  ;;  %v1331_v32 = vrot.slane %v1330_v24, 4  ;;  %v947_v33 = vadd.f32 %v946_v25, %v945_v17  ;;  %v983_v35 = vrot.slane %v982_v27, 2 }
 0x168   : > { %v1222_v34 = vrot.slane %v1221_v26, 2  ;;  %v1258_v36 = vadd.f32 %v1257_v28, %v1256_v20  ;;  %v1021_v37 = vadd.f32 %v1020_v29, %v1019_v21  ;;  %v1057_v39 = vrot.slane %v1056_v31, 2 }
 0x169   : > { %v1296_v38 = vrot.slane %v1295_v30, 2  ;;  %v1332_v40 = vadd.f32 %v1331_v32, %v1330_v24  ;;  %v948_v41 = vrot.slane %v947_v33, 1  ;;  %v984_v43 = vadd.f32 %v983_v35, %v982_v27 }
 0x16a   : > { %v1223_v42 = vadd.f32 %v1222_v34, %v1221_v26  ;;  %v1259_v44 = vrot.slane %v1258_v36, 2  ;;  %v1022_v45 = vrot.slane %v1021_v37, 1  ;;  %v1058_v47 = vadd.f32 %v1057_v39, %v1056_v31 }
 0x16b   : > { %v1297_v46 = vadd.f32 %v1296_v38, %v1295_v30  ;;  %v1333_v48 = vrot.slane %v1332_v40, 2  ;;  %v985_v50 = vrot.slane %v984_v43, 1  ;;  %v949_v55 = vadd.f32 %v948_v41, %v947_v33 }
 0x16c   : > { %v1224_v49 = vrot.slane %v1223_v42, 1  ;;  %v1260_v51 = vadd.f32 %v1259_v44, %v1258_v36  ;;  %v1059_v53 = vrot.slane %v1058_v47, 1  ;;  %v1023_v58 = vadd.f32 %v1022_v45, %v1021_v37 }
 0x16d   : > { %v1298_v52 = vrot.slane %v1297_v46, 1  ;;  %v1334_v54 = vadd.f32 %v1333_v48, %v1332_v40  ;;  %v986_v62 = vadd.f32 %v985_v50, %v984_v43 }
 0x16e   : > { %v1225_v56 = vadd.f32 %v1224_v49, %v1223_v42  ;;  %v1261_v57 = vrot.slane %v1260_v51, 1  ;;  %v1060_v2 = vadd.f32 %v1059_v53, %v1058_v47 }
 0x16f   : > { %v1299_v59 = vadd.f32 %v1298_v52, %v1297_v46  ;;  %v1335_v60 = vrot.slane %v1334_v54, 1 }
 0x170   : > { %v1338_v61 = vsel %vm1337_vm1, %v949_v55, %v1225_v56  ;;  %v1262_v63 = vadd.f32 %v1261_v57, %v1260_v51 }
 0x171   : > { %v1343_v0 = vsel %vm1342_vm2, %v1338_v61, 0.0  ;;  %v1340_v1 = vsel %vm1337_vm1, %v1023_v58, %v1299_v59  ;;  %v1336_v3 = vadd.f32 %v1335_v60, %v1334_v54 }
 0x172   : > { %1347 = vst [vmem:[%s188_s17] sm:$0xff] %v1343_v0  ;;  %v1345_v4 = vsel %vm1342_vm2, %v1340_v1, 0.0  ;;  %v1339_v5 = vsel %vm1337_vm1, %v986_v62, %v1262_v63 }
 0x173   : > { %1349 = vst [vmem:[%s188_s17 + $0x10] sm:$0xff] %v1345_v4  ;;  %v1344_v6 = vsel %vm1342_vm2, %v1339_v5, 0.0  ;;  %v1341_v7 = vsel %vm1337_vm1, %v1060_v2, %v1336_v3 }
 0x174   : > { %1348 = vst [vmem:[%s188_s17 + $0x8] sm:$0xff] %v1344_v6  ;;  %v1346_v8 = vsel %vm1342_vm2, %v1341_v7, 0.0 }
 0x175   : > { %1350 = vst [vmem:[%s188_s17 + $0x18] sm:$0xff] %v1346_v8 }
 0x176 PF: > { %s14_s12 = sadd.s32 1, %s1557_s12  }
 0x177   : > { %p11_p5 = scmp.ge.s32.totalorder %s14_s12, 4  }
 0x179   :  { %13 = sbr.rel (!%p11_p5) target bundleno = 1 (0x1), region = 70 }

// kernel: decoder_up_block.7
= control target key start
LH: loop header
LB: loop body
LE: loop exit
PB: predicated region body
PF: predicated region fallthrough
CT: control target
= control target key end

     0   :  { %s1266_s17 = smov 0   ;;  %s1958_s0 = inlined_call_operand.vmem [shape: f32[512,512], index: 0, kind: input, shape index: {}]   ;;  %s1959_s1 = inlined_call_operand.vmem [shape: f32[1,512], index: 1, kind: input, shape index: {}]   ;;  %s1960_s2 = inlined_call_operand.vmem [shape: f32[1,512], index: 2, kind: input, shape index: {}]   ;;  %s1961_s3 = inlined_call_operand.<no memory space> [shape: f32[1], index: 3, kind: input, shape index: {}]   ;;  %s1962_s4 = inlined_call_operand.vmem [shape: f32[512,512], index: 4, kind: output, shape index: {}]  }
   0x1   :  { %9 = sst [smem:[#allocation2]] %s1961_s3 }
   0x2 LB: > { %s1207_s18 = sadd.s32 4294967295, %s1236_s17   ;;  %p1211_p0 = scmp.ge.s32.totalorder %s1236_s17, 1  ;;  %s1236_s17 = sphi %s1266_s17, %s15_s17  }
   0x3   : > { %p165_p1 = scmp.lt.s32.totalorder %s1236_s17, 3 }
   0x5   : > { %p166_p2 = pnand %p1211_p0, %p165_p1 }
   0x6   : > { %s1212_s19 = sshll.u32 (!%p166_p2), %s1207_s18, 5  ;;  %v337_v0 = vlaneseq (!%p166_p2)  ;;  %s635_s20 = sld [smem:[#allocation2]] (!%p166_p2)  ;;  %v335_v2 = vld [vmem:[%s1959_s1] sm:$0xf] (!%p166_p2) }
   0x7   : > { %169 = sbr.rel (%p166_p2) target bundleno = 183 (0xb7), region = 36  ;;  %p194_p3 = scmp.lt.s32.totalorder (!%p166_p2), %s1212_s19, 63  ;;  %v485_v3 = vld [vmem:[%s1960_s2] sm:$0xf] (!%p166_p2) }
   0x8   : > { %v338_v1 = vshrl.u32 (!%p166_p2), %v337_v0, 7 }
   0xa   : > { %v339_v4 = vsub.s32 (!%p166_p2), 0, %v338_v1  ;;  %v343_v5 = vsub.s32 (!%p166_p2), 1, %v338_v1  ;;  %v347_v6 = vsub.s32 (!%p166_p2), 2, %v338_v1  ;;  %v351_v7 = vsub.s32 (!%p166_p2), 3, %v338_v1 }
   0xc   : > { %v1290_v8 = vrot.slane (!%p166_p2), %v335_v2, %v339_v4  ;;  %v1292_v9 = vrot.slane (!%p166_p2), %v485_v3, %v339_v4  ;;  %v1294_v10 = vrot.slane (!%p166_p2), %v335_v2, %v343_v5  ;;  %v1296_v11 = vrot.slane (!%p166_p2), %v485_v3, %v343_v5 }
   0xd   : > { %v1301_v15 = vrot.slane (!%p166_p2), %v335_v2, %v347_v6  ;;  %v1303_v16 = vrot.slane (!%p166_p2), %v485_v3, %v347_v6  ;;  %v1305_v17 = vrot.slane (!%p166_p2), %v335_v2, %v351_v7  ;;  %v1308_v19 = vstv (!%p166_p2), %s635_s20 }
   0xe   : > { %s1964_s19 = smov (!%p194_p3, %s1212_s19), 63  ;;  %v1312_v22 = vrot.slane %v485_v3, %v351_v7 }
   0xf   : > { %s1220_s24 = sshll.u32 %s1964_s19, 5 }
  0x10   : > { %s1288_s27 = scalar_lea.vmem %s1958_s0, %s1220_s24  ;;  %s1335_s30 = scalar_lea.vmem %s1962_s4, %s1220_s24 }
  0x11   : > { %v207_v12 = vld [vmem:[%s1288_s27] sm:$0xff]  ;;  %v208_v13 = vld [vmem:[%s1288_s27 + $0x8] sm:$0xff]  ;;  %v209_v14 = vld [vmem:[%s1288_s27 + $0x10] sm:$0xff] }
  0x12   : > { %v357_v18 = vsub.f32 %v207_v12, %v1290_v8  ;;  %v358_v20 = vsub.f32 %v208_v13, %v1294_v10  ;;  %v210_v21 = vld [vmem:[%s1288_s27 + $0x18] sm:$0xff]  ;;  %v211_v23 = vld [vmem:[%s1288_s27 + $0x20] sm:$0xff]  ;;  %v212_v24 = vld [vmem:[%s1288_s27 + $0x28] sm:$0xff]  ;;  %v359_v25 = vsub.f32 %v209_v14, %v1301_v15 }
  0x13   : > { %v360_v26 = vsub.f32 %v210_v21, %v1305_v17  ;;  %v361_v27 = vsub.f32 %v211_v23, %v1290_v8  ;;  %v362_v28 = vsub.f32 %v212_v24, %v1294_v10  ;;  %v213_v29 = vld [vmem:[%s1288_s27 + $0x30] sm:$0xff]  ;;  %v214_v30 = vld [vmem:[%s1288_s27 + $0x38] sm:$0xff]  ;;  %v215_v43 = vld [vmem:[%s1288_s27 + $0x40] sm:$0xff] }
  0x14   : > { %v507_v31 = vmul.f32 %v1292_v9, %v357_v18  ;;  %v508_v32 = vmul.f32 %v1296_v11, %v358_v20  ;;  %v363_v33 = vsub.f32 %v213_v29, %v1301_v15  ;;  %v364_v34 = vsub.f32 %v214_v30, %v1305_v17  ;;  %v216_v47 = vld [vmem:[%s1288_s27 + $0x48] sm:$0xff]  ;;  %v217_v48 = vld [vmem:[%s1288_s27 + $0x50] sm:$0xff]  ;;  %v218_v49 = vld [vmem:[%s1288_s27 + $0x58] sm:$0xff] }
  0x15   : > { %v509_v35 = vmul.f32 %v1303_v16, %v359_v25  ;;  %v510_v36 = vmul.f32 %v1312_v22, %v360_v26  ;;  %v511_v37 = vmul.f32 %v1292_v9, %v361_v27  ;;  %v512_v38 = vmul.f32 %v1296_v11, %v362_v28  ;;  %v219_v61 = vld [vmem:[%s1288_s27 + $0x60] sm:$0xff]  ;;  %v220_v62 = vld [vmem:[%s1288_s27 + $0x68] sm:$0xff]  ;;  %v221_v18 = vld [vmem:[%s1288_s27 + $0x70] sm:$0xff] }
  0x16   : > { %vm636_vm0 = vcmp.ge.f32.partialorder %v507_v31, 0.0  ;;  %v765_v39 = vmul.f32 %v1308_v19, %v507_v31  ;;  %vm637_vm1 = vcmp.ge.f32.partialorder %v508_v32, 0.0  ;;  %v766_v40 = vmul.f32 %v1308_v19, %v508_v32  ;;  %v222_v20 = vld [vmem:[%s1288_s27 + $0x78] sm:$0xff]  ;;  %v223_v28 = vld [vmem:[%s1288_s27 + $0x80] sm:$0xff]  ;;  %v224_v29 = vld [vmem:[%s1288_s27 + $0x88] sm:$0xff] }
  0x17   : > { %vm638_vm2 = vcmp.ge.f32.partialorder %v509_v35, 0.0  ;;  %v767_v41 = vmul.f32 %v1308_v19, %v509_v35  ;;  %vm639_vm3 = vcmp.ge.f32.partialorder %v510_v36, 0.0  ;;  %v768_v42 = vmul.f32 %v1308_v19, %v510_v36 }
  0x18   : > { %v893_v44 = vsel %vm636_vm0, %v507_v31, %v765_v39  ;;  %v894_v45 = vsel %vm637_vm1, %v508_v32, %v766_v40  ;;  %vm640_vm4 = vcmp.ge.f32.partialorder %v511_v37, 0.0  ;;  %v769_v46 = vmul.f32 %v1308_v19, %v511_v37 }
  0x19   : > { %1021 = vst [vmem:[%s1335_s30] sm:$0xff] %v893_v44  ;;  %1022 = vst [vmem:[%s1335_s30 + $0x8] sm:$0xff] %v894_v45  ;;  %v895_v50 = vsel %vm638_vm2, %v509_v35, %v767_v41  ;;  %v896_v51 = vsel %vm639_vm3, %v510_v36, %v768_v42  ;;  %vm641_vm5 = vcmp.ge.f32.partialorder %v512_v38, 0.0  ;;  %v770_v52 = vmul.f32 %v1308_v19, %v512_v38  ;;  %v226_v35 = vld [vmem:[%s1288_s27 + $0x98] sm:$0xff] }
  0x1a   : > { %1023 = vst [vmem:[%s1335_s30 + $0x10] sm:$0xff] %v895_v50  ;;  %1024 = vst [vmem:[%s1335_s30 + $0x18] sm:$0xff] %v896_v51  ;;  %v897_v53 = vsel %vm640_vm4, %v511_v37, %v769_v46  ;;  %v513_v54 = vmul.f32 %v1303_v16, %v363_v33  ;;  %v514_v55 = vmul.f32 %v1312_v22, %v364_v34  ;;  %v225_v34 = vld [vmem:[%s1288_s27 + $0x90] sm:$0xff]  ;;  %v227_v46 = vld [vmem:[%s1288_s27 + $0xa0] sm:$0xff] }
  0x1b   : > { %v365_v56 = vsub.f32 %v215_v43, %v1290_v8  ;;  %1025 = vst [vmem:[%s1335_s30 + $0x20] sm:$0xff] %v897_v53  ;;  %v898_v57 = vsel %vm641_vm5, %v512_v38, %v770_v52  ;;  %v366_v58 = vsub.f32 %v216_v47, %v1294_v10  ;;  %v367_v59 = vsub.f32 %v217_v48, %v1301_v15  ;;  %v228_v47 = vld [vmem:[%s1288_s27 + $0xa8] sm:$0xff] }
  0x1c   : > { %v368_v60 = vsub.f32 %v218_v49, %v1305_v17  ;;  %1026 = vst [vmem:[%s1335_s30 + $0x28] sm:$0xff] %v898_v57  ;;  %vm642_vm6 = vcmp.ge.f32.partialorder %v513_v54, 0.0  ;;  %v771_v63 = vmul.f32 %v1308_v19, %v513_v54  ;;  %vm643_vm7 = vcmp.ge.f32.partialorder %v514_v55, 0.0 }
  0x1d   : > { %v772_v0 = vmul.f32 %v1308_v19, %v514_v55  ;;  %v515_v1 = vmul.f32 %v1292_v9, %v365_v56  ;;  %v516_v2 = vmul.f32 %v1296_v11, %v366_v58  ;;  %v517_v3 = vmul.f32 %v1303_v16, %v367_v59 }
  0x1e   : > { %v518_v4 = vmul.f32 %v1312_v22, %v368_v60  ;;  %v899_v5 = vsel %vm642_vm6, %v513_v54, %v771_v63  ;;  %v369_v7 = vsub.f32 %v219_v61, %v1290_v8  ;;  %v370_v12 = vsub.f32 %v220_v62, %v1294_v10  ;;  %v229_v60 = vld [vmem:[%s1288_s27 + $0xb0] sm:$0xff]  ;;  %v230_v61 = vld [vmem:[%s1288_s27 + $0xb8] sm:$0xff] }
  0x1f   : > { %v900_v6 = vsel %vm643_vm7, %v514_v55, %v772_v0  ;;  %1027 = vst [vmem:[%s1335_s30 + $0x30] sm:$0xff] %v899_v5  ;;  %vm644_vm8 = vcmp.ge.f32.partialorder %v515_v1, 0.0  ;;  %v773_v13 = vmul.f32 %v1308_v19, %v515_v1  ;;  %vm645_vm9 = vcmp.ge.f32.partialorder %v516_v2, 0.0  ;;  %v232_v5 = vld [vmem:[%s1288_s27 + $0xc8] sm:$0xff] }
  0x20   : > { %1028 = vst [vmem:[%s1335_s30 + $0x38] sm:$0xff] %v900_v6  ;;  %v774_v14 = vmul.f32 %v1308_v19, %v516_v2  ;;  %vm646_vm10 = vcmp.ge.f32.partialorder %v517_v3, 0.0  ;;  %v775_v21 = vmul.f32 %v1308_v19, %v517_v3  ;;  %vm647_vm11 = vcmp.ge.f32.partialorder %v518_v4, 0.0 }
  0x21   : > { %v776_v23 = vmul.f32 %v1308_v19, %v518_v4  ;;  %v901_v24 = vsel %vm644_vm8, %v515_v1, %v773_v13  ;;  %v519_v26 = vmul.f32 %v1292_v9, %v369_v7  ;;  %v520_v27 = vmul.f32 %v1296_v11, %v370_v12 }
  0x22   : > { %v902_v25 = vsel %vm645_vm9, %v516_v2, %v774_v14  ;;  %1029 = vst [vmem:[%s1335_s30 + $0x40] sm:$0xff] %v901_v24  ;;  %v903_v30 = vsel %vm646_vm10, %v517_v3, %v775_v21  ;;  %v371_v32 = vsub.f32 %v221_v18, %v1301_v15  ;;  %v372_v33 = vsub.f32 %v222_v20, %v1305_v17  ;;  %v233_v14 = vld [vmem:[%s1288_s27 + $0xd0] sm:$0xff]  ;;  %v234_v18 = vld [vmem:[%s1288_s27 + $0xd8] sm:$0xff] }
  0x23   : > { %1030 = vst [vmem:[%s1335_s30 + $0x48] sm:$0xff] %v902_v25  ;;  %v904_v31 = vsel %vm647_vm11, %v518_v4, %v776_v23  ;;  %1031 = vst [vmem:[%s1335_s30 + $0x50] sm:$0xff] %v903_v30  ;;  %vm648_vm12 = vcmp.ge.f32.partialorder %v519_v26, 0.0  ;;  %v777_v36 = vmul.f32 %v1308_v19, %v519_v26  ;;  %vm649_vm13 = vcmp.ge.f32.partialorder %v520_v27, 0.0  ;;  %v231_v4 = vld [vmem:[%s1288_s27 + $0xc0] sm:$0xff] }
  0x24   : > { %1032 = vst [vmem:[%s1335_s30 + $0x58] sm:$0xff] %v904_v31  ;;  %v778_v37 = vmul.f32 %v1308_v19, %v520_v27  ;;  %v521_v38 = vmul.f32 %v1303_v16, %v371_v32  ;;  %v522_v39 = vmul.f32 %v1312_v22, %v372_v33  ;;  %v373_v40 = vsub.f32 %v223_v28, %v1290_v8  ;;  %v235_v31 = vld [vmem:[%s1288_s27 + $0xe0] sm:$0xff]  ;;  %v236_v32 = vld [vmem:[%s1288_s27 + $0xe8] sm:$0xff] }
  0x25   : > { %v374_v41 = vsub.f32 %v224_v29, %v1294_v10  ;;  %v905_v42 = vsel %vm648_vm12, %v519_v26, %v777_v36  ;;  %v375_v44 = vsub.f32 %v225_v34, %v1301_v15  ;;  %v376_v45 = vsub.f32 %v226_v35, %v1305_v17 }
  0x26   : > { %v906_v43 = vsel %vm649_vm13, %v520_v27, %v778_v37  ;;  %1033 = vst [vmem:[%s1335_s30 + $0x60] sm:$0xff] %v905_v42  ;;  %vm650_vm14 = vcmp.ge.f32.partialorder %v521_v38, 0.0  ;;  %v779_v48 = vmul.f32 %v1308_v19, %v521_v38  ;;  %vm651_vm15 = vcmp.ge.f32.partialorder %v522_v39, 0.0 }
  0x27   : > { %1034 = vst [vmem:[%s1335_s30 + $0x68] sm:$0xff] %v906_v43  ;;  %v780_v49 = vmul.f32 %v1308_v19, %v522_v39  ;;  %v523_v50 = vmul.f32 %v1292_v9, %v373_v40  ;;  %v524_v51 = vmul.f32 %v1296_v11, %v374_v41  ;;  %v525_v52 = vmul.f32 %v1303_v16, %v375_v44 }
  0x28   : > { %v526_v53 = vmul.f32 %v1312_v22, %v376_v45  ;;  %v907_v54 = vsel %vm650_vm14, %v521_v38, %v779_v48  ;;  %v377_v56 = vsub.f32 %v227_v46, %v1290_v8  ;;  %v378_v57 = vsub.f32 %v228_v47, %v1294_v10  ;;  %v237_v45 = vld [vmem:[%s1288_s27 + $0xf0] sm:$0xff]  ;;  %v238_v46 = vld [vmem:[%s1288_s27 + $0xf8] sm:$0xff] }
  0x29   : > { %v908_v55 = vsel %vm651_vm15, %v522_v39, %v780_v49  ;;  %1035 = vst [vmem:[%s1335_s30 + $0x70] sm:$0xff] %v907_v54  ;;  %vm652_vm0 = vcmp.ge.f32.partialorder %v523_v50, 0.0  ;;  %v781_v58 = vmul.f32 %v1308_v19, %v523_v50  ;;  %vm653_vm1 = vcmp.ge.f32.partialorder %v524_v51, 0.0  ;;  %v240_v54 = vld [vmem:[%s1288_s27 + $0x108] sm:$0xff] }
  0x2a   : > { %1036 = vst [vmem:[%s1335_s30 + $0x78] sm:$0xff] %v908_v55  ;;  %v782_v59 = vmul.f32 %v1308_v19, %v524_v51  ;;  %vm654_vm2 = vcmp.ge.f32.partialorder %v525_v52, 0.0  ;;  %v783_v62 = vmul.f32 %v1308_v19, %v525_v52  ;;  %vm655_vm3 = vcmp.ge.f32.partialorder %v526_v53, 0.0 }
  0x2b   : > { %v784_v63 = vmul.f32 %v1308_v19, %v526_v53  ;;  %v909_v0 = vsel %vm652_vm0, %v523_v50, %v781_v58  ;;  %v527_v2 = vmul.f32 %v1292_v9, %v377_v56  ;;  %v528_v3 = vmul.f32 %v1296_v11, %v378_v57 }
  0x2c   : > { %v910_v1 = vsel %vm653_vm1, %v524_v51, %v782_v59  ;;  %1037 = vst [vmem:[%s1335_s30 + $0x80] sm:$0xff] %v909_v0  ;;  %v911_v6 = vsel %vm654_vm2, %v525_v52, %v783_v62  ;;  %v379_v12 = vsub.f32 %v229_v60, %v1301_v15  ;;  %v380_v13 = vsub.f32 %v230_v61, %v1305_v17  ;;  %v241_v59 = vld [vmem:[%s1288_s27 + $0x110] sm:$0xff]  ;;  %v242_v60 = vld [vmem:[%s1288_s27 + $0x118] sm:$0xff] }
  0x2d   : > { %1038 = vst [vmem:[%s1335_s30 + $0x88] sm:$0xff] %v910_v1  ;;  %v912_v7 = vsel %vm655_vm3, %v526_v53, %v784_v63  ;;  %1039 = vst [vmem:[%s1335_s30 + $0x90] sm:$0xff] %v911_v6  ;;  %vm656_vm4 = vcmp.ge.f32.partialorder %v527_v2, 0.0  ;;  %v785_v20 = vmul.f32 %v1308_v19, %v527_v2  ;;  %vm657_vm5 = vcmp.ge.f32.partialorder %v528_v3, 0.0  ;;  %v239_v53 = vld [vmem:[%s1288_s27 + $0x100] sm:$0xff] }
  0x2e   : > { %1040 = vst [vmem:[%s1335_s30 + $0x98] sm:$0xff] %v912_v7  ;;  %v786_v21 = vmul.f32 %v1308_v19, %v528_v3  ;;  %v529_v23 = vmul.f32 %v1303_v16, %v379_v12  ;;  %v530_v24 = vmul.f32 %v1312_v22, %v380_v13  ;;  %v381_v25 = vsub.f32 %v231_v4, %v1290_v8  ;;  %v243_v7 = vld [vmem:[%s1288_s27 + $0x120] sm:$0xff]  ;;  %v244_v12 = vld [vmem:[%s1288_s27 + $0x128] sm:$0xff] }
  0x2f   : > { %v382_v26 = vsub.f32 %v232_v5, %v1294_v10  ;;  %v913_v27 = vsel %vm656_vm4, %v527_v2, %v785_v20  ;;  %v383_v29 = vsub.f32 %v233_v14, %v1301_v15  ;;  %v384_v30 = vsub.f32 %v234_v18, %v1305_v17 }
  0x30   : > { %v914_v28 = vsel %vm657_vm5, %v528_v3, %v786_v21  ;;  %1041 = vst [vmem:[%s1335_s30 + $0xa0] sm:$0xff] %v913_v27  ;;  %vm658_vm6 = vcmp.ge.f32.partialorder %v529_v23, 0.0  ;;  %v787_v33 = vmul.f32 %v1308_v19, %v529_v23  ;;  %vm659_vm7 = vcmp.ge.f32.partialorder %v530_v24, 0.0 }
  0x31   : > { %1042 = vst [vmem:[%s1335_s30 + $0xa8] sm:$0xff] %v914_v28  ;;  %v788_v34 = vmul.f32 %v1308_v19, %v530_v24  ;;  %v531_v35 = vmul.f32 %v1292_v9, %v381_v25  ;;  %v532_v36 = vmul.f32 %v1296_v11, %v382_v26  ;;  %v533_v37 = vmul.f32 %v1303_v16, %v383_v29 }
  0x32   : > { %v534_v38 = vmul.f32 %v1312_v22, %v384_v30  ;;  %v915_v39 = vsel %vm658_vm6, %v529_v23, %v787_v33  ;;  %v385_v41 = vsub.f32 %v235_v31, %v1290_v8  ;;  %v386_v42 = vsub.f32 %v236_v32, %v1294_v10  ;;  %v245_v30 = vld [vmem:[%s1288_s27 + $0x130] sm:$0xff]  ;;  %v246_v31 = vld [vmem:[%s1288_s27 + $0x138] sm:$0xff] }
  0x33   : > { %v916_v40 = vsel %vm659_vm7, %v530_v24, %v788_v34  ;;  %1043 = vst [vmem:[%s1335_s30 + $0xb0] sm:$0xff] %v915_v39  ;;  %vm660_vm8 = vcmp.ge.f32.partialorder %v531_v35, 0.0  ;;  %v789_v43 = vmul.f32 %v1308_v19, %v531_v35  ;;  %vm661_vm9 = vcmp.ge.f32.partialorder %v532_v36, 0.0  ;;  %v248_v39 = vld [vmem:[%s1288_s27 + $0x148] sm:$0xff] }
  0x34   : > { %1044 = vst [vmem:[%s1335_s30 + $0xb8] sm:$0xff] %v916_v40  ;;  %v790_v44 = vmul.f32 %v1308_v19, %v532_v36  ;;  %vm662_vm10 = vcmp.ge.f32.partialorder %v533_v37, 0.0  ;;  %v791_v47 = vmul.f32 %v1308_v19, %v533_v37  ;;  %vm663_vm11 = vcmp.ge.f32.partialorder %v534_v38, 0.0 }
  0x35   : > { %v792_v48 = vmul.f32 %v1308_v19, %v534_v38  ;;  %v917_v49 = vsel %vm660_vm8, %v531_v35, %v789_v43  ;;  %v535_v51 = vmul.f32 %v1292_v9, %v385_v41  ;;  %v536_v52 = vmul.f32 %v1296_v11, %v386_v42 }
  0x36   : > { %v918_v50 = vsel %vm661_vm9, %v532_v36, %v790_v44  ;;  %1045 = vst [vmem:[%s1335_s30 + $0xc0] sm:$0xff] %v917_v49  ;;  %v919_v55 = vsel %vm662_vm10, %v533_v37, %v791_v47  ;;  %v387_v57 = vsub.f32 %v237_v45, %v1301_v15  ;;  %v388_v58 = vsub.f32 %v238_v46, %v1305_v17  ;;  %v249_v44 = vld [vmem:[%s1288_s27 + $0x150] sm:$0xff]  ;;  %v250_v45 = vld [vmem:[%s1288_s27 + $0x158] sm:$0xff] }
  0x37   : > { %1046 = vst [vmem:[%s1335_s30 + $0xc8] sm:$0xff] %v918_v50  ;;  %v920_v56 = vsel %vm663_vm11, %v534_v38, %v792_v48  ;;  %1047 = vst [vmem:[%s1335_s30 + $0xd0] sm:$0xff] %v919_v55  ;;  %vm664_vm12 = vcmp.ge.f32.partialorder %v535_v51, 0.0  ;;  %v793_v61 = vmul.f32 %v1308_v19, %v535_v51  ;;  %vm665_vm13 = vcmp.ge.f32.partialorder %v536_v52, 0.0  ;;  %v247_v38 = vld [vmem:[%s1288_s27 + $0x140] sm:$0xff] }
  0x38   : > { %1048 = vst [vmem:[%s1335_s30 + $0xd8] sm:$0xff] %v920_v56  ;;  %v794_v62 = vmul.f32 %v1308_v19, %v536_v52  ;;  %v537_v63 = vmul.f32 %v1303_v16, %v387_v57  ;;  %v538_v0 = vmul.f32 %v1312_v22, %v388_v58  ;;  %v389_v1 = vsub.f32 %v239_v53, %v1290_v8  ;;  %v251_v56 = vld [vmem:[%s1288_s27 + $0x160] sm:$0xff]  ;;  %v252_v57 = vld [vmem:[%s1288_s27 + $0x168] sm:$0xff] }
  0x39   : > { %v390_v2 = vsub.f32 %v240_v54, %v1294_v10  ;;  %v921_v3 = vsel %vm664_vm12, %v535_v51, %v793_v61  ;;  %v391_v5 = vsub.f32 %v241_v59, %v1301_v15  ;;  %v392_v6 = vsub.f32 %v242_v60, %v1305_v17 }
  0x3a   : > { %v922_v4 = vsel %vm665_vm13, %v536_v52, %v794_v62  ;;  %1049 = vst [vmem:[%s1335_s30 + $0xe0] sm:$0xff] %v921_v3  ;;  %vm666_vm14 = vcmp.ge.f32.partialorder %v537_v63, 0.0  ;;  %v795_v13 = vmul.f32 %v1308_v19, %v537_v63  ;;  %vm667_vm15 = vcmp.ge.f32.partialorder %v538_v0, 0.0 }
  0x3b   : > { %1050 = vst [vmem:[%s1335_s30 + $0xe8] sm:$0xff] %v922_v4  ;;  %v796_v14 = vmul.f32 %v1308_v19, %v538_v0  ;;  %v539_v18 = vmul.f32 %v1292_v9, %v389_v1  ;;  %v540_v20 = vmul.f32 %v1296_v11, %v390_v2  ;;  %v541_v21 = vmul.f32 %v1303_v16, %v391_v5 }
  0x3c   : > { %v542_v23 = vmul.f32 %v1312_v22, %v392_v6  ;;  %v923_v24 = vsel %vm666_vm14, %v537_v63, %v795_v13  ;;  %v393_v26 = vsub.f32 %v243_v7, %v1290_v8  ;;  %v394_v27 = vsub.f32 %v244_v12, %v1294_v10  ;;  %v253_v6 = vld [vmem:[%s1288_s27 + $0x170] sm:$0xff]  ;;  %v254_v7 = vld [vmem:[%s1288_s27 + $0x178] sm:$0xff] }
  0x3d   : > { %v924_v25 = vsel %vm667_vm15, %v538_v0, %v796_v14  ;;  %1051 = vst [vmem:[%s1335_s30 + $0xf0] sm:$0xff] %v923_v24  ;;  %vm668_vm0 = vcmp.ge.f32.partialorder %v539_v18, 0.0  ;;  %v797_v28 = vmul.f32 %v1308_v19, %v539_v18  ;;  %vm669_vm1 = vcmp.ge.f32.partialorder %v540_v20, 0.0  ;;  %v256_v24 = vld [vmem:[%s1288_s27 + $0x188] sm:$0xff] }
  0x3e   : > { %1052 = vst [vmem:[%s1335_s30 + $0xf8] sm:$0xff] %v924_v25  ;;  %v798_v29 = vmul.f32 %v1308_v19, %v540_v20  ;;  %vm670_vm2 = vcmp.ge.f32.partialorder %v541_v21, 0.0  ;;  %v799_v32 = vmul.f32 %v1308_v19, %v541_v21  ;;  %vm671_vm3 = vcmp.ge.f32.partialorder %v542_v23, 0.0 }
  0x3f   : > { %v800_v33 = vmul.f32 %v1308_v19, %v542_v23  ;;  %v925_v34 = vsel %vm668_vm0, %v539_v18, %v797_v28  ;;  %v543_v36 = vmul.f32 %v1292_v9, %v393_v26  ;;  %v544_v37 = vmul.f32 %v1296_v11, %v394_v27 }
  0x40   : > { %v926_v35 = vsel %vm669_vm1, %v540_v20, %v798_v29  ;;  %1053 = vst [vmem:[%s1335_s30 + $0x100] sm:$0xff] %v925_v34  ;;  %v927_v40 = vsel %vm670_vm2, %v541_v21, %v799_v32  ;;  %v395_v42 = vsub.f32 %v245_v30, %v1301_v15  ;;  %v396_v43 = vsub.f32 %v246_v31, %v1305_v17  ;;  %v257_v29 = vld [vmem:[%s1288_s27 + $0x190] sm:$0xff]  ;;  %v258_v30 = vld [vmem:[%s1288_s27 + $0x198] sm:$0xff] }
  0x41   : > { %1054 = vst [vmem:[%s1335_s30 + $0x108] sm:$0xff] %v926_v35  ;;  %v928_v41 = vsel %vm671_vm3, %v542_v23, %v800_v33  ;;  %1055 = vst [vmem:[%s1335_s30 + $0x110] sm:$0xff] %v927_v40  ;;  %vm672_vm4 = vcmp.ge.f32.partialorder %v543_v36, 0.0  ;;  %v801_v46 = vmul.f32 %v1308_v19, %v543_v36  ;;  %vm673_vm5 = vcmp.ge.f32.partialorder %v544_v37, 0.0  ;;  %v255_v23 = vld [vmem:[%s1288_s27 + $0x180] sm:$0xff] }
  0x42   : > { %1056 = vst [vmem:[%s1335_s30 + $0x118] sm:$0xff] %v928_v41  ;;  %v802_v47 = vmul.f32 %v1308_v19, %v544_v37  ;;  %v545_v48 = vmul.f32 %v1303_v16, %v395_v42  ;;  %v546_v49 = vmul.f32 %v1312_v22, %v396_v43  ;;  %v397_v50 = vsub.f32 %v247_v38, %v1290_v8  ;;  %v259_v41 = vld [vmem:[%s1288_s27 + $0x1a0] sm:$0xff]  ;;  %v260_v42 = vld [vmem:[%s1288_s27 + $0x1a8] sm:$0xff] }
  0x43   : > { %v398_v51 = vsub.f32 %v248_v39, %v1294_v10  ;;  %v929_v52 = vsel %vm672_vm4, %v543_v36, %v801_v46  ;;  %v399_v54 = vsub.f32 %v249_v44, %v1301_v15  ;;  %v400_v55 = vsub.f32 %v250_v45, %v1305_v17 }
  0x44   : > { %v930_v53 = vsel %vm673_vm5, %v544_v37, %v802_v47  ;;  %1057 = vst [vmem:[%s1335_s30 + $0x120] sm:$0xff] %v929_v52  ;;  %vm674_vm6 = vcmp.ge.f32.partialorder %v545_v48, 0.0  ;;  %v803_v58 = vmul.f32 %v1308_v19, %v545_v48  ;;  %vm675_vm7 = vcmp.ge.f32.partialorder %v546_v49, 0.0 }
  0x45   : > { %1058 = vst [vmem:[%s1335_s30 + $0x128] sm:$0xff] %v930_v53  ;;  %v804_v59 = vmul.f32 %v1308_v19, %v546_v49  ;;  %v547_v60 = vmul.f32 %v1292_v9, %v397_v50  ;;  %v548_v61 = vmul.f32 %v1296_v11, %v398_v51  ;;  %v549_v62 = vmul.f32 %v1303_v16, %v399_v54 }
  0x46   : > { %v550_v63 = vmul.f32 %v1312_v22, %v400_v55  ;;  %v931_v0 = vsel %vm674_vm6, %v545_v48, %v803_v58  ;;  %v401_v2 = vsub.f32 %v251_v56, %v1290_v8  ;;  %v402_v3 = vsub.f32 %v252_v57, %v1294_v10  ;;  %v261_v55 = vld [vmem:[%s1288_s27 + $0x1b0] sm:$0xff]  ;;  %v262_v56 = vld [vmem:[%s1288_s27 + $0x1b8] sm:$0xff] }
  0x47   : > { %v932_v1 = vsel %vm675_vm7, %v546_v49, %v804_v59  ;;  %1059 = vst [vmem:[%s1335_s30 + $0x130] sm:$0xff] %v931_v0  ;;  %vm676_vm8 = vcmp.ge.f32.partialorder %v547_v60, 0.0  ;;  %v805_v4 = vmul.f32 %v1308_v19, %v547_v60  ;;  %vm677_vm9 = vcmp.ge.f32.partialorder %v548_v61, 0.0  ;;  %v264_v0 = vld [vmem:[%s1288_s27 + $0x1c8] sm:$0xff] }
  0x48   : > { %1060 = vst [vmem:[%s1335_s30 + $0x138] sm:$0xff] %v932_v1  ;;  %v806_v5 = vmul.f32 %v1308_v19, %v548_v61  ;;  %vm678_vm10 = vcmp.ge.f32.partialorder %v549_v62, 0.0  ;;  %v807_v12 = vmul.f32 %v1308_v19, %v549_v62  ;;  %vm679_vm11 = vcmp.ge.f32.partialorder %v550_v63, 0.0 }
  0x49   : > { %v808_v13 = vmul.f32 %v1308_v19, %v550_v63  ;;  %v933_v14 = vsel %vm676_vm8, %v547_v60, %v805_v4  ;;  %v551_v20 = vmul.f32 %v1292_v9, %v401_v2  ;;  %v552_v21 = vmul.f32 %v1296_v11, %v402_v3 }
  0x4a   : > { %v934_v18 = vsel %vm677_vm9, %v548_v61, %v806_v5  ;;  %1061 = vst [vmem:[%s1335_s30 + $0x140] sm:$0xff] %v933_v14  ;;  %v935_v25 = vsel %vm678_vm10, %v549_v62, %v807_v12  ;;  %v403_v27 = vsub.f32 %v253_v6, %v1301_v15  ;;  %v404_v28 = vsub.f32 %v254_v7, %v1305_v17  ;;  %v265_v5 = vld [vmem:[%s1288_s27 + $0x1d0] sm:$0xff]  ;;  %v266_v6 = vld [vmem:[%s1288_s27 + $0x1d8] sm:$0xff] }
  0x4b   : > { %1062 = vst [vmem:[%s1335_s30 + $0x148] sm:$0xff] %v934_v18  ;;  %v936_v26 = vsel %vm679_vm11, %v550_v63, %v808_v13  ;;  %1063 = vst [vmem:[%s1335_s30 + $0x150] sm:$0xff] %v935_v25  ;;  %vm680_vm12 = vcmp.ge.f32.partialorder %v551_v20, 0.0  ;;  %v809_v31 = vmul.f32 %v1308_v19, %v551_v20  ;;  %vm681_vm13 = vcmp.ge.f32.partialorder %v552_v21, 0.0  ;;  %v263_v63 = vld [vmem:[%s1288_s27 + $0x1c0] sm:$0xff] }
  0x4c   : > { %1064 = vst [vmem:[%s1335_s30 + $0x158] sm:$0xff] %v936_v26  ;;  %v810_v32 = vmul.f32 %v1308_v19, %v552_v21  ;;  %v553_v33 = vmul.f32 %v1303_v16, %v403_v27  ;;  %v554_v34 = vmul.f32 %v1312_v22, %v404_v28  ;;  %v405_v35 = vsub.f32 %v255_v23, %v1290_v8  ;;  %v267_v26 = vld [vmem:[%s1288_s27 + $0x1e0] sm:$0xff]  ;;  %v268_v27 = vld [vmem:[%s1288_s27 + $0x1e8] sm:$0xff] }
  0x4d   : > { %v406_v36 = vsub.f32 %v256_v24, %v1294_v10  ;;  %v937_v37 = vsel %vm680_vm12, %v551_v20, %v809_v31  ;;  %v407_v39 = vsub.f32 %v257_v29, %v1301_v15  ;;  %v408_v40 = vsub.f32 %v258_v30, %v1305_v17 }
  0x4e   : > { %v938_v38 = vsel %vm681_vm13, %v552_v21, %v810_v32  ;;  %1065 = vst [vmem:[%s1335_s30 + $0x160] sm:$0xff] %v937_v37  ;;  %vm682_vm14 = vcmp.ge.f32.partialorder %v553_v33, 0.0  ;;  %v811_v43 = vmul.f32 %v1308_v19, %v553_v33  ;;  %vm683_vm15 = vcmp.ge.f32.partialorder %v554_v34, 0.0 }
  0x4f   : > { %1066 = vst [vmem:[%s1335_s30 + $0x168] sm:$0xff] %v938_v38  ;;  %v812_v44 = vmul.f32 %v1308_v19, %v554_v34  ;;  %v555_v45 = vmul.f32 %v1292_v9, %v405_v35  ;;  %v556_v46 = vmul.f32 %v1296_v11, %v406_v36  ;;  %v557_v47 = vmul.f32 %v1303_v16, %v407_v39 }
  0x50   : > { %v558_v48 = vmul.f32 %v1312_v22, %v408_v40  ;;  %v939_v49 = vsel %vm682_vm14, %v553_v33, %v811_v43  ;;  %v409_v51 = vsub.f32 %v259_v41, %v1290_v8  ;;  %v410_v52 = vsub.f32 %v260_v42, %v1294_v10  ;;  %v269_v40 = vld [vmem:[%s1288_s27 + $0x1f0] sm:$0xff]  ;;  %v270_v41 = vld [vmem:[%s1288_s27 + $0x1f8] sm:$0xff] }
  0x51   : > { %v940_v50 = vsel %vm683_vm15, %v554_v34, %v812_v44  ;;  %1067 = vst [vmem:[%s1335_s30 + $0x170] sm:$0xff] %v939_v49  ;;  %vm684_vm0 = vcmp.ge.f32.partialorder %v555_v45, 0.0  ;;  %v813_v53 = vmul.f32 %v1308_v19, %v555_v45  ;;  %vm685_vm1 = vcmp.ge.f32.partialorder %v556_v46, 0.0  ;;  %v272_v49 = vld [vmem:[%s1288_s27 + $0x208] sm:$0xff] }
  0x52   : > { %1068 = vst [vmem:[%s1335_s30 + $0x178] sm:$0xff] %v940_v50  ;;  %v814_v54 = vmul.f32 %v1308_v19, %v556_v46  ;;  %vm686_vm2 = vcmp.ge.f32.partialorder %v557_v47, 0.0  ;;  %v815_v57 = vmul.f32 %v1308_v19, %v557_v47  ;;  %vm687_vm3 = vcmp.ge.f32.partialorder %v558_v48, 0.0 }
  0x53   : > { %v816_v58 = vmul.f32 %v1308_v19, %v558_v48  ;;  %v941_v59 = vsel %vm684_vm0, %v555_v45, %v813_v53  ;;  %v559_v61 = vmul.f32 %v1292_v9, %v409_v51  ;;  %v560_v62 = vmul.f32 %v1296_v11, %v410_v52 }
  0x54   : > { %v942_v60 = vsel %vm685_vm1, %v556_v46, %v814_v54  ;;  %1069 = vst [vmem:[%s1335_s30 + $0x180] sm:$0xff] %v941_v59  ;;  %v943_v1 = vsel %vm686_vm2, %v557_v47, %v815_v57  ;;  %v411_v3 = vsub.f32 %v261_v55, %v1301_v15  ;;  %v412_v4 = vsub.f32 %v262_v56, %v1305_v17  ;;  %v273_v54 = vld [vmem:[%s1288_s27 + $0x210] sm:$0xff]  ;;  %v274_v55 = vld [vmem:[%s1288_s27 + $0x218] sm:$0xff] }
  0x55   : > { %1070 = vst [vmem:[%s1335_s30 + $0x188] sm:$0xff] %v942_v60  ;;  %v944_v2 = vsel %vm687_vm3, %v558_v48, %v816_v58  ;;  %1071 = vst [vmem:[%s1335_s30 + $0x190] sm:$0xff] %v943_v1  ;;  %vm688_vm4 = vcmp.ge.f32.partialorder %v559_v61, 0.0  ;;  %v817_v7 = vmul.f32 %v1308_v19, %v559_v61  ;;  %vm689_vm5 = vcmp.ge.f32.partialorder %v560_v62, 0.0  ;;  %v271_v48 = vld [vmem:[%s1288_s27 + $0x200] sm:$0xff] }
  0x56   : > { %1072 = vst [vmem:[%s1335_s30 + $0x198] sm:$0xff] %v944_v2  ;;  %v818_v12 = vmul.f32 %v1308_v19, %v560_v62  ;;  %v561_v13 = vmul.f32 %v1303_v16, %v411_v3  ;;  %v562_v14 = vmul.f32 %v1312_v22, %v412_v4  ;;  %v413_v18 = vsub.f32 %v263_v63, %v1290_v8  ;;  %v275_v2 = vld [vmem:[%s1288_s27 + $0x220] sm:$0xff]  ;;  %v276_v3 = vld [vmem:[%s1288_s27 + $0x228] sm:$0xff] }
  0x57   : > { %v414_v20 = vsub.f32 %v264_v0, %v1294_v10  ;;  %v945_v21 = vsel %vm688_vm4, %v559_v61, %v817_v7  ;;  %v415_v24 = vsub.f32 %v265_v5, %v1301_v15  ;;  %v416_v25 = vsub.f32 %v266_v6, %v1305_v17 }
  0x58   : > { %v946_v23 = vsel %vm689_vm5, %v560_v62, %v818_v12  ;;  %1073 = vst [vmem:[%s1335_s30 + $0x1a0] sm:$0xff] %v945_v21  ;;  %vm690_vm6 = vcmp.ge.f32.partialorder %v561_v13, 0.0  ;;  %v819_v28 = vmul.f32 %v1308_v19, %v561_v13  ;;  %vm691_vm7 = vcmp.ge.f32.partialorder %v562_v14, 0.0 }
  0x59   : > { %1074 = vst [vmem:[%s1335_s30 + $0x1a8] sm:$0xff] %v946_v23  ;;  %v820_v29 = vmul.f32 %v1308_v19, %v562_v14  ;;  %v563_v30 = vmul.f32 %v1292_v9, %v413_v18  ;;  %v564_v31 = vmul.f32 %v1296_v11, %v414_v20  ;;  %v565_v32 = vmul.f32 %v1303_v16, %v415_v24 }
  0x5a   : > { %v566_v33 = vmul.f32 %v1312_v22, %v416_v25  ;;  %v947_v34 = vsel %vm690_vm6, %v561_v13, %v819_v28  ;;  %v417_v36 = vsub.f32 %v267_v26, %v1290_v8  ;;  %v418_v37 = vsub.f32 %v268_v27, %v1294_v10  ;;  %v277_v25 = vld [vmem:[%s1288_s27 + $0x230] sm:$0xff]  ;;  %v278_v26 = vld [vmem:[%s1288_s27 + $0x238] sm:$0xff] }
  0x5b   : > { %v948_v35 = vsel %vm691_vm7, %v562_v14, %v820_v29  ;;  %1075 = vst [vmem:[%s1335_s30 + $0x1b0] sm:$0xff] %v947_v34  ;;  %vm692_vm8 = vcmp.ge.f32.partialorder %v563_v30, 0.0  ;;  %v821_v38 = vmul.f32 %v1308_v19, %v563_v30  ;;  %vm693_vm9 = vcmp.ge.f32.partialorder %v564_v31, 0.0  ;;  %v280_v34 = vld [vmem:[%s1288_s27 + $0x248] sm:$0xff] }
  0x5c   : > { %1076 = vst [vmem:[%s1335_s30 + $0x1b8] sm:$0xff] %v948_v35  ;;  %v822_v39 = vmul.f32 %v1308_v19, %v564_v31  ;;  %vm694_vm10 = vcmp.ge.f32.partialorder %v565_v32, 0.0  ;;  %v823_v42 = vmul.f32 %v1308_v19, %v565_v32  ;;  %vm695_vm11 = vcmp.ge.f32.partialorder %v566_v33, 0.0 }
  0x5d   : > { %v824_v43 = vmul.f32 %v1308_v19, %v566_v33  ;;  %v949_v44 = vsel %vm692_vm8, %v563_v30, %v821_v38  ;;  %v567_v46 = vmul.f32 %v1292_v9, %v417_v36  ;;  %v568_v47 = vmul.f32 %v1296_v11, %v418_v37 }
  0x5e   : > { %v950_v45 = vsel %vm693_vm9, %v564_v31, %v822_v39  ;;  %1077 = vst [vmem:[%s1335_s30 + $0x1c0] sm:$0xff] %v949_v44  ;;  %v951_v50 = vsel %vm694_vm10, %v565_v32, %v823_v42  ;;  %v419_v52 = vsub.f32 %v269_v40, %v1301_v15  ;;  %v420_v53 = vsub.f32 %v270_v41, %v1305_v17  ;;  %v281_v39 = vld [vmem:[%s1288_s27 + $0x250] sm:$0xff]  ;;  %v282_v40 = vld [vmem:[%s1288_s27 + $0x258] sm:$0xff] }
  0x5f   : > { %1078 = vst [vmem:[%s1335_s30 + $0x1c8] sm:$0xff] %v950_v45  ;;  %v952_v51 = vsel %vm695_vm11, %v566_v33, %v824_v43  ;;  %1079 = vst [vmem:[%s1335_s30 + $0x1d0] sm:$0xff] %v951_v50  ;;  %vm696_vm12 = vcmp.ge.f32.partialorder %v567_v46, 0.0  ;;  %v825_v56 = vmul.f32 %v1308_v19, %v567_v46  ;;  %vm697_vm13 = vcmp.ge.f32.partialorder %v568_v47, 0.0  ;;  %v279_v33 = vld [vmem:[%s1288_s27 + $0x240] sm:$0xff] }
  0x60   : > { %1080 = vst [vmem:[%s1335_s30 + $0x1d8] sm:$0xff] %v952_v51  ;;  %v826_v57 = vmul.f32 %v1308_v19, %v568_v47  ;;  %v569_v58 = vmul.f32 %v1303_v16, %v419_v52  ;;  %v570_v59 = vmul.f32 %v1312_v22, %v420_v53  ;;  %v421_v60 = vsub.f32 %v271_v48, %v1290_v8  ;;  %v283_v51 = vld [vmem:[%s1288_s27 + $0x260] sm:$0xff]  ;;  %v284_v52 = vld [vmem:[%s1288_s27 + $0x268] sm:$0xff] }
  0x61   : > { %v422_v61 = vsub.f32 %v272_v49, %v1294_v10  ;;  %v953_v62 = vsel %vm696_vm12, %v567_v46, %v825_v56  ;;  %v423_v0 = vsub.f32 %v273_v54, %v1301_v15  ;;  %v424_v1 = vsub.f32 %v274_v55, %v1305_v17 }
  0x62   : > { %v954_v63 = vsel %vm697_vm13, %v568_v47, %v826_v57  ;;  %1081 = vst [vmem:[%s1335_s30 + $0x1e0] sm:$0xff] %v953_v62  ;;  %vm698_vm14 = vcmp.ge.f32.partialorder %v569_v58, 0.0  ;;  %v827_v4 = vmul.f32 %v1308_v19, %v569_v58  ;;  %vm699_vm15 = vcmp.ge.f32.partialorder %v570_v59, 0.0 }
  0x63   : > { %1082 = vst [vmem:[%s1335_s30 + $0x1e8] sm:$0xff] %v954_v63  ;;  %v828_v5 = vmul.f32 %v1308_v19, %v570_v59  ;;  %v571_v6 = vmul.f32 %v1292_v9, %v421_v60  ;;  %v572_v7 = vmul.f32 %v1296_v11, %v422_v61  ;;  %v573_v12 = vmul.f32 %v1303_v16, %v423_v0 }
  0x64   : > { %v574_v13 = vmul.f32 %v1312_v22, %v424_v1  ;;  %v955_v14 = vsel %vm698_vm14, %v569_v58, %v827_v4  ;;  %v425_v20 = vsub.f32 %v275_v2, %v1290_v8  ;;  %v426_v21 = vsub.f32 %v276_v3, %v1294_v10  ;;  %v285_v1 = vld [vmem:[%s1288_s27 + $0x270] sm:$0xff]  ;;  %v286_v2 = vld [vmem:[%s1288_s27 + $0x278] sm:$0xff] }
  0x65   : > { %v956_v18 = vsel %vm699_vm15, %v570_v59, %v828_v5  ;;  %1083 = vst [vmem:[%s1335_s30 + $0x1f0] sm:$0xff] %v955_v14  ;;  %vm700_vm0 = vcmp.ge.f32.partialorder %v571_v6, 0.0  ;;  %v829_v23 = vmul.f32 %v1308_v19, %v571_v6  ;;  %vm701_vm1 = vcmp.ge.f32.partialorder %v572_v7, 0.0  ;;  %v288_v14 = vld [vmem:[%s1288_s27 + $0x288] sm:$0xff] }
  0x66   : > { %1084 = vst [vmem:[%s1335_s30 + $0x1f8] sm:$0xff] %v956_v18  ;;  %v830_v24 = vmul.f32 %v1308_v19, %v572_v7  ;;  %vm702_vm2 = vcmp.ge.f32.partialorder %v573_v12, 0.0  ;;  %v831_v27 = vmul.f32 %v1308_v19, %v573_v12  ;;  %vm703_vm3 = vcmp.ge.f32.partialorder %v574_v13, 0.0 }
  0x67   : > { %v832_v28 = vmul.f32 %v1308_v19, %v574_v13  ;;  %v957_v29 = vsel %vm700_vm0, %v571_v6, %v829_v23  ;;  %v575_v31 = vmul.f32 %v1292_v9, %v425_v20  ;;  %v576_v32 = vmul.f32 %v1296_v11, %v426_v21 }
  0x68   : > { %v958_v30 = vsel %vm701_vm1, %v572_v7, %v830_v24  ;;  %1085 = vst [vmem:[%s1335_s30 + $0x200] sm:$0xff] %v957_v29  ;;  %v959_v35 = vsel %vm702_vm2, %v573_v12, %v831_v27  ;;  %v427_v37 = vsub.f32 %v277_v25, %v1301_v15  ;;  %v428_v38 = vsub.f32 %v278_v26, %v1305_v17  ;;  %v289_v24 = vld [vmem:[%s1288_s27 + $0x290] sm:$0xff]  ;;  %v290_v25 = vld [vmem:[%s1288_s27 + $0x298] sm:$0xff] }
  0x69   : > { %1086 = vst [vmem:[%s1335_s30 + $0x208] sm:$0xff] %v958_v30  ;;  %v960_v36 = vsel %vm703_vm3, %v574_v13, %v832_v28  ;;  %1087 = vst [vmem:[%s1335_s30 + $0x210] sm:$0xff] %v959_v35  ;;  %vm704_vm4 = vcmp.ge.f32.partialorder %v575_v31, 0.0  ;;  %v833_v41 = vmul.f32 %v1308_v19, %v575_v31  ;;  %vm705_vm5 = vcmp.ge.f32.partialorder %v576_v32, 0.0  ;;  %v287_v13 = vld [vmem:[%s1288_s27 + $0x280] sm:$0xff] }
  0x6a   : > { %1088 = vst [vmem:[%s1335_s30 + $0x218] sm:$0xff] %v960_v36  ;;  %v834_v42 = vmul.f32 %v1308_v19, %v576_v32  ;;  %v577_v43 = vmul.f32 %v1303_v16, %v427_v37  ;;  %v578_v44 = vmul.f32 %v1312_v22, %v428_v38  ;;  %v429_v45 = vsub.f32 %v279_v33, %v1290_v8  ;;  %v291_v36 = vld [vmem:[%s1288_s27 + $0x2a0] sm:$0xff]  ;;  %v292_v37 = vld [vmem:[%s1288_s27 + $0x2a8] sm:$0xff] }
  0x6b   : > { %v430_v46 = vsub.f32 %v280_v34, %v1294_v10  ;;  %v961_v47 = vsel %vm704_vm4, %v575_v31, %v833_v41  ;;  %v431_v49 = vsub.f32 %v281_v39, %v1301_v15  ;;  %v432_v50 = vsub.f32 %v282_v40, %v1305_v17 }
  0x6c   : > { %v962_v48 = vsel %vm705_vm5, %v576_v32, %v834_v42  ;;  %1089 = vst [vmem:[%s1335_s30 + $0x220] sm:$0xff] %v961_v47  ;;  %vm706_vm6 = vcmp.ge.f32.partialorder %v577_v43, 0.0  ;;  %v835_v53 = vmul.f32 %v1308_v19, %v577_v43  ;;  %vm707_vm7 = vcmp.ge.f32.partialorder %v578_v44, 0.0 }
  0x6d   : > { %1090 = vst [vmem:[%s1335_s30 + $0x228] sm:$0xff] %v962_v48  ;;  %v836_v54 = vmul.f32 %v1308_v19, %v578_v44  ;;  %v579_v55 = vmul.f32 %v1292_v9, %v429_v45  ;;  %v580_v56 = vmul.f32 %v1296_v11, %v430_v46  ;;  %v581_v57 = vmul.f32 %v1303_v16, %v431_v49 }
  0x6e   : > { %v582_v58 = vmul.f32 %v1312_v22, %v432_v50  ;;  %v963_v59 = vsel %vm706_vm6, %v577_v43, %v835_v53  ;;  %v433_v61 = vsub.f32 %v283_v51, %v1290_v8  ;;  %v434_v62 = vsub.f32 %v284_v52, %v1294_v10  ;;  %v293_v50 = vld [vmem:[%s1288_s27 + $0x2b0] sm:$0xff]  ;;  %v294_v51 = vld [vmem:[%s1288_s27 + $0x2b8] sm:$0xff] }
  0x6f   : > { %v964_v60 = vsel %vm707_vm7, %v578_v44, %v836_v54  ;;  %1091 = vst [vmem:[%s1335_s30 + $0x230] sm:$0xff] %v963_v59  ;;  %vm708_vm8 = vcmp.ge.f32.partialorder %v579_v55, 0.0  ;;  %v837_v63 = vmul.f32 %v1308_v19, %v579_v55  ;;  %vm709_vm9 = vcmp.ge.f32.partialorder %v580_v56, 0.0  ;;  %v296_v59 = vld [vmem:[%s1288_s27 + $0x2c8] sm:$0xff] }
  0x70   : > { %1092 = vst [vmem:[%s1335_s30 + $0x238] sm:$0xff] %v964_v60  ;;  %v838_v0 = vmul.f32 %v1308_v19, %v580_v56  ;;  %vm710_vm10 = vcmp.ge.f32.partialorder %v581_v57, 0.0  ;;  %v839_v3 = vmul.f32 %v1308_v19, %v581_v57  ;;  %vm711_vm11 = vcmp.ge.f32.partialorder %v582_v58, 0.0 }
  0x71   : > { %v840_v4 = vmul.f32 %v1308_v19, %v582_v58  ;;  %v965_v5 = vsel %vm708_vm8, %v579_v55, %v837_v63  ;;  %v583_v7 = vmul.f32 %v1292_v9, %v433_v61  ;;  %v584_v12 = vmul.f32 %v1296_v11, %v434_v62 }
  0x72   : > { %v966_v6 = vsel %vm709_vm9, %v580_v56, %v838_v0  ;;  %1093 = vst [vmem:[%s1335_s30 + $0x240] sm:$0xff] %v965_v5  ;;  %v967_v18 = vsel %vm710_vm10, %v581_v57, %v839_v3  ;;  %v435_v21 = vsub.f32 %v285_v1, %v1301_v15  ;;  %v436_v23 = vsub.f32 %v286_v2, %v1305_v17  ;;  %v297_v0 = vld [vmem:[%s1288_s27 + $0x2d0] sm:$0xff]  ;;  %v298_v1 = vld [vmem:[%s1288_s27 + $0x2d8] sm:$0xff] }
  0x73   : > { %1094 = vst [vmem:[%s1335_s30 + $0x248] sm:$0xff] %v966_v6  ;;  %v968_v20 = vsel %vm711_vm11, %v582_v58, %v840_v4  ;;  %1095 = vst [vmem:[%s1335_s30 + $0x250] sm:$0xff] %v967_v18  ;;  %vm712_vm12 = vcmp.ge.f32.partialorder %v583_v7, 0.0  ;;  %v841_v26 = vmul.f32 %v1308_v19, %v583_v7  ;;  %vm713_vm13 = vcmp.ge.f32.partialorder %v584_v12, 0.0  ;;  %v295_v58 = vld [vmem:[%s1288_s27 + $0x2c0] sm:$0xff] }
  0x74   : > { %1096 = vst [vmem:[%s1335_s30 + $0x258] sm:$0xff] %v968_v20  ;;  %v842_v27 = vmul.f32 %v1308_v19, %v584_v12  ;;  %v585_v28 = vmul.f32 %v1303_v16, %v435_v21  ;;  %v586_v29 = vmul.f32 %v1312_v22, %v436_v23  ;;  %v437_v30 = vsub.f32 %v287_v13, %v1290_v8  ;;  %v299_v20 = vld [vmem:[%s1288_s27 + $0x2e0] sm:$0xff]  ;;  %v300_v21 = vld [vmem:[%s1288_s27 + $0x2e8] sm:$0xff] }
  0x75   : > { %v438_v31 = vsub.f32 %v288_v14, %v1294_v10  ;;  %v969_v32 = vsel %vm712_vm12, %v583_v7, %v841_v26  ;;  %v439_v34 = vsub.f32 %v289_v24, %v1301_v15  ;;  %v440_v35 = vsub.f32 %v290_v25, %v1305_v17 }
  0x76   : > { %v970_v33 = vsel %vm713_vm13, %v584_v12, %v842_v27  ;;  %1097 = vst [vmem:[%s1335_s30 + $0x260] sm:$0xff] %v969_v32  ;;  %vm714_vm14 = vcmp.ge.f32.partialorder %v585_v28, 0.0  ;;  %v843_v38 = vmul.f32 %v1308_v19, %v585_v28  ;;  %vm715_vm15 = vcmp.ge.f32.partialorder %v586_v29, 0.0 }
  0x77   : > { %1098 = vst [vmem:[%s1335_s30 + $0x268] sm:$0xff] %v970_v33  ;;  %v844_v39 = vmul.f32 %v1308_v19, %v586_v29  ;;  %v587_v40 = vmul.f32 %v1292_v9, %v437_v30  ;;  %v588_v41 = vmul.f32 %v1296_v11, %v438_v31  ;;  %v589_v42 = vmul.f32 %v1303_v16, %v439_v34 }
  0x78   : > { %v590_v43 = vmul.f32 %v1312_v22, %v440_v35  ;;  %v971_v44 = vsel %vm714_vm14, %v585_v28, %v843_v38  ;;  %v441_v46 = vsub.f32 %v291_v36, %v1290_v8  ;;  %v442_v47 = vsub.f32 %v292_v37, %v1294_v10  ;;  %v301_v35 = vld [vmem:[%s1288_s27 + $0x2f0] sm:$0xff]  ;;  %v302_v36 = vld [vmem:[%s1288_s27 + $0x2f8] sm:$0xff] }
  0x79   : > { %v972_v45 = vsel %vm715_vm15, %v586_v29, %v844_v39  ;;  %1099 = vst [vmem:[%s1335_s30 + $0x270] sm:$0xff] %v971_v44  ;;  %vm716_vm0 = vcmp.ge.f32.partialorder %v587_v40, 0.0  ;;  %v845_v48 = vmul.f32 %v1308_v19, %v587_v40  ;;  %vm717_vm1 = vcmp.ge.f32.partialorder %v588_v41, 0.0  ;;  %v304_v44 = vld [vmem:[%s1288_s27 + $0x308] sm:$0xff] }
  0x7a   : > { %1100 = vst [vmem:[%s1335_s30 + $0x278] sm:$0xff] %v972_v45  ;;  %v846_v49 = vmul.f32 %v1308_v19, %v588_v41  ;;  %vm718_vm2 = vcmp.ge.f32.partialorder %v589_v42, 0.0  ;;  %v847_v52 = vmul.f32 %v1308_v19, %v589_v42  ;;  %vm719_vm3 = vcmp.ge.f32.partialorder %v590_v43, 0.0 }
  0x7b   : > { %v848_v53 = vmul.f32 %v1308_v19, %v590_v43  ;;  %v973_v54 = vsel %vm716_vm0, %v587_v40, %v845_v48  ;;  %v591_v56 = vmul.f32 %v1292_v9, %v441_v46  ;;  %v592_v57 = vmul.f32 %v1296_v11, %v442_v47 }
  0x7c   : > { %v974_v55 = vsel %vm717_vm1, %v588_v41, %v846_v49  ;;  %1101 = vst [vmem:[%s1335_s30 + $0x280] sm:$0xff] %v973_v54  ;;  %v975_v60 = vsel %vm718_vm2, %v589_v42, %v847_v52  ;;  %v443_v62 = vsub.f32 %v293_v50, %v1301_v15  ;;  %v444_v63 = vsub.f32 %v294_v51, %v1305_v17  ;;  %v305_v49 = vld [vmem:[%s1288_s27 + $0x310] sm:$0xff]  ;;  %v306_v50 = vld [vmem:[%s1288_s27 + $0x318] sm:$0xff] }
  0x7d   : > { %1102 = vst [vmem:[%s1335_s30 + $0x288] sm:$0xff] %v974_v55  ;;  %v976_v61 = vsel %vm719_vm3, %v590_v43, %v848_v53  ;;  %1103 = vst [vmem:[%s1335_s30 + $0x290] sm:$0xff] %v975_v60  ;;  %vm720_vm4 = vcmp.ge.f32.partialorder %v591_v56, 0.0  ;;  %v849_v2 = vmul.f32 %v1308_v19, %v591_v56  ;;  %vm721_vm5 = vcmp.ge.f32.partialorder %v592_v57, 0.0  ;;  %v303_v43 = vld [vmem:[%s1288_s27 + $0x300] sm:$0xff] }
  0x7e   : > { %1104 = vst [vmem:[%s1335_s30 + $0x298] sm:$0xff] %v976_v61  ;;  %v850_v3 = vmul.f32 %v1308_v19, %v592_v57  ;;  %v593_v4 = vmul.f32 %v1303_v16, %v443_v62  ;;  %v594_v5 = vmul.f32 %v1312_v22, %v444_v63  ;;  %v445_v6 = vsub.f32 %v295_v58, %v1290_v8  ;;  %v307_v61 = vld [vmem:[%s1288_s27 + $0x320] sm:$0xff]  ;;  %v308_v62 = vld [vmem:[%s1288_s27 + $0x328] sm:$0xff] }
  0x7f   : > { %v446_v7 = vsub.f32 %v296_v59, %v1294_v10  ;;  %v977_v12 = vsel %vm720_vm4, %v591_v56, %v849_v2  ;;  %v447_v14 = vsub.f32 %v297_v0, %v1301_v15  ;;  %v448_v18 = vsub.f32 %v298_v1, %v1305_v17 }
  0x80   : > { %v978_v13 = vsel %vm721_vm5, %v592_v57, %v850_v3  ;;  %1105 = vst [vmem:[%s1335_s30 + $0x2a0] sm:$0xff] %v977_v12  ;;  %vm722_vm6 = vcmp.ge.f32.partialorder %v593_v4, 0.0  ;;  %v851_v23 = vmul.f32 %v1308_v19, %v593_v4  ;;  %vm723_vm7 = vcmp.ge.f32.partialorder %v594_v5, 0.0 }
  0x81   : > { %1106 = vst [vmem:[%s1335_s30 + $0x2a8] sm:$0xff] %v978_v13  ;;  %v852_v24 = vmul.f32 %v1308_v19, %v594_v5  ;;  %v595_v25 = vmul.f32 %v1292_v9, %v445_v6  ;;  %v596_v26 = vmul.f32 %v1296_v11, %v446_v7  ;;  %v597_v27 = vmul.f32 %v1303_v16, %v447_v14 }
  0x82   : > { %v598_v28 = vmul.f32 %v1312_v22, %v448_v18  ;;  %v979_v29 = vsel %vm722_vm6, %v593_v4, %v851_v23  ;;  %v449_v31 = vsub.f32 %v299_v20, %v1290_v8  ;;  %v450_v32 = vsub.f32 %v300_v21, %v1294_v10  ;;  %v309_v18 = vld [vmem:[%s1288_s27 + $0x330] sm:$0xff]  ;;  %v310_v20 = vld [vmem:[%s1288_s27 + $0x338] sm:$0xff] }
  0x83   : > { %v980_v30 = vsel %vm723_vm7, %v594_v5, %v852_v24  ;;  %1107 = vst [vmem:[%s1335_s30 + $0x2b0] sm:$0xff] %v979_v29  ;;  %vm724_vm8 = vcmp.ge.f32.partialorder %v595_v25, 0.0  ;;  %v853_v33 = vmul.f32 %v1308_v19, %v595_v25  ;;  %vm725_vm9 = vcmp.ge.f32.partialorder %v596_v26, 0.0  ;;  %v312_v29 = vld [vmem:[%s1288_s27 + $0x348] sm:$0xff] }
  0x84   : > { %1108 = vst [vmem:[%s1335_s30 + $0x2b8] sm:$0xff] %v980_v30  ;;  %v854_v34 = vmul.f32 %v1308_v19, %v596_v26  ;;  %vm726_vm10 = vcmp.ge.f32.partialorder %v597_v27, 0.0  ;;  %v855_v37 = vmul.f32 %v1308_v19, %v597_v27  ;;  %vm727_vm11 = vcmp.ge.f32.partialorder %v598_v28, 0.0 }
  0x85   : > { %v856_v38 = vmul.f32 %v1308_v19, %v598_v28  ;;  %v981_v39 = vsel %vm724_vm8, %v595_v25, %v853_v33  ;;  %v599_v41 = vmul.f32 %v1292_v9, %v449_v31  ;;  %v600_v42 = vmul.f32 %v1296_v11, %v450_v32 }
  0x86   : > { %v982_v40 = vsel %vm725_vm9, %v596_v26, %v854_v34  ;;  %1109 = vst [vmem:[%s1335_s30 + $0x2c0] sm:$0xff] %v981_v39  ;;  %v983_v45 = vsel %vm726_vm10, %v597_v27, %v855_v37  ;;  %v451_v47 = vsub.f32 %v301_v35, %v1301_v15  ;;  %v452_v48 = vsub.f32 %v302_v36, %v1305_v17  ;;  %v313_v34 = vld [vmem:[%s1288_s27 + $0x350] sm:$0xff]  ;;  %v314_v35 = vld [vmem:[%s1288_s27 + $0x358] sm:$0xff] }
  0x87   : > { %1110 = vst [vmem:[%s1335_s30 + $0x2c8] sm:$0xff] %v982_v40  ;;  %v984_v46 = vsel %vm727_vm11, %v598_v28, %v856_v38  ;;  %1111 = vst [vmem:[%s1335_s30 + $0x2d0] sm:$0xff] %v983_v45  ;;  %vm728_vm12 = vcmp.ge.f32.partialorder %v599_v41, 0.0  ;;  %v857_v51 = vmul.f32 %v1308_v19, %v599_v41  ;;  %vm729_vm13 = vcmp.ge.f32.partialorder %v600_v42, 0.0  ;;  %v311_v28 = vld [vmem:[%s1288_s27 + $0x340] sm:$0xff] }
  0x88   : > { %1112 = vst [vmem:[%s1335_s30 + $0x2d8] sm:$0xff] %v984_v46  ;;  %v858_v52 = vmul.f32 %v1308_v19, %v600_v42  ;;  %v601_v53 = vmul.f32 %v1303_v16, %v451_v47  ;;  %v602_v54 = vmul.f32 %v1312_v22, %v452_v48  ;;  %v453_v55 = vsub.f32 %v303_v43, %v1290_v8  ;;  %v315_v46 = vld [vmem:[%s1288_s27 + $0x360] sm:$0xff]  ;;  %v316_v47 = vld [vmem:[%s1288_s27 + $0x368] sm:$0xff] }
  0x89   : > { %v454_v56 = vsub.f32 %v304_v44, %v1294_v10  ;;  %v985_v57 = vsel %vm728_vm12, %v599_v41, %v857_v51  ;;  %v455_v59 = vsub.f32 %v305_v49, %v1301_v15  ;;  %v456_v60 = vsub.f32 %v306_v50, %v1305_v17 }
  0x8a   : > { %v986_v58 = vsel %vm729_vm13, %v600_v42, %v858_v52  ;;  %1113 = vst [vmem:[%s1335_s30 + $0x2e0] sm:$0xff] %v985_v57  ;;  %vm730_vm14 = vcmp.ge.f32.partialorder %v601_v53, 0.0  ;;  %v859_v63 = vmul.f32 %v1308_v19, %v601_v53  ;;  %vm731_vm15 = vcmp.ge.f32.partialorder %v602_v54, 0.0 }
  0x8b   : > { %1114 = vst [vmem:[%s1335_s30 + $0x2e8] sm:$0xff] %v986_v58  ;;  %v860_v0 = vmul.f32 %v1308_v19, %v602_v54  ;;  %v603_v1 = vmul.f32 %v1292_v9, %v453_v55  ;;  %v604_v2 = vmul.f32 %v1296_v11, %v454_v56  ;;  %v605_v3 = vmul.f32 %v1303_v16, %v455_v59 }
  0x8c   : > { %v606_v4 = vmul.f32 %v1312_v22, %v456_v60  ;;  %v987_v5 = vsel %vm730_vm14, %v601_v53, %v859_v63  ;;  %v457_v7 = vsub.f32 %v307_v61, %v1290_v8  ;;  %v458_v12 = vsub.f32 %v308_v62, %v1294_v10  ;;  %v317_v60 = vld [vmem:[%s1288_s27 + $0x370] sm:$0xff]  ;;  %v318_v61 = vld [vmem:[%s1288_s27 + $0x378] sm:$0xff] }
  0x8d   : > { %v988_v6 = vsel %vm731_vm15, %v602_v54, %v860_v0  ;;  %1115 = vst [vmem:[%s1335_s30 + $0x2f0] sm:$0xff] %v987_v5  ;;  %vm732_vm0 = vcmp.ge.f32.partialorder %v603_v1, 0.0  ;;  %v861_v13 = vmul.f32 %v1308_v19, %v603_v1  ;;  %vm733_vm1 = vcmp.ge.f32.partialorder %v604_v2, 0.0  ;;  %v320_v5 = vld [vmem:[%s1288_s27 + $0x388] sm:$0xff] }
  0x8e   : > { %1116 = vst [vmem:[%s1335_s30 + $0x2f8] sm:$0xff] %v988_v6  ;;  %v862_v14 = vmul.f32 %v1308_v19, %v604_v2  ;;  %vm734_vm2 = vcmp.ge.f32.partialorder %v605_v3, 0.0  ;;  %v863_v21 = vmul.f32 %v1308_v19, %v605_v3  ;;  %vm735_vm3 = vcmp.ge.f32.partialorder %v606_v4, 0.0 }
  0x8f   : > { %v864_v23 = vmul.f32 %v1308_v19, %v606_v4  ;;  %v989_v24 = vsel %vm732_vm0, %v603_v1, %v861_v13  ;;  %v607_v26 = vmul.f32 %v1292_v9, %v457_v7  ;;  %v608_v27 = vmul.f32 %v1296_v11, %v458_v12 }
  0x90   : > { %v990_v25 = vsel %vm733_vm1, %v604_v2, %v862_v14  ;;  %1117 = vst [vmem:[%s1335_s30 + $0x300] sm:$0xff] %v989_v24  ;;  %v991_v30 = vsel %vm734_vm2, %v605_v3, %v863_v21  ;;  %v459_v32 = vsub.f32 %v309_v18, %v1301_v15  ;;  %v460_v33 = vsub.f32 %v310_v20, %v1305_v17  ;;  %v321_v14 = vld [vmem:[%s1288_s27 + $0x390] sm:$0xff]  ;;  %v322_v18 = vld [vmem:[%s1288_s27 + $0x398] sm:$0xff] }
  0x91   : > { %1118 = vst [vmem:[%s1335_s30 + $0x308] sm:$0xff] %v990_v25  ;;  %v992_v31 = vsel %vm735_vm3, %v606_v4, %v864_v23  ;;  %1119 = vst [vmem:[%s1335_s30 + $0x310] sm:$0xff] %v991_v30  ;;  %vm736_vm4 = vcmp.ge.f32.partialorder %v607_v26, 0.0  ;;  %v865_v36 = vmul.f32 %v1308_v19, %v607_v26  ;;  %vm737_vm5 = vcmp.ge.f32.partialorder %v608_v27, 0.0  ;;  %v319_v4 = vld [vmem:[%s1288_s27 + $0x380] sm:$0xff] }
  0x92   : > { %1120 = vst [vmem:[%s1335_s30 + $0x318] sm:$0xff] %v992_v31  ;;  %v866_v37 = vmul.f32 %v1308_v19, %v608_v27  ;;  %v609_v38 = vmul.f32 %v1303_v16, %v459_v32  ;;  %v610_v39 = vmul.f32 %v1312_v22, %v460_v33  ;;  %v461_v40 = vsub.f32 %v311_v28, %v1290_v8  ;;  %v323_v31 = vld [vmem:[%s1288_s27 + $0x3a0] sm:$0xff]  ;;  %v324_v32 = vld [vmem:[%s1288_s27 + $0x3a8] sm:$0xff] }
  0x93   : > { %v462_v41 = vsub.f32 %v312_v29, %v1294_v10  ;;  %v993_v42 = vsel %vm736_vm4, %v607_v26, %v865_v36  ;;  %v463_v44 = vsub.f32 %v313_v34, %v1301_v15  ;;  %v464_v45 = vsub.f32 %v314_v35, %v1305_v17 }
  0x94   : > { %v994_v43 = vsel %vm737_vm5, %v608_v27, %v866_v37  ;;  %1121 = vst [vmem:[%s1335_s30 + $0x320] sm:$0xff] %v993_v42  ;;  %vm738_vm6 = vcmp.ge.f32.partialorder %v609_v38, 0.0  ;;  %v867_v48 = vmul.f32 %v1308_v19, %v609_v38  ;;  %vm739_vm7 = vcmp.ge.f32.partialorder %v610_v39, 0.0 }
  0x95   : > { %1122 = vst [vmem:[%s1335_s30 + $0x328] sm:$0xff] %v994_v43  ;;  %v868_v49 = vmul.f32 %v1308_v19, %v610_v39  ;;  %v611_v50 = vmul.f32 %v1292_v9, %v461_v40  ;;  %v612_v51 = vmul.f32 %v1296_v11, %v462_v41  ;;  %v613_v52 = vmul.f32 %v1303_v16, %v463_v44 }
  0x96   : > { %v614_v53 = vmul.f32 %v1312_v22, %v464_v45  ;;  %v995_v54 = vsel %vm738_vm6, %v609_v38, %v867_v48  ;;  %v465_v56 = vsub.f32 %v315_v46, %v1290_v8  ;;  %v466_v57 = vsub.f32 %v316_v47, %v1294_v10  ;;  %v325_v45 = vld [vmem:[%s1288_s27 + $0x3b0] sm:$0xff]  ;;  %v326_v46 = vld [vmem:[%s1288_s27 + $0x3b8] sm:$0xff] }
  0x97   : > { %v996_v55 = vsel %vm739_vm7, %v610_v39, %v868_v49  ;;  %1123 = vst [vmem:[%s1335_s30 + $0x330] sm:$0xff] %v995_v54  ;;  %vm740_vm8 = vcmp.ge.f32.partialorder %v611_v50, 0.0  ;;  %v869_v58 = vmul.f32 %v1308_v19, %v611_v50  ;;  %vm741_vm9 = vcmp.ge.f32.partialorder %v612_v51, 0.0  ;;  %v328_v54 = vld [vmem:[%s1288_s27 + $0x3c8] sm:$0xff] }
  0x98   : > { %1124 = vst [vmem:[%s1335_s30 + $0x338] sm:$0xff] %v996_v55  ;;  %v870_v59 = vmul.f32 %v1308_v19, %v612_v51  ;;  %vm742_vm10 = vcmp.ge.f32.partialorder %v613_v52, 0.0  ;;  %v871_v62 = vmul.f32 %v1308_v19, %v613_v52  ;;  %vm743_vm11 = vcmp.ge.f32.partialorder %v614_v53, 0.0 }
  0x99   : > { %v872_v63 = vmul.f32 %v1308_v19, %v614_v53  ;;  %v997_v0 = vsel %vm740_vm8, %v611_v50, %v869_v58  ;;  %v615_v2 = vmul.f32 %v1292_v9, %v465_v56  ;;  %v616_v3 = vmul.f32 %v1296_v11, %v466_v57 }
  0x9a   : > { %v998_v1 = vsel %vm741_vm9, %v612_v51, %v870_v59  ;;  %1125 = vst [vmem:[%s1335_s30 + $0x340] sm:$0xff] %v997_v0  ;;  %v999_v6 = vsel %vm742_vm10, %v613_v52, %v871_v62  ;;  %v467_v12 = vsub.f32 %v317_v60, %v1301_v15  ;;  %v468_v13 = vsub.f32 %v318_v61, %v1305_v17  ;;  %v329_v59 = vld [vmem:[%s1288_s27 + $0x3d0] sm:$0xff]  ;;  %v330_v60 = vld [vmem:[%s1288_s27 + $0x3d8] sm:$0xff] }
  0x9b   : > { %1126 = vst [vmem:[%s1335_s30 + $0x348] sm:$0xff] %v998_v1  ;;  %v1000_v7 = vsel %vm743_vm11, %v614_v53, %v872_v63  ;;  %1127 = vst [vmem:[%s1335_s30 + $0x350] sm:$0xff] %v999_v6  ;;  %vm744_vm12 = vcmp.ge.f32.partialorder %v615_v2, 0.0  ;;  %v873_v20 = vmul.f32 %v1308_v19, %v615_v2  ;;  %vm745_vm13 = vcmp.ge.f32.partialorder %v616_v3, 0.0  ;;  %v327_v53 = vld [vmem:[%s1288_s27 + $0x3c0] sm:$0xff] }
  0x9c   : > { %1128 = vst [vmem:[%s1335_s30 + $0x358] sm:$0xff] %v1000_v7  ;;  %v874_v21 = vmul.f32 %v1308_v19, %v616_v3  ;;  %v617_v23 = vmul.f32 %v1303_v16, %v467_v12  ;;  %v618_v24 = vmul.f32 %v1312_v22, %v468_v13  ;;  %v469_v25 = vsub.f32 %v319_v4, %v1290_v8  ;;  %v331_v7 = vld [vmem:[%s1288_s27 + $0x3e0] sm:$0xff]  ;;  %v332_v12 = vld [vmem:[%s1288_s27 + $0x3e8] sm:$0xff] }
  0x9d   : > { %v470_v26 = vsub.f32 %v320_v5, %v1294_v10  ;;  %v1001_v27 = vsel %vm744_vm12, %v615_v2, %v873_v20  ;;  %v471_v29 = vsub.f32 %v321_v14, %v1301_v15  ;;  %v472_v30 = vsub.f32 %v322_v18, %v1305_v17 }
  0x9e   : > { %v1002_v28 = vsel %vm745_vm13, %v616_v3, %v874_v21  ;;  %1129 = vst [vmem:[%s1335_s30 + $0x360] sm:$0xff] %v1001_v27  ;;  %vm746_vm14 = vcmp.ge.f32.partialorder %v617_v23, 0.0  ;;  %v875_v33 = vmul.f32 %v1308_v19, %v617_v23  ;;  %vm747_vm15 = vcmp.ge.f32.partialorder %v618_v24, 0.0 }
  0x9f   : > { %1130 = vst [vmem:[%s1335_s30 + $0x368] sm:$0xff] %v1002_v28  ;;  %v876_v34 = vmul.f32 %v1308_v19, %v618_v24  ;;  %v619_v35 = vmul.f32 %v1292_v9, %v469_v25  ;;  %v620_v36 = vmul.f32 %v1296_v11, %v470_v26  ;;  %v621_v37 = vmul.f32 %v1303_v16, %v471_v29 }
  0xa0   : > { %v622_v38 = vmul.f32 %v1312_v22, %v472_v30  ;;  %v1003_v39 = vsel %vm746_vm14, %v617_v23, %v875_v33  ;;  %v473_v41 = vsub.f32 %v323_v31, %v1290_v8  ;;  %v474_v42 = vsub.f32 %v324_v32, %v1294_v10  ;;  %v333_v30 = vld [vmem:[%s1288_s27 + $0x3f0] sm:$0xff]  ;;  %v334_v31 = vld [vmem:[%s1288_s27 + $0x3f8] sm:$0xff] }
  0xa1   : > { %v1004_v40 = vsel %vm747_vm15, %v618_v24, %v876_v34  ;;  %1131 = vst [vmem:[%s1335_s30 + $0x370] sm:$0xff] %v1003_v39  ;;  %vm748_vm0 = vcmp.ge.f32.partialorder %v619_v35, 0.0  ;;  %v877_v43 = vmul.f32 %v1308_v19, %v619_v35  ;;  %vm749_vm1 = vcmp.ge.f32.partialorder %v620_v36, 0.0 }
  0xa2   : > { %1132 = vst [vmem:[%s1335_s30 + $0x378] sm:$0xff] %v1004_v40  ;;  %v878_v44 = vmul.f32 %v1308_v19, %v620_v36  ;;  %vm750_vm2 = vcmp.ge.f32.partialorder %v621_v37, 0.0  ;;  %v879_v47 = vmul.f32 %v1308_v19, %v621_v37  ;;  %vm751_vm3 = vcmp.ge.f32.partialorder %v622_v38, 0.0 }
  0xa3   : > { %v880_v48 = vmul.f32 %v1308_v19, %v622_v38  ;;  %v1005_v49 = vsel %vm748_vm0, %v619_v35, %v877_v43  ;;  %v623_v51 = vmul.f32 %v1292_v9, %v473_v41  ;;  %v624_v52 = vmul.f32 %v1296_v11, %v474_v42 }
  0xa4   : > { %v1006_v50 = vsel %vm749_vm1, %v620_v36, %v878_v44  ;;  %1133 = vst [vmem:[%s1335_s30 + $0x380] sm:$0xff] %v1005_v49  ;;  %v1007_v55 = vsel %vm750_vm2, %v621_v37, %v879_v47  ;;  %v475_v57 = vsub.f32 %v325_v45, %v1301_v15  ;;  %v476_v58 = vsub.f32 %v326_v46, %v1305_v17 }
  0xa5   : > { %1134 = vst [vmem:[%s1335_s30 + $0x388] sm:$0xff] %v1006_v50  ;;  %v1008_v56 = vsel %vm751_vm3, %v622_v38, %v880_v48  ;;  %1135 = vst [vmem:[%s1335_s30 + $0x390] sm:$0xff] %v1007_v55  ;;  %vm752_vm4 = vcmp.ge.f32.partialorder %v623_v51, 0.0  ;;  %v881_v61 = vmul.f32 %v1308_v19, %v623_v51  ;;  %vm753_vm5 = vcmp.ge.f32.partialorder %v624_v52, 0.0 }
  0xa6   : > { %1136 = vst [vmem:[%s1335_s30 + $0x398] sm:$0xff] %v1008_v56  ;;  %v882_v62 = vmul.f32 %v1308_v19, %v624_v52  ;;  %v625_v63 = vmul.f32 %v1303_v16, %v475_v57  ;;  %v626_v0 = vmul.f32 %v1312_v22, %v476_v58  ;;  %v477_v1 = vsub.f32 %v327_v53, %v1290_v8 }
  0xa7   : > { %v478_v2 = vsub.f32 %v328_v54, %v1294_v10  ;;  %v1009_v3 = vsel %vm752_vm4, %v623_v51, %v881_v61  ;;  %v479_v5 = vsub.f32 %v329_v59, %v1301_v15  ;;  %v480_v6 = vsub.f32 %v330_v60, %v1305_v17 }
  0xa8   : > { %v1010_v4 = vsel %vm753_vm5, %v624_v52, %v882_v62  ;;  %1137 = vst [vmem:[%s1335_s30 + $0x3a0] sm:$0xff] %v1009_v3  ;;  %vm754_vm6 = vcmp.ge.f32.partialorder %v625_v63, 0.0  ;;  %v883_v13 = vmul.f32 %v1308_v19, %v625_v63  ;;  %vm755_vm7 = vcmp.ge.f32.partialorder %v626_v0, 0.0 }
  0xa9   : > { %1138 = vst [vmem:[%s1335_s30 + $0x3a8] sm:$0xff] %v1010_v4  ;;  %v884_v14 = vmul.f32 %v1308_v19, %v626_v0  ;;  %v627_v18 = vmul.f32 %v1292_v9, %v477_v1  ;;  %v628_v20 = vmul.f32 %v1296_v11, %v478_v2  ;;  %v629_v21 = vmul.f32 %v1303_v16, %v479_v5 }
  0xaa   : > { %v630_v23 = vmul.f32 %v1312_v22, %v480_v6  ;;  %v1011_v24 = vsel %vm754_vm6, %v625_v63, %v883_v13  ;;  %v481_v26 = vsub.f32 %v331_v7, %v1290_v8  ;;  %v482_v27 = vsub.f32 %v332_v12, %v1294_v10 }
  0xab   : > { %v1012_v25 = vsel %vm755_vm7, %v626_v0, %v884_v14  ;;  %1139 = vst [vmem:[%s1335_s30 + $0x3b0] sm:$0xff] %v1011_v24  ;;  %vm756_vm8 = vcmp.ge.f32.partialorder %v627_v18, 0.0  ;;  %v885_v28 = vmul.f32 %v1308_v19, %v627_v18  ;;  %vm757_vm9 = vcmp.ge.f32.partialorder %v628_v20, 0.0 }
  0xac   : > { %1140 = vst [vmem:[%s1335_s30 + $0x3b8] sm:$0xff] %v1012_v25  ;;  %v886_v29 = vmul.f32 %v1308_v19, %v628_v20  ;;  %vm758_vm10 = vcmp.ge.f32.partialorder %v629_v21, 0.0  ;;  %v887_v32 = vmul.f32 %v1308_v19, %v629_v21  ;;  %vm759_vm11 = vcmp.ge.f32.partialorder %v630_v23, 0.0 }
  0xad   : > { %v888_v8 = vmul.f32 %v1308_v19, %v630_v23  ;;  %v1013_v10 = vsel %vm756_vm8, %v627_v18, %v885_v28  ;;  %v631_v34 = vmul.f32 %v1292_v9, %v481_v26  ;;  %v632_v35 = vmul.f32 %v1296_v11, %v482_v27 }
  0xae   : > { %v1014_v33 = vsel %vm757_vm9, %v628_v20, %v886_v29  ;;  %1141 = vst [vmem:[%s1335_s30 + $0x3c0] sm:$0xff] %v1013_v10  ;;  %v1015_v36 = vsel %vm758_vm10, %v629_v21, %v887_v32  ;;  %v483_v38 = vsub.f32 %v333_v30, %v1301_v15  ;;  %v484_v39 = vsub.f32 %v334_v31, %v1305_v17 }
  0xaf   : > { %1142 = vst [vmem:[%s1335_s30 + $0x3c8] sm:$0xff] %v1014_v33  ;;  %v1016_v37 = vsel %vm759_vm11, %v630_v23, %v888_v8  ;;  %1143 = vst [vmem:[%s1335_s30 + $0x3d0] sm:$0xff] %v1015_v36  ;;  %vm760_vm12 = vcmp.ge.f32.partialorder %v631_v34, 0.0  ;;  %v889_v40 = vmul.f32 %v1308_v19, %v631_v34  ;;  %vm761_vm13 = vcmp.ge.f32.partialorder %v632_v35, 0.0 }
  0xb0   : > { %1144 = vst [vmem:[%s1335_s30 + $0x3d8] sm:$0xff] %v1016_v37  ;;  %v890_v9 = vmul.f32 %v1308_v19, %v632_v35  ;;  %v633_v11 = vmul.f32 %v1303_v16, %v483_v38  ;;  %v634_v41 = vmul.f32 %v1312_v22, %v484_v39 }
  0xb1   : > { %v1017_v42 = vsel %vm760_vm12, %v631_v34, %v889_v40 }
  0xb2   : > { %v1018_v43 = vsel %vm761_vm13, %v632_v35, %v890_v9  ;;  %1145 = vst [vmem:[%s1335_s30 + $0x3e0] sm:$0xff] %v1017_v42  ;;  %vm762_vm14 = vcmp.ge.f32.partialorder %v633_v11, 0.0  ;;  %v891_v15 = vmul.f32 %v1308_v19, %v633_v11  ;;  %vm763_vm15 = vcmp.ge.f32.partialorder %v634_v41, 0.0 }
  0xb3   : > { %1146 = vst [vmem:[%s1335_s30 + $0x3e8] sm:$0xff] %v1018_v43  ;;  %v892_v17 = vmul.f32 %v1308_v19, %v634_v41 }
  0xb4   : > { %v1019_v44 = vsel %vm762_vm14, %v633_v11, %v891_v15 }
  0xb5   : > { %v1020_v45 = vsel %vm763_vm15, %v634_v41, %v892_v17  ;;  %1147 = vst [vmem:[%s1335_s30 + $0x3f0] sm:$0xff] %v1019_v44 }
  0xb6   : > { %1148 = vst [vmem:[%s1335_s30 + $0x3f8] sm:$0xff] %v1020_v45 }
  0xb7 PF: > { %s15_s17 = sadd.s32 1, %s1236_s17  }
  0xb8   : > { %p12_p4 = scmp.ge.s32.totalorder %s15_s17, 4  }
  0xba   :  { %14 = sbr.rel (!%p12_p4) target bundleno = 2 (0x2), region = 66 }

</bundles_post_ra>
